<compile_context>
chip_gen: v5e
topology: v5e:2x2
jax: 0.10.0
libtpu: 0.0.40
codegen_flags: <defaults>
</compile_context>

<pallas_src>
import functools

import jax
import jax.numpy as jnp
from jax.experimental import pallas as pl
from jax.experimental.pallas import tpu as pltpu

NEG_SLOPE = 0.2
BN_EPS = 1e-5
_INT_MIN = -(2 ** 31)


def _leaky_relu(y):
    return jnp.where(y >= 0, y, NEG_SLOPE * y)


def _vmem_limit_bytes():
    # v5e/v6e: 128 MiB physical VMEM -> 64 MiB scoped request is fine.
    # v7x: only 64 MiB physical -> cap the request at 3/4 of capacity.
    try:
        cap = pltpu.get_tpu_info().vmem_capacity_bytes
        return int(min(64 * 1024 * 1024, (cap * 3) // 4))
    except Exception:
        return 48 * 1024 * 1024


def _compiler_params():
    return pltpu.CompilerParams(
        dimension_semantics=("parallel", "parallel"),
        vmem_limit_bytes=_vmem_limit_bytes(),
    )


def _tiling(n):
    """Row tile (multiple of 8, <=256) and padded point count."""
    if n <= 256:
        tn = -(-n // 8) * 8
        return tn, tn
    tn = 256
    return tn, -(-n // tn) * tn


# ----------------------------------------------------------------------------
# Kernel 1: conv0 (1x1, BN scale folded into bf16 weights) + shift + LeakyReLU,
#           reading the channel-major input directly (input transpose fused),
#           and emitting the g-table for edge-conv stage 1.
# ----------------------------------------------------------------------------
def _head_kernel(x_ref, w0_ref, b0_ref, wg1_ref, a_ref, g_ref):
    x = x_ref[0].astype(jnp.bfloat16)                            # (Cin, TN)
    a = jax.lax.dot_general(x, w0_ref[...], (((0,), (0,)), ((), ())),
                            preferred_element_type=jnp.float32)  # (TN, 512)
    a = _leaky_relu(a + b0_ref[...])
    a_bf = a.astype(jnp.bfloat16)
    a_ref[0] = a_bf
    g_ref[0] = jnp.dot(a_bf, wg1_ref[...],
                       preferred_element_type=jnp.float32).astype(jnp.bfloat16)


def _head(x_pad, w0, b0, wg1, tn):
    B, Cin, Np = x_pad.shape
    c0 = w0.shape[1]
    cg = wg1.shape[1]
    return pl.pallas_call(
        _head_kernel,
        out_shape=(jax.ShapeDtypeStruct((B, Np, c0), jnp.bfloat16),
                   jax.ShapeDtypeStruct((B, Np, cg), jnp.bfloat16)),
        grid=(B, Np // tn),
        in_specs=[
            pl.BlockSpec((1, Cin, tn), lambda b, t: (b, 0, t)),
            pl.BlockSpec((Cin, c0), lambda b, t: (0, 0)),
            pl.BlockSpec((1, c0), lambda b, t: (0, 0)),
            pl.BlockSpec((c0, cg), lambda b, t: (0, 0)),
        ],
        out_specs=(
            pl.BlockSpec((1, tn, c0), lambda b, t: (b, t, 0)),
            pl.BlockSpec((1, tn, cg), lambda b, t: (b, t, 0)),
        ),
        compiler_params=_compiler_params(),
    )(x_pad, w0, b0, wg1)


# ----------------------------------------------------------------------------
# Fused edge-convolution core (per query row tile):
#   bf16 pairwise-distance gram vs. all N points (f32 accumulation)
#   -> packed-int32 top-k (unique per-row argmax, smallest-column tie-break)
#   -> one-hot MXU row-gather from the resident g table
#   -> LeakyReLU(g_nbr + c) and running max over k.
# Neighbor indices never leave the kernel.
# ----------------------------------------------------------------------------
def _edge_core(xq, xa, sq, g, wc, shift, *, k, n_valid):
    # xq (TN, C) bf16, xa (N, C) bf16, sq (1, N) f32, g (N, Cout) bf16,
    # wc (C, Cout) bf16, shift (1, Cout) f32  ->  (TN, Cout) f32
    tn = xq.shape[0]
    n = xa.shape[0]
    cout = wc.shape[1]

    # ranking value: 2<x_i,x_j> - ||x_j||^2  (per-row constant ||x_i||^2 dropped;
    # ranking identical to the reference pairwise distance, self included)
    gram = jax.lax.dot_general(xq, xa, (((1,), (1,)), ((), ())),
                               preferred_element_type=jnp.float32)   # (TN, N)
    d = 2.0 * gram - sq                                              # (TN, N)

    # Pack (distance, column) into one sortable int32 key: order-preserving
    # f32->i32 map, low bits replaced by (n-1-col) so the row max is unique and
    # ties resolve to the smallest column.
    nbits = max((n - 1).bit_length(), 1)
    lowmask = (1 << nbits) - 1
    key = pltpu.bitcast(d, jnp.int32)
    key = jnp.where(key < 0, key ^ jnp.int32(0x7FFFFFFF), key)
    col = jax.lax.broadcasted_iota(jnp.int32, (tn, n), 1)
    key = (key & jnp.int32(~lowmask)) | (jnp.int32(n - 1) - col)
    if n_valid < n:                                   # mask padded points
        key = jnp.where(col < n_valid, key, jnp.int32(_INT_MIN))

    # center term  c_i = x_i @ Wc + shift
    c = jnp.dot(xq, wc, preferred_element_type=jnp.float32) + shift  # (TN, Cout)

    # k x { argmax -> one-hot -> MXU gather of g row -> lrelu -> running max }
    acc = jnp.full((tn, cout), -jnp.inf, dtype=jnp.float32)
    for _ in range(k):
        m = jnp.max(key, axis=-1, keepdims=True)                     # (TN, 1)
        sel = key == m                                               # one hit/row
        key = jnp.where(sel, jnp.int32(_INT_MIN), key)
        onehot = jnp.where(sel, 1.0, 0.0).astype(jnp.bfloat16)       # (TN, N)
        nbr = jnp.dot(onehot, g, preferred_element_type=jnp.float32)  # (TN, Cout)
        acc = jnp.maximum(acc, _leaky_relu(nbr + c))
    return acc


def _edge_mid_kernel(xq_ref, xa_ref, sq_ref, g_ref, wc_ref, sh_ref, wgn_ref,
                     a_ref, gn_ref, *, k, n_valid):
    a = _edge_core(xq_ref[0], xa_ref[0], sq_ref[0], g_ref[0],
                   wc_ref[...], sh_ref[...], k=k, n_valid=n_valid)
    a_bf = a.astype(jnp.bfloat16)
    a_ref[0] = a_bf
    # g table for the next edge-conv stage, produced here to save a pass.
    gn_ref[0] = jnp.dot(a_bf, wgn_ref[...],
                        preferred_element_type=jnp.float32).astype(jnp.bfloat16)


def _edge_last_kernel(xq_ref, xa_ref, sq_ref, g_ref, wc_ref, sh_ref, o_ref,
                      *, k, n_valid):
    a = _edge_core(xq_ref[0], xa_ref[0], sq_ref[0], g_ref[0],
                   wc_ref[...], sh_ref[...], k=k, n_valid=n_valid)
    # fused output transpose: write (Cout, TN) so the wrapper needs no trailing
    # XLA transpose back to the PyTorch NCL layout.
    o_ref[0] = a.T.astype(o_ref.dtype)


def _edge_mid(x, sq, g, wc, shift, wg_next, k, n_valid, tn):
    B, Np, C = x.shape
    cout = wc.shape[1]
    cgn = wg_next.shape[1]
    kernel = functools.partial(_edge_mid_kernel, k=k, n_valid=n_valid)
    return pl.pallas_call(
        kernel,
        out_shape=(jax.ShapeDtypeStruct((B, Np, cout), jnp.bfloat16),
                   jax.ShapeDtypeStruct((B, Np, cgn), jnp.bfloat16)),
        grid=(B, Np // tn),
        in_specs=[
            pl.BlockSpec((1, tn, C), lambda b, t: (b, t, 0)),      # query tile
            pl.BlockSpec((1, Np, C), lambda b, t: (b, 0, 0)),      # all points
            pl.BlockSpec((1, 1, Np), lambda b, t: (b, 0, 0)),      # ||x_j||^2
            pl.BlockSpec((1, Np, cout), lambda b, t: (b, 0, 0)),   # g table
            pl.BlockSpec((C, cout), lambda b, t: (0, 0)),
            pl.BlockSpec((1, cout), lambda b, t: (0, 0)),
            pl.BlockSpec((cout, cgn), lambda b, t: (0, 0)),
        ],
        out_specs=(
            pl.BlockSpec((1, tn, cout), lambda b, t: (b, t, 0)),
            pl.BlockSpec((1, tn, cgn), lambda b, t: (b, t, 0)),
        ),
        compiler_params=_compiler_params(),
    )(x, x, sq, g, wc, shift, wg_next)


def _edge_last(x, sq, g, wc, shift, k, n_valid, tn):
    B, Np, C = x.shape
    cout = wc.shape[1]
    kernel = functools.partial(_edge_last_kernel, k=k, n_valid=n_valid)
    return pl.pallas_call(
        kernel,
        out_shape=jax.ShapeDtypeStruct((B, cout, Np), jnp.float32),
        grid=(B, Np // tn),
        in_specs=[
            pl.BlockSpec((1, tn, C), lambda b, t: (b, t, 0)),
            pl.BlockSpec((1, Np, C), lambda b, t: (b, 0, 0)),
            pl.BlockSpec((1, 1, Np), lambda b, t: (b, 0, 0)),
            pl.BlockSpec((1, Np, cout), lambda b, t: (b, 0, 0)),
            pl.BlockSpec((C, cout), lambda b, t: (0, 0)),
            pl.BlockSpec((1, cout), lambda b, t: (0, 0)),
        ],
        out_specs=pl.BlockSpec((1, cout, tn), lambda b, t: (b, 0, t)),
        compiler_params=_compiler_params(),
    )(x, x, sq, g, wc, shift)


# ----------------------------------------------------------------------------
# Tail forward (input / output in PyTorch NCL layout)
# ----------------------------------------------------------------------------
def tail_forward(x_ncl, params, k):
    B, Cin, N = x_ncl.shape
    assert k <= N, "k must not exceed the number of points"
    tn, n_pad = _tiling(N)
    if n_pad != N:
        x_ncl = jnp.pad(x_ncl, ((0, 0), (0, 0), (0, n_pad - N)))

    c0, e1, e2 = params["conv0"], params["ec1"], params["ec2"]

    a0, g1 = _head(x_ncl, c0["w"], c0["shift"], e1["wg"], tn)         # (B,Np,512)
    sq0 = jnp.sum(jnp.square(a0.astype(jnp.float32)), axis=-1)[:, None, :]
    a1, g2 = _edge_mid(a0, sq0, g1, e1["wc"], e1["shift"], e2["wg"],
                       k, N, tn)                                       # (B,Np,256)
    sq1 = jnp.sum(jnp.square(a1.astype(jnp.float32)), axis=-1)[:, None, :]
    out = _edge_last(a1, sq1, g2, e2["wc"], e2["shift"], k, N, tn)     # (B,128,Np)
    return out[:, :, :N]


# ----------------------------------------------------------------------------
# Deterministic parameter construction (BN folded into the weights on the host)
# ----------------------------------------------------------------------------
def _bn_scale_shift(keys, c):
    kg, kb, km, kv = keys
    gamma = 1.0 + 0.1 * jax.random.normal(kg, (c,), jnp.float32)
    beta = 0.1 * jax.random.normal(kb, (c,), jnp.float32)
    mean = 0.1 * jax.random.normal(km, (c,), jnp.float32)
    var = jnp.abs(jax.random.normal(kv, (c,), jnp.float32)) + 0.5
    scale = gamma / jnp.sqrt(var + BN_EPS)
    shift = beta - mean * scale
    return scale, shift


def init_params(key, in_features):
    ks = jax.random.split(key, 15)

    def conv_w(kk, cin, cout):
        return jax.random.normal(kk, (cin, cout), jnp.float32) / jnp.sqrt(float(cin))

    w0 = conv_w(ks[0], in_features, 512)
    s0, b0 = _bn_scale_shift(ks[1:5], 512)
    conv0 = {"w": (w0 * s0[None, :]).astype(jnp.bfloat16),
             "shift": b0.reshape(1, 512)}

    def edge_params(kw, kbn, cin, cout):
        w = conv_w(kw, 2 * cin, cout)        # rows: [diff-part ; center-part]
        s, b = _bn_scale_shift(kbn, cout)
        w1 = w[:cin] * s[None, :]            # applied to (x_j - x_i)
        w2 = w[cin:] * s[None, :]            # applied to x_i
        return {"wg": w1.astype(jnp.bfloat16),           # neighbor (gathered) term
                "wc": (w2 - w1).astype(jnp.bfloat16),     # center term
                "shift": b.reshape(1, cout)}

    ec1 = edge_params(ks[5], ks[6:10], 512, 256)
    ec2 = edge_params(ks[10], ks[11:15], 256, 128)
    return {"conv0": conv0, "ec1": ec1, "ec2": ec2}


if __name__ == "__main__":
    B, IN_FEATURES, N, K = 2, 64, 32, 8

    key = jax.random.PRNGKey(0)
    k_x, k_p = jax.random.split(key)
    x = jax.random.normal(k_x, (B, IN_FEATURES, N), jnp.float32)   # PyTorch NCL layout
    params = init_params(k_p, IN_FEATURES)

    out = jax.jit(lambda xx: tail_forward(xx, params, K))(x)
    out = jax.block_until_ready(out)

    assert out.shape == (B, 128, N), out.shape
    assert bool(jnp.all(jnp.isfinite(out)))
    print("KERNEL_OK")
</pallas_src>

<mosaic_0001>
module attributes {stable_mosaic.version = 11 : i64} {
  func.func @_head_kernel(%arg0: i32, %arg1: i32, %arg2: memref<1x64x32xf32, #tpu.memory_space<vmem>>, %arg3: memref<64x512xbf16, #tpu.memory_space<vmem>>, %arg4: memref<1x512xf32, #tpu.memory_space<vmem>>, %arg5: memref<512x256xbf16, #tpu.memory_space<vmem>>, %arg6: memref<1x32x512xbf16, #tpu.memory_space<vmem>>, %arg7: memref<1x32x256xbf16, #tpu.memory_space<vmem>>) attributes {dimension_semantics = [#tpu.dimension_semantics<parallel>, #tpu.dimension_semantics<parallel>], iteration_bounds = array<i64: 2, 1>, scalar_prefetch = 0 : i64, scratch_operands = 0 : i64, tpu.core_type = #tpu.core_type<tc>, window_params = [{transform_indices = @transform_0, window_bounds = array<i64: 1, 64, 32>}, {pipeline_mode = #tpu.pipeline_mode<synchronous>, transform_indices = @transform_1, window_bounds = array<i64: 64, 512>}, {pipeline_mode = #tpu.pipeline_mode<synchronous>, transform_indices = @transform_2, window_bounds = array<i64: 1, 512>}, {pipeline_mode = #tpu.pipeline_mode<synchronous>, transform_indices = @transform_3, window_bounds = array<i64: 512, 256>}, {transform_indices = @transform_4, window_bounds = array<i64: 1, 32, 512>}, {transform_indices = @transform_5, window_bounds = array<i64: 1, 32, 256>}]} {
    %c0 = arith.constant 0 : index
    %c0_0 = arith.constant 0 : index
    %c0_1 = arith.constant 0 : index
    %0 = vector.load %arg2[%c0, %c0_0, %c0_1] : memref<1x64x32xf32, #tpu.memory_space<vmem>>, vector<1x64x32xf32>
    %1 = vector.shape_cast %0 : vector<1x64x32xf32> to vector<64x32xf32>
    %2 = arith.truncf %1 : vector<64x32xf32> to vector<64x32xbf16>
    %c0_2 = arith.constant 0 : index
    %c0_3 = arith.constant 0 : index
    %3 = vector.load %arg3[%c0_2, %c0_3] : memref<64x512xbf16, #tpu.memory_space<vmem>>, vector<64x512xbf16>
    %cst = arith.constant dense<0.000000e+00> : vector<32x512xf32>
    %4 = tpu.matmul %2, %3, %cst {dimension_numbers = #tpu.dot_dimension_numbers<[0], [0], [1], [1], [0, 1, 1, 1], [], []>} : vector<64x32xbf16>, vector<64x512xbf16>, vector<32x512xf32> -> vector<32x512xf32>
    %c0_4 = arith.constant 0 : index
    %c0_5 = arith.constant 0 : index
    %5 = vector.load %arg4[%c0_4, %c0_5] : memref<1x512xf32, #tpu.memory_space<vmem>>, vector<1x512xf32>
    %6 = vector.broadcast %5 : vector<1x512xf32> to vector<32x512xf32>
    %7 = arith.addf %4, %6 : vector<32x512xf32>
    %cst_6 = arith.constant 0.000000e+00 : f32
    %8 = vector.broadcast %cst_6 : f32 to vector<32x512xf32>
    %9 = arith.cmpf oge, %7, %8 : vector<32x512xf32>
    %cst_7 = arith.constant 2.000000e-01 : f32
    %10 = vector.broadcast %cst_7 : f32 to vector<32x512xf32>
    %11 = arith.mulf %10, %7 : vector<32x512xf32>
    %12 = arith.select %9, %7, %11 : vector<32x512xi1>, vector<32x512xf32>
    %13 = arith.truncf %12 : vector<32x512xf32> to vector<32x512xbf16>
    %c0_8 = arith.constant 0 : index
    %c0_9 = arith.constant 0 : index
    %c0_10 = arith.constant 0 : index
    %14 = vector.load %arg6[%c0_8, %c0_9, %c0_10] : memref<1x32x512xbf16, #tpu.memory_space<vmem>>, vector<1x32x512xbf16>
    %15 = vector.shape_cast %14 : vector<1x32x512xbf16> to vector<32x512xbf16>
    %16 = vector.shape_cast %13 : vector<32x512xbf16> to vector<1x32x512xbf16>
    tpu.vector_store %arg6[%c0_8, %c0_9, %c0_10], %16 {strides = array<i32>} : memref<1x32x512xbf16, #tpu.memory_space<vmem>>, vector<1x32x512xbf16>,
    %c0_11 = arith.constant 0 : index
    %c0_12 = arith.constant 0 : index
    %17 = vector.load %arg5[%c0_11, %c0_12] : memref<512x256xbf16, #tpu.memory_space<vmem>>, vector<512x256xbf16>
    %cst_13 = arith.constant dense<0.000000e+00> : vector<32x256xf32>
    %18 = tpu.matmul %13, %17, %cst_13 {dimension_numbers = #tpu.dot_dimension_numbers<[1], [0], [0], [1], [0, 0, 1, 1], [], []>} : vector<32x512xbf16>, vector<512x256xbf16>, vector<32x256xf32> -> vector<32x256xf32>
    %19 = arith.truncf %18 : vector<32x256xf32> to vector<32x256xbf16>
    %c0_14 = arith.constant 0 : index
    %c0_15 = arith.constant 0 : index
    %c0_16 = arith.constant 0 : index
    %20 = vector.load %arg7[%c0_14, %c0_15, %c0_16] : memref<1x32x256xbf16, #tpu.memory_space<vmem>>, vector<1x32x256xbf16>
    %21 = vector.shape_cast %20 : vector<1x32x256xbf16> to vector<32x256xbf16>
    %22 = vector.shape_cast %19 : vector<32x256xbf16> to vector<1x32x256xbf16>
    tpu.vector_store %arg7[%c0_14, %c0_15, %c0_16], %22 {strides = array<i32>} : memref<1x32x256xbf16, #tpu.memory_space<vmem>>, vector<1x32x256xbf16>,
    return
  }
  func.func @transform_0(%arg0: i32, %arg1: i32) -> (i32, i32, i32) {
    %c0_i32 = arith.constant 0 : i32
    %c0_i32_0 = arith.constant 0 : i32
    return %arg0, %c0_i32, %arg1 : i32, i32, i32
  }
  func.func @transform_1(%arg0: i32, %arg1: i32) -> (i32, i32) {
    %c0_i32 = arith.constant 0 : i32
    %c0_i32_0 = arith.constant 0 : i32
    %c0_i32_1 = arith.constant 0 : i32
    return %c0_i32, %c0_i32_0 : i32, i32
  }
  func.func @transform_2(%arg0: i32, %arg1: i32) -> (i32, i32) {
    %c0_i32 = arith.constant 0 : i32
    %c0_i32_0 = arith.constant 0 : i32
    %c0_i32_1 = arith.constant 0 : i32
    return %c0_i32, %c0_i32_0 : i32, i32
  }
  func.func @transform_3(%arg0: i32, %arg1: i32) -> (i32, i32) {
    %c0_i32 = arith.constant 0 : i32
    %c0_i32_0 = arith.constant 0 : i32
    %c0_i32_1 = arith.constant 0 : i32
    return %c0_i32, %c0_i32_0 : i32, i32
  }
  func.func @transform_4(%arg0: i32, %arg1: i32) -> (i32, i32, i32) {
    %c0_i32 = arith.constant 0 : i32
    %c0_i32_0 = arith.constant 0 : i32
    return %arg0, %arg1, %c0_i32 : i32, i32, i32
  }
  func.func @transform_5(%arg0: i32, %arg1: i32) -> (i32, i32, i32) {
    %c0_i32 = arith.constant 0 : i32
    %c0_i32_0 = arith.constant 0 : i32
    return %arg0, %arg1, %c0_i32 : i32, i32, i32
  }
}

module attributes {stable_mosaic.version = 11 : i64} {
  func.func @_edge_mid_kernel(%arg0: i32, %arg1: i32, %arg2: memref<1x32x512xbf16, #tpu.memory_space<vmem>>, %arg3: memref<1x32x512xbf16, #tpu.memory_space<vmem>>, %arg4: memref<1x1x32xf32, #tpu.memory_space<vmem>>, %arg5: memref<1x32x256xbf16, #tpu.memory_space<vmem>>, %arg6: memref<512x256xbf16, #tpu.memory_space<vmem>>, %arg7: memref<1x256xf32, #tpu.memory_space<vmem>>, %arg8: memref<256x128xbf16, #tpu.memory_space<vmem>>, %arg9: memref<1x32x256xbf16, #tpu.memory_space<vmem>>, %arg10: memref<1x32x128xbf16, #tpu.memory_space<vmem>>) attributes {dimension_semantics = [#tpu.dimension_semantics<parallel>, #tpu.dimension_semantics<parallel>], iteration_bounds = array<i64: 2, 1>, scalar_prefetch = 0 : i64, scratch_operands = 0 : i64, tpu.core_type = #tpu.core_type<tc>, window_params = [{transform_indices = @transform_0, window_bounds = array<i64: 1, 32, 512>}, {transform_indices = @transform_1, window_bounds = array<i64: 1, 32, 512>}, {transform_indices = @transform_2, window_bounds = array<i64: 1, 1, 32>}, {transform_indices = @transform_3, window_bounds = array<i64: 1, 32, 256>}, {pipeline_mode = #tpu.pipeline_mode<synchronous>, transform_indices = @transform_4, window_bounds = array<i64: 512, 256>}, {pipeline_mode = #tpu.pipeline_mode<synchronous>, transform_indices = @transform_5, window_bounds = array<i64: 1, 256>}, {pipeline_mode = #tpu.pipeline_mode<synchronous>, transform_indices = @transform_6, window_bounds = array<i64: 256, 128>}, {transform_indices = @transform_7, window_bounds = array<i64: 1, 32, 256>}, {transform_indices = @transform_8, window_bounds = array<i64: 1, 32, 128>}]} {
    %c0 = arith.constant 0 : index
    %c0_0 = arith.constant 0 : index
    %c0_1 = arith.constant 0 : index
    %0 = vector.load %arg2[%c0, %c0_0, %c0_1] : memref<1x32x512xbf16, #tpu.memory_space<vmem>>, vector<1x32x512xbf16>
    %1 = vector.shape_cast %0 : vector<1x32x512xbf16> to vector<32x512xbf16>
    %c0_2 = arith.constant 0 : index
    %c0_3 = arith.constant 0 : index
    %c0_4 = arith.constant 0 : index
    %2 = vector.load %arg3[%c0_2, %c0_3, %c0_4] : memref<1x32x512xbf16, #tpu.memory_space<vmem>>, vector<1x32x512xbf16>
    %3 = vector.shape_cast %2 : vector<1x32x512xbf16> to vector<32x512xbf16>
    %c0_5 = arith.constant 0 : index
    %c0_6 = arith.constant 0 : index
    %c0_7 = arith.constant 0 : index
    %4 = vector.load %arg4[%c0_5, %c0_6, %c0_7] : memref<1x1x32xf32, #tpu.memory_space<vmem>>, vector<1x1x32xf32>
    %5 = vector.shape_cast %4 : vector<1x1x32xf32> to vector<1x32xf32>
    %c0_8 = arith.constant 0 : index
    %c0_9 = arith.constant 0 : index
    %c0_10 = arith.constant 0 : index
    %6 = vector.load %arg5[%c0_8, %c0_9, %c0_10] : memref<1x32x256xbf16, #tpu.memory_space<vmem>>, vector<1x32x256xbf16>
    %7 = vector.shape_cast %6 : vector<1x32x256xbf16> to vector<32x256xbf16>
    %c0_11 = arith.constant 0 : index
    %c0_12 = arith.constant 0 : index
    %8 = vector.load %arg6[%c0_11, %c0_12] : memref<512x256xbf16, #tpu.memory_space<vmem>>, vector<512x256xbf16>
    %c0_13 = arith.constant 0 : index
    %c0_14 = arith.constant 0 : index
    %9 = vector.load %arg7[%c0_13, %c0_14] : memref<1x256xf32, #tpu.memory_space<vmem>>, vector<1x256xf32>
    %cst = arith.constant dense<0.000000e+00> : vector<32x32xf32>
    %10 = tpu.matmul %1, %3, %cst {dimension_numbers = #tpu.dot_dimension_numbers<[1], [1], [0], [0], [0, 0, 1, 0], [], []>} : vector<32x512xbf16>, vector<32x512xbf16>, vector<32x32xf32> -> vector<32x32xf32>
    %cst_15 = arith.constant 2.000000e+00 : f32
    %11 = vector.broadcast %cst_15 : f32 to vector<32x32xf32>
    %12 = arith.mulf %11, %10 : vector<32x32xf32>
    %13 = vector.broadcast %5 : vector<1x32xf32> to vector<32x32xf32>
    %14 = arith.subf %12, %13 : vector<32x32xf32>
    %15 = tpu.bitcast %14 : vector<32x32xf32> -> vector<32x32xi32>
    %c0_i32 = arith.constant 0 : i32
    %16 = vector.broadcast %c0_i32 : i32 to vector<32x32xi32>
    %17 = arith.cmpi slt, %15, %16 : vector<32x32xi32>
    %c2147483647_i32 = arith.constant 2147483647 : i32
    %18 = vector.broadcast %c2147483647_i32 : i32 to vector<32x32xi32>
    %19 = arith.xori %15, %18 : vector<32x32xi32>
    %20 = arith.select %17, %19, %15 : vector<32x32xi1>, vector<32x32xi32>
    %21 = tpu.iota {dimensions = array<i32: 1>} : vector<32x32xi32>
    %c-32_i32 = arith.constant -32 : i32
    %22 = vector.broadcast %c-32_i32 : i32 to vector<32x32xi32>
    %23 = arith.andi %20, %22 : vector<32x32xi32>
    %c31_i32 = arith.constant 31 : i32
    %24 = vector.broadcast %c31_i32 : i32 to vector<32x32xi32>
    %25 = arith.subi %24, %21 : vector<32x32xi32>
    %26 = arith.ori %23, %25 : vector<32x32xi32>
    %cst_16 = arith.constant dense<0.000000e+00> : vector<32x256xf32>
    %27 = tpu.matmul %1, %8, %cst_16 {dimension_numbers = #tpu.dot_dimension_numbers<[1], [0], [0], [1], [0, 0, 1, 1], [], []>} : vector<32x512xbf16>, vector<512x256xbf16>, vector<32x256xf32> -> vector<32x256xf32>
    %28 = vector.broadcast %9 : vector<1x256xf32> to vector<32x256xf32>
    %29 = arith.addf %27, %28 : vector<32x256xf32>
    %cst_17 = arith.constant 0xFF800000 : f32
    %30 = vector.broadcast %cst_17 : f32 to vector<32x256xf32>
    %cst_18 = arith.constant dense<-2147483648> : vector<32xi32>
    %31 = vector.multi_reduction <maxsi>, %26, %cst_18 [1] : vector<32x32xi32> to vector<32xi32>
    %32 = vector.shape_cast %31 : vector<32xi32> to vector<32x1xi32>
    %33 = vector.broadcast %32 : vector<32x1xi32> to vector<32x32xi32>
    %34 = arith.cmpi eq, %26, %33 : vector<32x32xi32>
    %c-2147483648_i32 = arith.constant -2147483648 : i32
    %35 = vector.broadcast %c-2147483648_i32 : i32 to vector<32x32xi32>
    %36 = arith.select %34, %35, %26 : vector<32x32xi1>, vector<32x32xi32>
    %cst_19 = arith.constant 1.000000e+00 : f32
    %cst_20 = arith.constant 0.000000e+00 : f32
    %37 = vector.broadcast %cst_19 : f32 to vector<32x32xf32>
    %38 = vector.broadcast %cst_20 : f32 to vector<32x32xf32>
    %39 = arith.select %34, %37, %38 : vector<32x32xi1>, vector<32x32xf32>
    %40 = arith.truncf %39 : vector<32x32xf32> to vector<32x32xbf16>
    %cst_21 = arith.constant dense<0.000000e+00> : vector<32x256xf32>
    %41 = tpu.matmul %40, %7, %cst_21 {dimension_numbers = #tpu.dot_dimension_numbers<[1], [0], [0], [1], [0, 0, 1, 1], [], []>} : vector<32x32xbf16>, vector<32x256xbf16>, vector<32x256xf32> -> vector<32x256xf32>
    %42 = arith.addf %41, %29 : vector<32x256xf32>
    %cst_22 = arith.constant 0.000000e+00 : f32
    %43 = vector.broadcast %cst_22 : f32 to vector<32x256xf32>
    %44 = arith.cmpf oge, %42, %43 : vector<32x256xf32>
    %cst_23 = arith.constant 2.000000e-01 : f32
    %45 = vector.broadcast %cst_23 : f32 to vector<32x256xf32>
    %46 = arith.mulf %45, %42 : vector<32x256xf32>
    %47 = arith.select %44, %42, %46 : vector<32x256xi1>, vector<32x256xf32>
    %48 = arith.maximumf %30, %47 : vector<32x256xf32>
    %cst_24 = arith.constant dense<-2147483648> : vector<32xi32>
    %49 = vector.multi_reduction <maxsi>, %36, %cst_24 [1] : vector<32x32xi32> to vector<32xi32>
    %50 = vector.shape_cast %49 : vector<32xi32> to vector<32x1xi32>
    %51 = vector.broadcast %50 : vector<32x1xi32> to vector<32x32xi32>
    %52 = arith.cmpi eq, %36, %51 : vector<32x32xi32>
    %c-2147483648_i32_25 = arith.constant -2147483648 : i32
    %53 = vector.broadcast %c-2147483648_i32_25 : i32 to vector<32x32xi32>
    %54 = arith.select %52, %53, %36 : vector<32x32xi1>, vector<32x32xi32>
    %cst_26 = arith.constant 1.000000e+00 : f32
    %cst_27 = arith.constant 0.000000e+00 : f32
    %55 = vector.broadcast %cst_26 : f32 to vector<32x32xf32>
    %56 = vector.broadcast %cst_27 : f32 to vector<32x32xf32>
    %57 = arith.select %52, %55, %56 : vector<32x32xi1>, vector<32x32xf32>
    %58 = arith.truncf %57 : vector<32x32xf32> to vector<32x32xbf16>
    %cst_28 = arith.constant dense<0.000000e+00> : vector<32x256xf32>
    %59 = tpu.matmul %58, %7, %cst_28 {dimension_numbers = #tpu.dot_dimension_numbers<[1], [0], [0], [1], [0, 0, 1, 1], [], []>} : vector<32x32xbf16>, vector<32x256xbf16>, vector<32x256xf32> -> vector<32x256xf32>
    %60 = arith.addf %59, %29 : vector<32x256xf32>
    %cst_29 = arith.constant 0.000000e+00 : f32
    %61 = vector.broadcast %cst_29 : f32 to vector<32x256xf32>
    %62 = arith.cmpf oge, %60, %61 : vector<32x256xf32>
    %cst_30 = arith.constant 2.000000e-01 : f32
    %63 = vector.broadcast %cst_30 : f32 to vector<32x256xf32>
    %64 = arith.mulf %63, %60 : vector<32x256xf32>
    %65 = arith.select %62, %60, %64 : vector<32x256xi1>, vector<32x256xf32>
    %66 = arith.maximumf %48, %65 : vector<32x256xf32>
    %cst_31 = arith.constant dense<-2147483648> : vector<32xi32>
    %67 = vector.multi_reduction <maxsi>, %54, %cst_31 [1] : vector<32x32xi32> to vector<32xi32>
    %68 = vector.shape_cast %67 : vector<32xi32> to vector<32x1xi32>
    %69 = vector.broadcast %68 : vector<32x1xi32> to vector<32x32xi32>
    %70 = arith.cmpi eq, %54, %69 : vector<32x32xi32>
    %c-2147483648_i32_32 = arith.constant -2147483648 : i32
    %71 = vector.broadcast %c-2147483648_i32_32 : i32 to vector<32x32xi32>
    %72 = arith.select %70, %71, %54 : vector<32x32xi1>, vector<32x32xi32>
    %cst_33 = arith.constant 1.000000e+00 : f32
    %cst_34 = arith.constant 0.000000e+00 : f32
    %73 = vector.broadcast %cst_33 : f32 to vector<32x32xf32>
    %74 = vector.broadcast %cst_34 : f32 to vector<32x32xf32>
    %75 = arith.select %70, %73, %74 : vector<32x32xi1>, vector<32x32xf32>
    %76 = arith.truncf %75 : vector<32x32xf32> to vector<32x32xbf16>
    %cst_35 = arith.constant dense<0.000000e+00> : vector<32x256xf32>
    %77 = tpu.matmul %76, %7, %cst_35 {dimension_numbers = #tpu.dot_dimension_numbers<[1], [0], [0], [1], [0, 0, 1, 1], [], []>} : vector<32x32xbf16>, vector<32x256xbf16>, vector<32x256xf32> -> vector<32x256xf32>
    %78 = arith.addf %77, %29 : vector<32x256xf32>
    %cst_36 = arith.constant 0.000000e+00 : f32
    %79 = vector.broadcast %cst_36 : f32 to vector<32x256xf32>
    %80 = arith.cmpf oge, %78, %79 : vector<32x256xf32>
    %cst_37 = arith.constant 2.000000e-01 : f32
    %81 = vector.broadcast %cst_37 : f32 to vector<32x256xf32>
    %82 = arith.mulf %81, %78 : vector<32x256xf32>
    %83 = arith.select %80, %78, %82 : vector<32x256xi1>, vector<32x256xf32>
    %84 = arith.maximumf %66, %83 : vector<32x256xf32>
    %cst_38 = arith.constant dense<-2147483648> : vector<32xi32>
    %85 = vector.multi_reduction <maxsi>, %72, %cst_38 [1] : vector<32x32xi32> to vector<32xi32>
    %86 = vector.shape_cast %85 : vector<32xi32> to vector<32x1xi32>
    %87 = vector.broadcast %86 : vector<32x1xi32> to vector<32x32xi32>
    %88 = arith.cmpi eq, %72, %87 : vector<32x32xi32>
    %c-2147483648_i32_39 = arith.constant -2147483648 : i32
    %89 = vector.broadcast %c-2147483648_i32_39 : i32 to vector<32x32xi32>
    %90 = arith.select %88, %89, %72 : vector<32x32xi1>, vector<32x32xi32>
    %cst_40 = arith.constant 1.000000e+00 : f32
    %cst_41 = arith.constant 0.000000e+00 : f32
    %91 = vector.broadcast %cst_40 : f32 to vector<32x32xf32>
    %92 = vector.broadcast %cst_41 : f32 to vector<32x32xf32>
    %93 = arith.select %88, %91, %92 : vector<32x32xi1>, vector<32x32xf32>
    %94 = arith.truncf %93 : vector<32x32xf32> to vector<32x32xbf16>
    %cst_42 = arith.constant dense<0.000000e+00> : vector<32x256xf32>
    %95 = tpu.matmul %94, %7, %cst_42 {dimension_numbers = #tpu.dot_dimension_numbers<[1], [0], [0], [1], [0, 0, 1, 1], [], []>} : vector<32x32xbf16>, vector<32x256xbf16>, vector<32x256xf32> -> vector<32x256xf32>
    %96 = arith.addf %95, %29 : vector<32x256xf32>
    %cst_43 = arith.constant 0.000000e+00 : f32
    %97 = vector.broadcast %cst_43 : f32 to vector<32x256xf32>
    %98 = arith.cmpf oge, %96, %97 : vector<32x256xf32>
    %cst_44 = arith.constant 2.000000e-01 : f32
    %99 = vector.broadcast %cst_44 : f32 to vector<32x256xf32>
    %100 = arith.mulf %99, %96 : vector<32x256xf32>
    %101 = arith.select %98, %96, %100 : vector<32x256xi1>, vector<32x256xf32>
    %102 = arith.maximumf %84, %101 : vector<32x256xf32>
    %cst_45 = arith.constant dense<-2147483648> : vector<32xi32>
    %103 = vector.multi_reduction <maxsi>, %90, %cst_45 [1] : vector<32x32xi32> to vector<32xi32>
    %104 = vector.shape_cast %103 : vector<32xi32> to vector<32x1xi32>
    %105 = vector.broadcast %104 : vector<32x1xi32> to vector<32x32xi32>
    %106 = arith.cmpi eq, %90, %105 : vector<32x32xi32>
    %c-2147483648_i32_46 = arith.constant -2147483648 : i32
    %107 = vector.broadcast %c-2147483648_i32_46 : i32 to vector<32x32xi32>
    %108 = arith.select %106, %107, %90 : vector<32x32xi1>, vector<32x32xi32>
    %cst_47 = arith.constant 1.000000e+00 : f32
    %cst_48 = arith.constant 0.000000e+00 : f32
    %109 = vector.broadcast %cst_47 : f32 to vector<32x32xf32>
    %110 = vector.broadcast %cst_48 : f32 to vector<32x32xf32>
    %111 = arith.select %106, %109, %110 : vector<32x32xi1>, vector<32x32xf32>
    %112 = arith.truncf %111 : vector<32x32xf32> to vector<32x32xbf16>
    %cst_49 = arith.constant dense<0.000000e+00> : vector<32x256xf32>
    %113 = tpu.matmul %112, %7, %cst_49 {dimension_numbers = #tpu.dot_dimension_numbers<[1], [0], [0], [1], [0, 0, 1, 1], [], []>} : vector<32x32xbf16>, vector<32x256xbf16>, vector<32x256xf32> -> vector<32x256xf32>
    %114 = arith.addf %113, %29 : vector<32x256xf32>
    %cst_50 = arith.constant 0.000000e+00 : f32
    %115 = vector.broadcast %cst_50 : f32 to vector<32x256xf32>
    %116 = arith.cmpf oge, %114, %115 : vector<32x256xf32>
    %cst_51 = arith.constant 2.000000e-01 : f32
    %117 = vector.broadcast %cst_51 : f32 to vector<32x256xf32>
    %118 = arith.mulf %117, %114 : vector<32x256xf32>
    %119 = arith.select %116, %114, %118 : vector<32x256xi1>, vector<32x256xf32>
    %120 = arith.maximumf %102, %119 : vector<32x256xf32>
    %cst_52 = arith.constant dense<-2147483648> : vector<32xi32>
    %121 = vector.multi_reduction <maxsi>, %108, %cst_52 [1] : vector<32x32xi32> to vector<32xi32>
    %122 = vector.shape_cast %121 : vector<32xi32> to vector<32x1xi32>
    %123 = vector.broadcast %122 : vector<32x1xi32> to vector<32x32xi32>
    %124 = arith.cmpi eq, %108, %123 : vector<32x32xi32>
    %c-2147483648_i32_53 = arith.constant -2147483648 : i32
    %125 = vector.broadcast %c-2147483648_i32_53 : i32 to vector<32x32xi32>
    %126 = arith.select %124, %125, %108 : vector<32x32xi1>, vector<32x32xi32>
    %cst_54 = arith.constant 1.000000e+00 : f32
    %cst_55 = arith.constant 0.000000e+00 : f32
    %127 = vector.broadcast %cst_54 : f32 to vector<32x32xf32>
    %128 = vector.broadcast %cst_55 : f32 to vector<32x32xf32>
    %129 = arith.select %124, %127, %128 : vector<32x32xi1>, vector<32x32xf32>
    %130 = arith.truncf %129 : vector<32x32xf32> to vector<32x32xbf16>
    %cst_56 = arith.constant dense<0.000000e+00> : vector<32x256xf32>
    %131 = tpu.matmul %130, %7, %cst_56 {dimension_numbers = #tpu.dot_dimension_numbers<[1], [0], [0], [1], [0, 0, 1, 1], [], []>} : vector<32x32xbf16>, vector<32x256xbf16>, vector<32x256xf32> -> vector<32x256xf32>
    %132 = arith.addf %131, %29 : vector<32x256xf32>
    %cst_57 = arith.constant 0.000000e+00 : f32
    %133 = vector.broadcast %cst_57 : f32 to vector<32x256xf32>
    %134 = arith.cmpf oge, %132, %133 : vector<32x256xf32>
    %cst_58 = arith.constant 2.000000e-01 : f32
    %135 = vector.broadcast %cst_58 : f32 to vector<32x256xf32>
    %136 = arith.mulf %135, %132 : vector<32x256xf32>
    %137 = arith.select %134, %132, %136 : vector<32x256xi1>, vector<32x256xf32>
    %138 = arith.maximumf %120, %137 : vector<32x256xf32>
    %cst_59 = arith.constant dense<-2147483648> : vector<32xi32>
    %139 = vector.multi_reduction <maxsi>, %126, %cst_59 [1] : vector<32x32xi32> to vector<32xi32>
    %140 = vector.shape_cast %139 : vector<32xi32> to vector<32x1xi32>
    %141 = vector.broadcast %140 : vector<32x1xi32> to vector<32x32xi32>
    %142 = arith.cmpi eq, %126, %141 : vector<32x32xi32>
    %c-2147483648_i32_60 = arith.constant -2147483648 : i32
    %143 = vector.broadcast %c-2147483648_i32_60 : i32 to vector<32x32xi32>
    %144 = arith.select %142, %143, %126 : vector<32x32xi1>, vector<32x32xi32>
    %cst_61 = arith.constant 1.000000e+00 : f32
    %cst_62 = arith.constant 0.000000e+00 : f32
    %145 = vector.broadcast %cst_61 : f32 to vector<32x32xf32>
    %146 = vector.broadcast %cst_62 : f32 to vector<32x32xf32>
    %147 = arith.select %142, %145, %146 : vector<32x32xi1>, vector<32x32xf32>
    %148 = arith.truncf %147 : vector<32x32xf32> to vector<32x32xbf16>
    %cst_63 = arith.constant dense<0.000000e+00> : vector<32x256xf32>
    %149 = tpu.matmul %148, %7, %cst_63 {dimension_numbers = #tpu.dot_dimension_numbers<[1], [0], [0], [1], [0, 0, 1, 1], [], []>} : vector<32x32xbf16>, vector<32x256xbf16>, vector<32x256xf32> -> vector<32x256xf32>
    %150 = arith.addf %149, %29 : vector<32x256xf32>
    %cst_64 = arith.constant 0.000000e+00 : f32
    %151 = vector.broadcast %cst_64 : f32 to vector<32x256xf32>
    %152 = arith.cmpf oge, %150, %151 : vector<32x256xf32>
    %cst_65 = arith.constant 2.000000e-01 : f32
    %153 = vector.broadcast %cst_65 : f32 to vector<32x256xf32>
    %154 = arith.mulf %153, %150 : vector<32x256xf32>
    %155 = arith.select %152, %150, %154 : vector<32x256xi1>, vector<32x256xf32>
    %156 = arith.maximumf %138, %155 : vector<32x256xf32>
    %cst_66 = arith.constant dense<-2147483648> : vector<32xi32>
    %157 = vector.multi_reduction <maxsi>, %144, %cst_66 [1] : vector<32x32xi32> to vector<32xi32>
    %158 = vector.shape_cast %157 : vector<32xi32> to vector<32x1xi32>
    %159 = vector.broadcast %158 : vector<32x1xi32> to vector<32x32xi32>
    %160 = arith.cmpi eq, %144, %159 : vector<32x32xi32>
    %cst_67 = arith.constant 1.000000e+00 : f32
    %cst_68 = arith.constant 0.000000e+00 : f32
    %161 = vector.broadcast %cst_67 : f32 to vector<32x32xf32>
    %162 = vector.broadcast %cst_68 : f32 to vector<32x32xf32>
    %163 = arith.select %160, %161, %162 : vector<32x32xi1>, vector<32x32xf32>
    %164 = arith.truncf %163 : vector<32x32xf32> to vector<32x32xbf16>
    %cst_69 = arith.constant dense<0.000000e+00> : vector<32x256xf32>
    %165 = tpu.matmul %164, %7, %cst_69 {dimension_numbers = #tpu.dot_dimension_numbers<[1], [0], [0], [1], [0, 0, 1, 1], [], []>} : vector<32x32xbf16>, vector<32x256xbf16>, vector<32x256xf32> -> vector<32x256xf32>
    %166 = arith.addf %165, %29 : vector<32x256xf32>
    %cst_70 = arith.constant 0.000000e+00 : f32
    %167 = vector.broadcast %cst_70 : f32 to vector<32x256xf32>
    %168 = arith.cmpf oge, %166, %167 : vector<32x256xf32>
    %cst_71 = arith.constant 2.000000e-01 : f32
    %169 = vector.broadcast %cst_71 : f32 to vector<32x256xf32>
    %170 = arith.mulf %169, %166 : vector<32x256xf32>
    %171 = arith.select %168, %166, %170 : vector<32x256xi1>, vector<32x256xf32>
    %172 = arith.maximumf %156, %171 : vector<32x256xf32>
    %173 = arith.truncf %172 : vector<32x256xf32> to vector<32x256xbf16>
    %c0_72 = arith.constant 0 : index
    %c0_73 = arith.constant 0 : index
    %c0_74 = arith.constant 0 : index
    %174 = vector.load %arg9[%c0_72, %c0_73, %c0_74] : memref<1x32x256xbf16, #tpu.memory_space<vmem>>, vector<1x32x256xbf16>
    %175 = vector.shape_cast %174 : vector<1x32x256xbf16> to vector<32x256xbf16>
    %176 = vector.shape_cast %173 : vector<32x256xbf16> to vector<1x32x256xbf16>
    tpu.vector_store %arg9[%c0_72, %c0_73, %c0_74], %176 {strides = array<i32>} : memref<1x32x256xbf16, #tpu.memory_space<vmem>>, vector<1x32x256xbf16>,
    %c0_75 = arith.constant 0 : index
    %c0_76 = arith.constant 0 : index
    %177 = vector.load %arg8[%c0_75, %c0_76] : memref<256x128xbf16, #tpu.memory_space<vmem>>, vector<256x128xbf16>
    %cst_77 = arith.constant dense<0.000000e+00> : vector<32x128xf32>
    %178 = tpu.matmul %173, %177, %cst_77 {dimension_numbers = #tpu.dot_dimension_numbers<[1], [0], [0], [1], [0, 0, 1, 1], [], []>} : vector<32x256xbf16>, vector<256x128xbf16>, vector<32x128xf32> -> vector<32x128xf32>
    %179 = arith.truncf %178 : vector<32x128xf32> to vector<32x128xbf16>
    %c0_78 = arith.constant 0 : index
    %c0_79 = arith.constant 0 : index
    %c0_80 = arith.constant 0 : index
    %180 = vector.load %arg10[%c0_78, %c0_79, %c0_80] : memref<1x32x128xbf16, #tpu.memory_space<vmem>>, vector<1x32x128xbf16>
    %181 = vector.shape_cast %180 : vector<1x32x128xbf16> to vector<32x128xbf16>
    %182 = vector.shape_cast %179 : vector<32x128xbf16> to vector<1x32x128xbf16>
    tpu.vector_store %arg10[%c0_78, %c0_79, %c0_80], %182 {strides = array<i32>} : memref<1x32x128xbf16, #tpu.memory_space<vmem>>, vector<1x32x128xbf16>,
    return
  }
  func.func @transform_0(%arg0: i32, %arg1: i32) -> (i32, i32, i32) {
    %c0_i32 = arith.constant 0 : i32
    %c0_i32_0 = arith.constant 0 : i32
    return %arg0, %arg1, %c0_i32 : i32, i32, i32
  }
  func.func @transform_1(%arg0: i32, %arg1: i32) -> (i32, i32, i32) {
    %c0_i32 = arith.constant 0 : i32
    %c0_i32_0 = arith.constant 0 : i32
    %c0_i32_1 = arith.constant 0 : i32
    return %arg0, %c0_i32, %c0_i32_0 : i32, i32, i32
  }
  func.func @transform_2(%arg0: i32, %arg1: i32) -> (i32, i32, i32) {
    %c0_i32 = arith.constant 0 : i32
    %c0_i32_0 = arith.constant 0 : i32
    %c0_i32_1 = arith.constant 0 : i32
    return %arg0, %c0_i32, %c0_i32_0 : i32, i32, i32
  }
  func.func @transform_3(%arg0: i32, %arg1: i32) -> (i32, i32, i32) {
    %c0_i32 = arith.constant 0 : i32
    %c0_i32_0 = arith.constant 0 : i32
    %c0_i32_1 = arith.constant 0 : i32
    return %arg0, %c0_i32, %c0_i32_0 : i32, i32, i32
  }
  func.func @transform_4(%arg0: i32, %arg1: i32) -> (i32, i32) {
    %c0_i32 = arith.constant 0 : i32
    %c0_i32_0 = arith.constant 0 : i32
    %c0_i32_1 = arith.constant 0 : i32
    return %c0_i32, %c0_i32_0 : i32, i32
  }
  func.func @transform_5(%arg0: i32, %arg1: i32) -> (i32, i32) {
    %c0_i32 = arith.constant 0 : i32
    %c0_i32_0 = arith.constant 0 : i32
    %c0_i32_1 = arith.constant 0 : i32
    return %c0_i32, %c0_i32_0 : i32, i32
  }
  func.func @transform_6(%arg0: i32, %arg1: i32) -> (i32, i32) {
    %c0_i32 = arith.constant 0 : i32
    %c0_i32_0 = arith.constant 0 : i32
    %c0_i32_1 = arith.constant 0 : i32
    return %c0_i32, %c0_i32_0 : i32, i32
  }
  func.func @transform_7(%arg0: i32, %arg1: i32) -> (i32, i32, i32) {
    %c0_i32 = arith.constant 0 : i32
    %c0_i32_0 = arith.constant 0 : i32
    return %arg0, %arg1, %c0_i32 : i32, i32, i32
  }
  func.func @transform_8(%arg0: i32, %arg1: i32) -> (i32, i32, i32) {
    %c0_i32 = arith.constant 0 : i32
    %c0_i32_0 = arith.constant 0 : i32
    return %arg0, %arg1, %c0_i32 : i32, i32, i32
  }
}

module attributes {stable_mosaic.version = 11 : i64} {
  func.func @_edge_last_kernel(%arg0: i32, %arg1: i32, %arg2: memref<1x32x256xbf16, #tpu.memory_space<vmem>>, %arg3: memref<1x32x256xbf16, #tpu.memory_space<vmem>>, %arg4: memref<1x1x32xf32, #tpu.memory_space<vmem>>, %arg5: memref<1x32x128xbf16, #tpu.memory_space<vmem>>, %arg6: memref<256x128xbf16, #tpu.memory_space<vmem>>, %arg7: memref<1x128xf32, #tpu.memory_space<vmem>>, %arg8: memref<1x128x32xf32, #tpu.memory_space<vmem>>) attributes {dimension_semantics = [#tpu.dimension_semantics<parallel>, #tpu.dimension_semantics<parallel>], iteration_bounds = array<i64: 2, 1>, scalar_prefetch = 0 : i64, scratch_operands = 0 : i64, tpu.core_type = #tpu.core_type<tc>, window_params = [{transform_indices = @transform_0, window_bounds = array<i64: 1, 32, 256>}, {transform_indices = @transform_1, window_bounds = array<i64: 1, 32, 256>}, {transform_indices = @transform_2, window_bounds = array<i64: 1, 1, 32>}, {transform_indices = @transform_3, window_bounds = array<i64: 1, 32, 128>}, {pipeline_mode = #tpu.pipeline_mode<synchronous>, transform_indices = @transform_4, window_bounds = array<i64: 256, 128>}, {pipeline_mode = #tpu.pipeline_mode<synchronous>, transform_indices = @transform_5, window_bounds = array<i64: 1, 128>}, {transform_indices = @transform_6, window_bounds = array<i64: 1, 128, 32>}]} {
    %c0 = arith.constant 0 : index
    %c0_0 = arith.constant 0 : index
    %c0_1 = arith.constant 0 : index
    %0 = vector.load %arg2[%c0, %c0_0, %c0_1] : memref<1x32x256xbf16, #tpu.memory_space<vmem>>, vector<1x32x256xbf16>
    %1 = vector.shape_cast %0 : vector<1x32x256xbf16> to vector<32x256xbf16>
    %c0_2 = arith.constant 0 : index
    %c0_3 = arith.constant 0 : index
    %c0_4 = arith.constant 0 : index
    %2 = vector.load %arg3[%c0_2, %c0_3, %c0_4] : memref<1x32x256xbf16, #tpu.memory_space<vmem>>, vector<1x32x256xbf16>
    %3 = vector.shape_cast %2 : vector<1x32x256xbf16> to vector<32x256xbf16>
    %c0_5 = arith.constant 0 : index
    %c0_6 = arith.constant 0 : index
    %c0_7 = arith.constant 0 : index
    %4 = vector.load %arg4[%c0_5, %c0_6, %c0_7] : memref<1x1x32xf32, #tpu.memory_space<vmem>>, vector<1x1x32xf32>
    %5 = vector.shape_cast %4 : vector<1x1x32xf32> to vector<1x32xf32>
    %c0_8 = arith.constant 0 : index
    %c0_9 = arith.constant 0 : index
    %c0_10 = arith.constant 0 : index
    %6 = vector.load %arg5[%c0_8, %c0_9, %c0_10] : memref<1x32x128xbf16, #tpu.memory_space<vmem>>, vector<1x32x128xbf16>
    %7 = vector.shape_cast %6 : vector<1x32x128xbf16> to vector<32x128xbf16>
    %c0_11 = arith.constant 0 : index
    %c0_12 = arith.constant 0 : index
    %8 = vector.load %arg6[%c0_11, %c0_12] : memref<256x128xbf16, #tpu.memory_space<vmem>>, vector<256x128xbf16>
    %c0_13 = arith.constant 0 : index
    %c0_14 = arith.constant 0 : index
    %9 = vector.load %arg7[%c0_13, %c0_14] : memref<1x128xf32, #tpu.memory_space<vmem>>, vector<1x128xf32>
    %cst = arith.constant dense<0.000000e+00> : vector<32x32xf32>
    %10 = tpu.matmul %1, %3, %cst {dimension_numbers = #tpu.dot_dimension_numbers<[1], [1], [0], [0], [0, 0, 1, 0], [], []>} : vector<32x256xbf16>, vector<32x256xbf16>, vector<32x32xf32> -> vector<32x32xf32>
    %cst_15 = arith.constant 2.000000e+00 : f32
    %11 = vector.broadcast %cst_15 : f32 to vector<32x32xf32>
    %12 = arith.mulf %11, %10 : vector<32x32xf32>
    %13 = vector.broadcast %5 : vector<1x32xf32> to vector<32x32xf32>
    %14 = arith.subf %12, %13 : vector<32x32xf32>
    %15 = tpu.bitcast %14 : vector<32x32xf32> -> vector<32x32xi32>
    %c0_i32 = arith.constant 0 : i32
    %16 = vector.broadcast %c0_i32 : i32 to vector<32x32xi32>
    %17 = arith.cmpi slt, %15, %16 : vector<32x32xi32>
    %c2147483647_i32 = arith.constant 2147483647 : i32
    %18 = vector.broadcast %c2147483647_i32 : i32 to vector<32x32xi32>
    %19 = arith.xori %15, %18 : vector<32x32xi32>
    %20 = arith.select %17, %19, %15 : vector<32x32xi1>, vector<32x32xi32>
    %21 = tpu.iota {dimensions = array<i32: 1>} : vector<32x32xi32>
    %c-32_i32 = arith.constant -32 : i32
    %22 = vector.broadcast %c-32_i32 : i32 to vector<32x32xi32>
    %23 = arith.andi %20, %22 : vector<32x32xi32>
    %c31_i32 = arith.constant 31 : i32
    %24 = vector.broadcast %c31_i32 : i32 to vector<32x32xi32>
    %25 = arith.subi %24, %21 : vector<32x32xi32>
    %26 = arith.ori %23, %25 : vector<32x32xi32>
    %cst_16 = arith.constant dense<0.000000e+00> : vector<32x128xf32>
    %27 = tpu.matmul %1, %8, %cst_16 {dimension_numbers = #tpu.dot_dimension_numbers<[1], [0], [0], [1], [0, 0, 1, 1], [], []>} : vector<32x256xbf16>, vector<256x128xbf16>, vector<32x128xf32> -> vector<32x128xf32>
    %28 = vector.broadcast %9 : vector<1x128xf32> to vector<32x128xf32>
    %29 = arith.addf %27, %28 : vector<32x128xf32>
    %cst_17 = arith.constant 0xFF800000 : f32
    %30 = vector.broadcast %cst_17 : f32 to vector<32x128xf32>
    %cst_18 = arith.constant dense<-2147483648> : vector<32xi32>
    %31 = vector.multi_reduction <maxsi>, %26, %cst_18 [1] : vector<32x32xi32> to vector<32xi32>
    %32 = vector.shape_cast %31 : vector<32xi32> to vector<32x1xi32>
    %33 = vector.broadcast %32 : vector<32x1xi32> to vector<32x32xi32>
    %34 = arith.cmpi eq, %26, %33 : vector<32x32xi32>
    %c-2147483648_i32 = arith.constant -2147483648 : i32
    %35 = vector.broadcast %c-2147483648_i32 : i32 to vector<32x32xi32>
    %36 = arith.select %34, %35, %26 : vector<32x32xi1>, vector<32x32xi32>
    %cst_19 = arith.constant 1.000000e+00 : f32
    %cst_20 = arith.constant 0.000000e+00 : f32
    %37 = vector.broadcast %cst_19 : f32 to vector<32x32xf32>
    %38 = vector.broadcast %cst_20 : f32 to vector<32x32xf32>
    %39 = arith.select %34, %37, %38 : vector<32x32xi1>, vector<32x32xf32>
    %40 = arith.truncf %39 : vector<32x32xf32> to vector<32x32xbf16>
    %cst_21 = arith.constant dense<0.000000e+00> : vector<32x128xf32>
    %41 = tpu.matmul %40, %7, %cst_21 {dimension_numbers = #tpu.dot_dimension_numbers<[1], [0], [0], [1], [0, 0, 1, 1], [], []>} : vector<32x32xbf16>, vector<32x128xbf16>, vector<32x128xf32> -> vector<32x128xf32>
    %42 = arith.addf %41, %29 : vector<32x128xf32>
    %cst_22 = arith.constant 0.000000e+00 : f32
    %43 = vector.broadcast %cst_22 : f32 to vector<32x128xf32>
    %44 = arith.cmpf oge, %42, %43 : vector<32x128xf32>
    %cst_23 = arith.constant 2.000000e-01 : f32
    %45 = vector.broadcast %cst_23 : f32 to vector<32x128xf32>
    %46 = arith.mulf %45, %42 : vector<32x128xf32>
    %47 = arith.select %44, %42, %46 : vector<32x128xi1>, vector<32x128xf32>
    %48 = arith.maximumf %30, %47 : vector<32x128xf32>
    %cst_24 = arith.constant dense<-2147483648> : vector<32xi32>
    %49 = vector.multi_reduction <maxsi>, %36, %cst_24 [1] : vector<32x32xi32> to vector<32xi32>
    %50 = vector.shape_cast %49 : vector<32xi32> to vector<32x1xi32>
    %51 = vector.broadcast %50 : vector<32x1xi32> to vector<32x32xi32>
    %52 = arith.cmpi eq, %36, %51 : vector<32x32xi32>
    %c-2147483648_i32_25 = arith.constant -2147483648 : i32
    %53 = vector.broadcast %c-2147483648_i32_25 : i32 to vector<32x32xi32>
    %54 = arith.select %52, %53, %36 : vector<32x32xi1>, vector<32x32xi32>
    %cst_26 = arith.constant 1.000000e+00 : f32
    %cst_27 = arith.constant 0.000000e+00 : f32
    %55 = vector.broadcast %cst_26 : f32 to vector<32x32xf32>
    %56 = vector.broadcast %cst_27 : f32 to vector<32x32xf32>
    %57 = arith.select %52, %55, %56 : vector<32x32xi1>, vector<32x32xf32>
    %58 = arith.truncf %57 : vector<32x32xf32> to vector<32x32xbf16>
    %cst_28 = arith.constant dense<0.000000e+00> : vector<32x128xf32>
    %59 = tpu.matmul %58, %7, %cst_28 {dimension_numbers = #tpu.dot_dimension_numbers<[1], [0], [0], [1], [0, 0, 1, 1], [], []>} : vector<32x32xbf16>, vector<32x128xbf16>, vector<32x128xf32> -> vector<32x128xf32>
    %60 = arith.addf %59, %29 : vector<32x128xf32>
    %cst_29 = arith.constant 0.000000e+00 : f32
    %61 = vector.broadcast %cst_29 : f32 to vector<32x128xf32>
    %62 = arith.cmpf oge, %60, %61 : vector<32x128xf32>
    %cst_30 = arith.constant 2.000000e-01 : f32
    %63 = vector.broadcast %cst_30 : f32 to vector<32x128xf32>
    %64 = arith.mulf %63, %60 : vector<32x128xf32>
    %65 = arith.select %62, %60, %64 : vector<32x128xi1>, vector<32x128xf32>
    %66 = arith.maximumf %48, %65 : vector<32x128xf32>
    %cst_31 = arith.constant dense<-2147483648> : vector<32xi32>
    %67 = vector.multi_reduction <maxsi>, %54, %cst_31 [1] : vector<32x32xi32> to vector<32xi32>
    %68 = vector.shape_cast %67 : vector<32xi32> to vector<32x1xi32>
    %69 = vector.broadcast %68 : vector<32x1xi32> to vector<32x32xi32>
    %70 = arith.cmpi eq, %54, %69 : vector<32x32xi32>
    %c-2147483648_i32_32 = arith.constant -2147483648 : i32
    %71 = vector.broadcast %c-2147483648_i32_32 : i32 to vector<32x32xi32>
    %72 = arith.select %70, %71, %54 : vector<32x32xi1>, vector<32x32xi32>
    %cst_33 = arith.constant 1.000000e+00 : f32
    %cst_34 = arith.constant 0.000000e+00 : f32
    %73 = vector.broadcast %cst_33 : f32 to vector<32x32xf32>
    %74 = vector.broadcast %cst_34 : f32 to vector<32x32xf32>
    %75 = arith.select %70, %73, %74 : vector<32x32xi1>, vector<32x32xf32>
    %76 = arith.truncf %75 : vector<32x32xf32> to vector<32x32xbf16>
    %cst_35 = arith.constant dense<0.000000e+00> : vector<32x128xf32>
    %77 = tpu.matmul %76, %7, %cst_35 {dimension_numbers = #tpu.dot_dimension_numbers<[1], [0], [0], [1], [0, 0, 1, 1], [], []>} : vector<32x32xbf16>, vector<32x128xbf16>, vector<32x128xf32> -> vector<32x128xf32>
    %78 = arith.addf %77, %29 : vector<32x128xf32>
    %cst_36 = arith.constant 0.000000e+00 : f32
    %79 = vector.broadcast %cst_36 : f32 to vector<32x128xf32>
    %80 = arith.cmpf oge, %78, %79 : vector<32x128xf32>
    %cst_37 = arith.constant 2.000000e-01 : f32
    %81 = vector.broadcast %cst_37 : f32 to vector<32x128xf32>
    %82 = arith.mulf %81, %78 : vector<32x128xf32>
    %83 = arith.select %80, %78, %82 : vector<32x128xi1>, vector<32x128xf32>
    %84 = arith.maximumf %66, %83 : vector<32x128xf32>
    %cst_38 = arith.constant dense<-2147483648> : vector<32xi32>
    %85 = vector.multi_reduction <maxsi>, %72, %cst_38 [1] : vector<32x32xi32> to vector<32xi32>
    %86 = vector.shape_cast %85 : vector<32xi32> to vector<32x1xi32>
    %87 = vector.broadcast %86 : vector<32x1xi32> to vector<32x32xi32>
    %88 = arith.cmpi eq, %72, %87 : vector<32x32xi32>
    %c-2147483648_i32_39 = arith.constant -2147483648 : i32
    %89 = vector.broadcast %c-2147483648_i32_39 : i32 to vector<32x32xi32>
    %90 = arith.select %88, %89, %72 : vector<32x32xi1>, vector<32x32xi32>
    %cst_40 = arith.constant 1.000000e+00 : f32
    %cst_41 = arith.constant 0.000000e+00 : f32
    %91 = vector.broadcast %cst_40 : f32 to vector<32x32xf32>
    %92 = vector.broadcast %cst_41 : f32 to vector<32x32xf32>
    %93 = arith.select %88, %91, %92 : vector<32x32xi1>, vector<32x32xf32>
    %94 = arith.truncf %93 : vector<32x32xf32> to vector<32x32xbf16>
    %cst_42 = arith.constant dense<0.000000e+00> : vector<32x128xf32>
    %95 = tpu.matmul %94, %7, %cst_42 {dimension_numbers = #tpu.dot_dimension_numbers<[1], [0], [0], [1], [0, 0, 1, 1], [], []>} : vector<32x32xbf16>, vector<32x128xbf16>, vector<32x128xf32> -> vector<32x128xf32>
    %96 = arith.addf %95, %29 : vector<32x128xf32>
    %cst_43 = arith.constant 0.000000e+00 : f32
    %97 = vector.broadcast %cst_43 : f32 to vector<32x128xf32>
    %98 = arith.cmpf oge, %96, %97 : vector<32x128xf32>
    %cst_44 = arith.constant 2.000000e-01 : f32
    %99 = vector.broadcast %cst_44 : f32 to vector<32x128xf32>
    %100 = arith.mulf %99, %96 : vector<32x128xf32>
    %101 = arith.select %98, %96, %100 : vector<32x128xi1>, vector<32x128xf32>
    %102 = arith.maximumf %84, %101 : vector<32x128xf32>
    %cst_45 = arith.constant dense<-2147483648> : vector<32xi32>
    %103 = vector.multi_reduction <maxsi>, %90, %cst_45 [1] : vector<32x32xi32> to vector<32xi32>
    %104 = vector.shape_cast %103 : vector<32xi32> to vector<32x1xi32>
    %105 = vector.broadcast %104 : vector<32x1xi32> to vector<32x32xi32>
    %106 = arith.cmpi eq, %90, %105 : vector<32x32xi32>
    %c-2147483648_i32_46 = arith.constant -2147483648 : i32
    %107 = vector.broadcast %c-2147483648_i32_46 : i32 to vector<32x32xi32>
    %108 = arith.select %106, %107, %90 : vector<32x32xi1>, vector<32x32xi32>
    %cst_47 = arith.constant 1.000000e+00 : f32
    %cst_48 = arith.constant 0.000000e+00 : f32
    %109 = vector.broadcast %cst_47 : f32 to vector<32x32xf32>
    %110 = vector.broadcast %cst_48 : f32 to vector<32x32xf32>
    %111 = arith.select %106, %109, %110 : vector<32x32xi1>, vector<32x32xf32>
    %112 = arith.truncf %111 : vector<32x32xf32> to vector<32x32xbf16>
    %cst_49 = arith.constant dense<0.000000e+00> : vector<32x128xf32>
    %113 = tpu.matmul %112, %7, %cst_49 {dimension_numbers = #tpu.dot_dimension_numbers<[1], [0], [0], [1], [0, 0, 1, 1], [], []>} : vector<32x32xbf16>, vector<32x128xbf16>, vector<32x128xf32> -> vector<32x128xf32>
    %114 = arith.addf %113, %29 : vector<32x128xf32>
    %cst_50 = arith.constant 0.000000e+00 : f32
    %115 = vector.broadcast %cst_50 : f32 to vector<32x128xf32>
    %116 = arith.cmpf oge, %114, %115 : vector<32x128xf32>
    %cst_51 = arith.constant 2.000000e-01 : f32
    %117 = vector.broadcast %cst_51 : f32 to vector<32x128xf32>
    %118 = arith.mulf %117, %114 : vector<32x128xf32>
    %119 = arith.select %116, %114, %118 : vector<32x128xi1>, vector<32x128xf32>
    %120 = arith.maximumf %102, %119 : vector<32x128xf32>
    %cst_52 = arith.constant dense<-2147483648> : vector<32xi32>
    %121 = vector.multi_reduction <maxsi>, %108, %cst_52 [1] : vector<32x32xi32> to vector<32xi32>
    %122 = vector.shape_cast %121 : vector<32xi32> to vector<32x1xi32>
    %123 = vector.broadcast %122 : vector<32x1xi32> to vector<32x32xi32>
    %124 = arith.cmpi eq, %108, %123 : vector<32x32xi32>
    %c-2147483648_i32_53 = arith.constant -2147483648 : i32
    %125 = vector.broadcast %c-2147483648_i32_53 : i32 to vector<32x32xi32>
    %126 = arith.select %124, %125, %108 : vector<32x32xi1>, vector<32x32xi32>
    %cst_54 = arith.constant 1.000000e+00 : f32
    %cst_55 = arith.constant 0.000000e+00 : f32
    %127 = vector.broadcast %cst_54 : f32 to vector<32x32xf32>
    %128 = vector.broadcast %cst_55 : f32 to vector<32x32xf32>
    %129 = arith.select %124, %127, %128 : vector<32x32xi1>, vector<32x32xf32>
    %130 = arith.truncf %129 : vector<32x32xf32> to vector<32x32xbf16>
    %cst_56 = arith.constant dense<0.000000e+00> : vector<32x128xf32>
    %131 = tpu.matmul %130, %7, %cst_56 {dimension_numbers = #tpu.dot_dimension_numbers<[1], [0], [0], [1], [0, 0, 1, 1], [], []>} : vector<32x32xbf16>, vector<32x128xbf16>, vector<32x128xf32> -> vector<32x128xf32>
    %132 = arith.addf %131, %29 : vector<32x128xf32>
    %cst_57 = arith.constant 0.000000e+00 : f32
    %133 = vector.broadcast %cst_57 : f32 to vector<32x128xf32>
    %134 = arith.cmpf oge, %132, %133 : vector<32x128xf32>
    %cst_58 = arith.constant 2.000000e-01 : f32
    %135 = vector.broadcast %cst_58 : f32 to vector<32x128xf32>
    %136 = arith.mulf %135, %132 : vector<32x128xf32>
    %137 = arith.select %134, %132, %136 : vector<32x128xi1>, vector<32x128xf32>
    %138 = arith.maximumf %120, %137 : vector<32x128xf32>
    %cst_59 = arith.constant dense<-2147483648> : vector<32xi32>
    %139 = vector.multi_reduction <maxsi>, %126, %cst_59 [1] : vector<32x32xi32> to vector<32xi32>
    %140 = vector.shape_cast %139 : vector<32xi32> to vector<32x1xi32>
    %141 = vector.broadcast %140 : vector<32x1xi32> to vector<32x32xi32>
    %142 = arith.cmpi eq, %126, %141 : vector<32x32xi32>
    %c-2147483648_i32_60 = arith.constant -2147483648 : i32
    %143 = vector.broadcast %c-2147483648_i32_60 : i32 to vector<32x32xi32>
    %144 = arith.select %142, %143, %126 : vector<32x32xi1>, vector<32x32xi32>
    %cst_61 = arith.constant 1.000000e+00 : f32
    %cst_62 = arith.constant 0.000000e+00 : f32
    %145 = vector.broadcast %cst_61 : f32 to vector<32x32xf32>
    %146 = vector.broadcast %cst_62 : f32 to vector<32x32xf32>
    %147 = arith.select %142, %145, %146 : vector<32x32xi1>, vector<32x32xf32>
    %148 = arith.truncf %147 : vector<32x32xf32> to vector<32x32xbf16>
    %cst_63 = arith.constant dense<0.000000e+00> : vector<32x128xf32>
    %149 = tpu.matmul %148, %7, %cst_63 {dimension_numbers = #tpu.dot_dimension_numbers<[1], [0], [0], [1], [0, 0, 1, 1], [], []>} : vector<32x32xbf16>, vector<32x128xbf16>, vector<32x128xf32> -> vector<32x128xf32>
    %150 = arith.addf %149, %29 : vector<32x128xf32>
    %cst_64 = arith.constant 0.000000e+00 : f32
    %151 = vector.broadcast %cst_64 : f32 to vector<32x128xf32>
    %152 = arith.cmpf oge, %150, %151 : vector<32x128xf32>
    %cst_65 = arith.constant 2.000000e-01 : f32
    %153 = vector.broadcast %cst_65 : f32 to vector<32x128xf32>
    %154 = arith.mulf %153, %150 : vector<32x128xf32>
    %155 = arith.select %152, %150, %154 : vector<32x128xi1>, vector<32x128xf32>
    %156 = arith.maximumf %138, %155 : vector<32x128xf32>
    %cst_66 = arith.constant dense<-2147483648> : vector<32xi32>
    %157 = vector.multi_reduction <maxsi>, %144, %cst_66 [1] : vector<32x32xi32> to vector<32xi32>
    %158 = vector.shape_cast %157 : vector<32xi32> to vector<32x1xi32>
    %159 = vector.broadcast %158 : vector<32x1xi32> to vector<32x32xi32>
    %160 = arith.cmpi eq, %144, %159 : vector<32x32xi32>
    %cst_67 = arith.constant 1.000000e+00 : f32
    %cst_68 = arith.constant 0.000000e+00 : f32
    %161 = vector.broadcast %cst_67 : f32 to vector<32x32xf32>
    %162 = vector.broadcast %cst_68 : f32 to vector<32x32xf32>
    %163 = arith.select %160, %161, %162 : vector<32x32xi1>, vector<32x32xf32>
    %164 = arith.truncf %163 : vector<32x32xf32> to vector<32x32xbf16>
    %cst_69 = arith.constant dense<0.000000e+00> : vector<32x128xf32>
    %165 = tpu.matmul %164, %7, %cst_69 {dimension_numbers = #tpu.dot_dimension_numbers<[1], [0], [0], [1], [0, 0, 1, 1], [], []>} : vector<32x32xbf16>, vector<32x128xbf16>, vector<32x128xf32> -> vector<32x128xf32>
    %166 = arith.addf %165, %29 : vector<32x128xf32>
    %cst_70 = arith.constant 0.000000e+00 : f32
    %167 = vector.broadcast %cst_70 : f32 to vector<32x128xf32>
    %168 = arith.cmpf oge, %166, %167 : vector<32x128xf32>
    %cst_71 = arith.constant 2.000000e-01 : f32
    %169 = vector.broadcast %cst_71 : f32 to vector<32x128xf32>
    %170 = arith.mulf %169, %166 : vector<32x128xf32>
    %171 = arith.select %168, %166, %170 : vector<32x128xi1>, vector<32x128xf32>
    %172 = arith.maximumf %156, %171 : vector<32x128xf32>
    %173 = tpu.transpose %172, [1, 0] : vector<32x128xf32> -> vector<128x32xf32>
    %c0_72 = arith.constant 0 : index
    %c0_73 = arith.constant 0 : index
    %c0_74 = arith.constant 0 : index
    %174 = vector.load %arg8[%c0_72, %c0_73, %c0_74] : memref<1x128x32xf32, #tpu.memory_space<vmem>>, vector<1x128x32xf32>
    %175 = vector.shape_cast %174 : vector<1x128x32xf32> to vector<128x32xf32>
    %176 = vector.shape_cast %173 : vector<128x32xf32> to vector<1x128x32xf32>
    tpu.vector_store %arg8[%c0_72, %c0_73, %c0_74], %176 {strides = array<i32>} : memref<1x128x32xf32, #tpu.memory_space<vmem>>, vector<1x128x32xf32>,
    return
  }
  func.func @transform_0(%arg0: i32, %arg1: i32) -> (i32, i32, i32) {
    %c0_i32 = arith.constant 0 : i32
    %c0_i32_0 = arith.constant 0 : i32
    return %arg0, %arg1, %c0_i32 : i32, i32, i32
  }
  func.func @transform_1(%arg0: i32, %arg1: i32) -> (i32, i32, i32) {
    %c0_i32 = arith.constant 0 : i32
    %c0_i32_0 = arith.constant 0 : i32
    %c0_i32_1 = arith.constant 0 : i32
    return %arg0, %c0_i32, %c0_i32_0 : i32, i32, i32
  }
  func.func @transform_2(%arg0: i32, %arg1: i32) -> (i32, i32, i32) {
    %c0_i32 = arith.constant 0 : i32
    %c0_i32_0 = arith.constant 0 : i32
    %c0_i32_1 = arith.constant 0 : i32
    return %arg0, %c0_i32, %c0_i32_0 : i32, i32, i32
  }
  func.func @transform_3(%arg0: i32, %arg1: i32) -> (i32, i32, i32) {
    %c0_i32 = arith.constant 0 : i32
    %c0_i32_0 = arith.constant 0 : i32
    %c0_i32_1 = arith.constant 0 : i32
    return %arg0, %c0_i32, %c0_i32_0 : i32, i32, i32
  }
  func.func @transform_4(%arg0: i32, %arg1: i32) -> (i32, i32) {
    %c0_i32 = arith.constant 0 : i32
    %c0_i32_0 = arith.constant 0 : i32
    %c0_i32_1 = arith.constant 0 : i32
    return %c0_i32, %c0_i32_0 : i32, i32
  }
  func.func @transform_5(%arg0: i32, %arg1: i32) -> (i32, i32) {
    %c0_i32 = arith.constant 0 : i32
    %c0_i32_0 = arith.constant 0 : i32
    %c0_i32_1 = arith.constant 0 : i32
    return %c0_i32, %c0_i32_0 : i32, i32
  }
  func.func @transform_6(%arg0: i32, %arg1: i32) -> (i32, i32, i32) {
    %c0_i32 = arith.constant 0 : i32
    %c0_i32_0 = arith.constant 0 : i32
    return %arg0, %c0_i32, %arg1 : i32, i32, i32
  }
}

</mosaic_0001>

<bundles_post_ra>
// kernel: _lambda_.3
= control target key start
LH: loop header
LB: loop body
LE: loop exit
PB: predicated region body
PF: predicated region fallthrough
CT: control target
= control target key end

     0   :  { %11 = vsyncpa [#allocation3], 0  ;;  %s1886_s18 = smov 0   ;;  %s1888_s19 = smov 0   ;;  %s2106_s0 = inlined_call_operand.vmem [shape: f32[2,64,32], index: 0, kind: input, shape index: {}]   ;;  %s2107_s1 = inlined_call_operand.vmem [shape: bf16[64,512], index: 1, kind: input, shape index: {}]   ;;  %s2108_s2 = inlined_call_operand.vmem [shape: f32[1,512], index: 2, kind: input, shape index: {}]   ;;  %s2109_s3 = inlined_call_operand.hbm [shape: bf16[512,256], index: 3, kind: input, shape index: {}]   ;;  %s2110_s4 = inlined_call_operand.vmem [shape: bf16[2,32,512], index: 4, kind: output, shape index: {0}]   ;;  %s2111_s5 = inlined_call_operand.vmem [shape: bf16[2,32,256], index: 5, kind: output, shape index: {1}]  }
   0x1   :  { %s1890_s20 = smov 0  }
   0x2 LB: > { %s1331_s21 = sadd.s32 4294967295, %s1851_s20   ;;  %s29_s22 = sadd.s32 1, %s1847_s19  ;;  %s1851_s20 = sphi %s1890_s20, %s17_s20   ;;  %s1847_s19 = sphi %s1888_s19, %s2113_s19   ;;  %s1843_s18 = sphi %s1886_s18, %s2112_s18  }
   0x3   : > { %p31_p0 = scmp.ge.s32.totalorder %s29_s22, 2  ;;  %p1333_p1 = scmp.ge.s32.totalorder %s1851_s20, 1 }
   0x4   : > { %p181_p2 = scmp.lt.s32.totalorder %s1851_s20, 3  ;;  %p1765_p4 = scmp.eq.s32.totalorder %s1331_s21, 0 }
   0x5   : > { %s2115_s22 = smov (%p31_p0, %s29_s22), 0  ;;  %s198_s25 = sshll.u32 %s2109_s3, 4  ;;  %s199_s25 = int_to_ptr.hbm [resolvable:$true] %s198_s25 }
   0x6   : > { %p182_p3 = pnand %p1333_p1, %p181_p2  ;;  %s1853_s26 = smov [#allocation2]  }
   0x7   : > { %s200_s27 = sshll.u32 %s1853_s26, 4  ;;  %s1854_s28 = smov 128   ;;  %s201_s27 = int_to_ptr.vmem [resolvable:$true] %s200_s27 }
   0x8   : > { %p1761_p5 = pneg %p182_p3  ;;  %s1855_s29 = smov 8  }
   0x9   : > { %227 = sbr.rel (%p182_p3) target bundleno = 543 (0x21f), region = 36 }
   0xa   : > { %p1762_p6 = pnand %p1765_p4, %p1761_p5 }
   0xc   : > { %1764 = dma.hbm_to_vmem [thread:$0]  (!%p1762_p6), %s199_s25, 8192, %s201_s27, [#allocation3], %s1854_s28, %s1854_s28, %s1855_s29  }
   0xe   : > { %1838 = dma.done.wait (%p1765_p4), [#allocation3], 8192  }
   0xf   : > { %1840 = vsyncadd (%p1765_p4), [#allocation3], 4294959104  ;;  %p274_p7 = scmp.lt.s32.totalorder %s1843_s18, 1  ;;  %v1394_v6 = vld [vmem:[%s2107_s1 + $0x60] sm:$0xf]  ;;  %vm439_vm0 = vcmask 523264  }
  0x10   : > { %v1691_v7 = vld [vmem:[%s2107_s1 + $0x6c] sm:$0xf0]  ;;  %v1689_v9 = vld [vmem:[%s2107_s1 + $0x64] sm:$0xf]  ;;  %v1396_v10 = vld [vmem:[%s2107_s1 + $0x70] sm:$0xf0] }
  0x11   : > { %s2117_s18 = smov (!%p274_p7, %s1843_s18), 1  ;;  %v1395_v8 = vor.u32 %v1691_v7, %v1394_v6  ;;  %v1402_v11 = vld [vmem:[%s2107_s1 + $0x68] sm:$0xf]  ;;  %v1399_v12 = vor.u32 %v1689_v9, %v1396_v10  ;;  %v1692_v13 = vld [vmem:[%s2107_s1 + $0x74] sm:$0xf0] }
  0x12   : > { %s1674_s30 = sshll.u32 %s2117_s18, 6  ;;  %v1690_v14 = vld [vmem:[%s2107_s1 + $0x6c] sm:$0xf]  ;;  %v1404_v15 = vld [vmem:[%s2107_s1 + $0x78] sm:$0xf0]  ;;  %v1403_v16 = vor.u32 %v1692_v13, %v1402_v11 }
  0x13   : > { %s1916_s8 = scalar_lea.vmem %s2106_s0, %s1674_s30  ;;  %450 = vmatpush.bf16.msra.mxu0 %v1395_v8  ;;  %v1407_v17 = vor.u32 %v1690_v14, %v1404_v15  ;;  %v1378_v18 = vld [vmem:[%s2107_s1 + $0x40] sm:$0xf]  ;;  %v1687_v19 = vld [vmem:[%s2107_s1 + $0x4c] sm:$0xf0]  ;;  %v1685_v20 = vld [vmem:[%s2107_s1 + $0x44] sm:$0xf]  ;;  %469 = vmatpush.bf16.msra.mxu1 %v1399_v12  ;;  %s2040_s23 = scalar_lea.vmem %s2110_s4, %s1674_s30 }
  0x14   : > { %v305_v0 = vld [vmem:[%s1916_s8] sm:$0xff]  ;;  %v306_v1 = vld [vmem:[%s1916_s8 + $0x8] sm:$0xff]  ;;  %v307_v3 = vld [vmem:[%s1916_s8 + $0x10] sm:$0xff]  ;;  %v1379_v21 = vor.u32 %v1687_v19, %v1378_v18  ;;  %488 = vmatpush.bf16.msra.mxu2 %v1403_v16  ;;  %s1676_s30 = sshll.u32 %s2117_s18, 5 }
  0x15   : > { %v313_v2 = vpack.c.bf16 %v306_v1, %v305_v0  ;;  %v308_v4 = vld [vmem:[%s1916_s8 + $0x18] sm:$0xff]  ;;  %v1380_v22 = vld [vmem:[%s2107_s1 + $0x50] sm:$0xf0]  ;;  %v1386_v23 = vld [vmem:[%s2107_s1 + $0x48] sm:$0xf]  ;;  %507 = vmatpush.bf16.msra.mxu3 %v1407_v17  ;;  %s2091_s26 = scalar_lea.vmem %s2111_s5, %s1676_s30 }
  0x16   : > { %v314_v5 = vpack.c.bf16 %v308_v4, %v307_v3  ;;  %v1688_v24 = vld [vmem:[%s2107_s1 + $0x54] sm:$0xf0]  ;;  %v1383_v25 = vor.u32 %v1685_v20, %v1380_v22  ;;  %v1686_v27 = vld [vmem:[%s2107_s1 + $0x4c] sm:$0xf]  ;;  %v1388_v28 = vld [vmem:[%s2107_s1 + $0x58] sm:$0xf0] }
  0x17   : > { %343 = vxpose.xlu0.c.b16.start [1/4] (short) (narrow) %v313_v2, 32  ;;  %v1387_v26 = vor.u32 %v1688_v24, %v1386_v23  ;;  %v1362_v29 = vld [vmem:[%s2107_s1 + $0x20] sm:$0xf]  ;;  %v1391_v30 = vor.u32 %v1686_v27, %v1388_v28  ;;  %v1683_v31 = vld [vmem:[%s2107_s1 + $0x2c] sm:$0xf0]  ;;  %v310_v35 = vld [vmem:[%s1916_s8 + $0x28] sm:$0xff]  ;;  %451 = vmatpush.bf16.msra.mxu0 %v1379_v21 }
  0x18   : > { %v1681_v32 = vld [vmem:[%s2107_s1 + $0x24] sm:$0xf]  ;;  %v1364_v33 = vld [vmem:[%s2107_s1 + $0x30] sm:$0xf0]  ;;  %v1363_v36 = vor.u32 %v1683_v31, %v1362_v29  ;;  %v1370_v37 = vld [vmem:[%s2107_s1 + $0x28] sm:$0xf]  ;;  %470 = vmatpush.bf16.msra.mxu1 %v1383_v25 }
  0x19   : > { %v309_v34 = vld [vmem:[%s1916_s8 + $0x20] sm:$0xff]  ;;  %v1684_v38 = vld [vmem:[%s2107_s1 + $0x34] sm:$0xf0]  ;;  %v1682_v39 = vld [vmem:[%s2107_s1 + $0x2c] sm:$0xf]  ;;  %v1367_v40 = vor.u32 %v1681_v32, %v1364_v33  ;;  %489 = vmatpush.bf16.msra.mxu2 %v1387_v26  ;;  %508 = vmatpush.bf16.msra.mxu3 %v1391_v30 }
  0x1a   : > { %v1372_v41 = vld [vmem:[%s2107_s1 + $0x38] sm:$0xf0]  ;;  %v1346_v42 = vld [vmem:[%s2107_s1] sm:$0xf]  ;;  %v1679_v43 = vld [vmem:[%s2107_s1 + $0xc] sm:$0xf0]  ;;  %v1371_v44 = vor.u32 %v1684_v38, %v1370_v37  ;;  %v315_v53 = vpack.c.bf16 %v310_v35, %v309_v34 }
  0x1b   : > { %v1375_v45 = vor.u32 %v1682_v39, %v1372_v41  ;;  %v1677_v46 = vld [vmem:[%s2107_s1 + $0x4] sm:$0xf]  ;;  %v1348_v47 = vld [vmem:[%s2107_s1 + $0x10] sm:$0xf0]  ;;  %v1354_v48 = vld [vmem:[%s2107_s1 + $0x8] sm:$0xf]  ;;  %452 = vmatpush.bf16.msra.mxu0 %v1363_v36  ;;  %v1347_v52 = vor.u32 %v1679_v43, %v1346_v42 }
  0x1c   : > { %v1680_v49 = vld [vmem:[%s2107_s1 + $0x14] sm:$0xf0]  ;;  %v1678_v50 = vld [vmem:[%s2107_s1 + $0xc] sm:$0xf]  ;;  %v1356_v51 = vld [vmem:[%s2107_s1 + $0x18] sm:$0xf0]  ;;  %471 = vmatpush.bf16.msra.mxu1 %v1367_v40  ;;  %v1351_v54 = vor.u32 %v1677_v46, %v1348_v47 }
  0x1d   : > { %490 = vmatpush.bf16.msra.mxu2 %v1371_v44  ;;  %509 = vmatpush.bf16.msra.mxu3 %v1375_v45  ;;  %v1355_v55 = vor.u32 %v1680_v49, %v1354_v48  ;;  %v1359_v56 = vor.u32 %v1678_v50, %v1356_v51  ;;  %v311_v57 = vld [vmem:[%s1916_s8 + $0x30] sm:$0xff]  ;;  %v312_v58 = vld [vmem:[%s1916_s8 + $0x38] sm:$0xff]  ;;  %v1466_v1 = vld [vmem:[#allocation2 + $0x60] sm:$0xf] }
  0x1e   : > { %v316_v59 = vpack.c.bf16 %v312_v58, %v311_v57  ;;  %v1474_v60 = vld [vmem:[#allocation2 + $0x70] sm:$0xf]  ;;  %v1708_v61 = vld [vmem:[#allocation2 + $0x74] sm:$0xf0]  ;;  %v1706_v2 = vld [vmem:[#allocation2 + $0x64] sm:$0xf0] }
  0x1f   : > { %453 = vmatpush.bf16.msra.mxu0 %v1347_v52  ;;  %v1538_v62 = vld [vmem:[#allocation2 + $0xf0] sm:$0xf]  ;;  %v1475_v63 = vor.u32 %v1708_v61, %v1474_v60  ;;  %v1724_v0 = vld [vmem:[#allocation2 + $0xf4] sm:$0xf0]  ;;  %v1530_v4 = vld [vmem:[#allocation2 + $0xe0] sm:$0xf]  ;;  %v1467_v7 = vor.u32 %v1706_v2, %v1466_v1 }
  0x20   : > { %472 = vmatpush.bf16.msra.mxu1 %v1351_v54  ;;  %v1539_v3 = vor.u32 %v1724_v0, %v1538_v62  ;;  %v1602_v6 = vld [vmem:[#allocation2 + $0x170] sm:$0xf]  ;;  %v1740_v8 = vld [vmem:[#allocation2 + $0x174] sm:$0xf0]  ;;  %v1594_v18 = vld [vmem:[#allocation2 + $0x160] sm:$0xf] }
  0x21   : > { %491 = vmatpush.bf16.msra.mxu2 %v1355_v55  ;;  %510 = vmatpush.bf16.msra.mxu3 %v1359_v56  ;;  %v1666_v9 = vld [vmem:[#allocation2 + $0x1f0] sm:$0xf]  ;;  %v1756_v10 = vld [vmem:[#allocation2 + $0x1f4] sm:$0xf0]  ;;  %v1603_v12 = vor.u32 %v1740_v8, %v1602_v6  ;;  %v1738_v19 = vld [vmem:[#allocation2 + $0x164] sm:$0xf0] }
  0x22   : > { %v1667_v13 = vor.u32 %v1756_v10, %v1666_v9  ;;  %v1458_v14 = vld [vmem:[#allocation2 + $0x50] sm:$0xf]  ;;  %v1704_v15 = vld [vmem:[#allocation2 + $0x54] sm:$0xf0]  ;;  %v1595_v20 = vor.u32 %v1738_v19, %v1594_v18  ;;  %v1658_v21 = vld [vmem:[#allocation2 + $0x1e0] sm:$0xf] }
  0x23   : > { %1010 = vmatpush.bf16.msrb.mxu0 %v1475_v63  ;;  %v1522_v16 = vld [vmem:[#allocation2 + $0xd0] sm:$0xf]  ;;  %v1720_v17 = vld [vmem:[#allocation2 + $0xd4] sm:$0xf0]  ;;  %v1754_v22 = vld [vmem:[#allocation2 + $0x1e4] sm:$0xf0]  ;;  %v1459_v23 = vor.u32 %v1704_v15, %v1458_v14 }
  0x24   : > { %1029 = vmatpush.bf16.msrb.mxu1 %v1539_v3  ;;  %v1659_v24 = vor.u32 %v1754_v22, %v1658_v21  ;;  %v1523_v25 = vor.u32 %v1720_v17, %v1522_v16  ;;  %v1450_v28 = vld [vmem:[#allocation2 + $0x40] sm:$0xf]  ;;  %v1702_v29 = vld [vmem:[#allocation2 + $0x44] sm:$0xf0]  ;;  %v1586_v34 = vld [vmem:[#allocation2 + $0x150] sm:$0xf] }
  0x25   : > { %1048 = vmatpush.bf16.msrb.mxu2 %v1603_v12  ;;  %1067 = vmatpush.bf16.msrb.mxu3 %v1667_v13  ;;  %v1514_v30 = vld [vmem:[#allocation2 + $0xc0] sm:$0xf]  ;;  %v1451_v31 = vor.u32 %v1702_v29, %v1450_v28  ;;  %v1718_v32 = vld [vmem:[#allocation2 + $0xc4] sm:$0xf0]  ;;  %v1736_v35 = vld [vmem:[#allocation2 + $0x154] sm:$0xf0] }
  0x26   : > { %v1515_v33 = vor.u32 %v1718_v32, %v1514_v30  ;;  %v1650_v36 = vld [vmem:[#allocation2 + $0x1d0] sm:$0xf]  ;;  %v1587_v37 = vor.u32 %v1736_v35, %v1586_v34  ;;  %v1752_v38 = vld [vmem:[#allocation2 + $0x1d4] sm:$0xf0]  ;;  %v1578_v46 = vld [vmem:[#allocation2 + $0x140] sm:$0xf] }
  0x27   : > { %344 = vxpose.xlu0.c.b16.cont [2/4] (short) (narrow) %v314_v5, 32  ;;  %v1722_v5 = vld [vmem:[#allocation2 + $0xe4] sm:$0xf0]  ;;  %1011 = vmatpush.bf16.msrb.mxu0 %v1467_v7  ;;  %v1651_v39 = vor.u32 %v1752_v38, %v1650_v36  ;;  %v1442_v40 = vld [vmem:[#allocation2 + $0x30] sm:$0xf] }
  0x28   : > { %v1531_v11 = vor.u32 %v1722_v5, %v1530_v4  ;;  %v1700_v41 = vld [vmem:[#allocation2 + $0x34] sm:$0xf0]  ;;  %v1506_v42 = vld [vmem:[#allocation2 + $0xb0] sm:$0xf]  ;;  %v1734_v47 = vld [vmem:[#allocation2 + $0x144] sm:$0xf0] }
  0x29   : > { %1049 = vmatpush.bf16.msrb.mxu2 %v1595_v20  ;;  %1068 = vmatpush.bf16.msrb.mxu3 %v1659_v24  ;;  %v1443_v43 = vor.u32 %v1700_v41, %v1442_v40  ;;  %v1716_v44 = vld [vmem:[#allocation2 + $0xb4] sm:$0xf0]  ;;  %v1642_v48 = vld [vmem:[#allocation2 + $0x1c0] sm:$0xf]  ;;  %v1579_v49 = vor.u32 %v1734_v47, %v1578_v46  ;;  %v1750_v50 = vld [vmem:[#allocation2 + $0x1c4] sm:$0xf0] }
  0x2a   : > { %1030 = vmatpush.bf16.msrb.mxu1 %v1531_v11  ;;  %v1507_v45 = vor.u32 %v1716_v44, %v1506_v42  ;;  %v1643_v51 = vor.u32 %v1750_v50, %v1642_v48  ;;  %v1434_v52 = vld [vmem:[#allocation2 + $0x20] sm:$0xf]  ;;  %v1714_v56 = vld [vmem:[#allocation2 + $0xa4] sm:$0xf0]  ;;  %v1570_v58 = vld [vmem:[#allocation2 + $0x130] sm:$0xf] }
  0x2b   : > { %1012 = vmatpush.bf16.msrb.mxu0 %v1459_v23  ;;  %v1498_v54 = vld [vmem:[#allocation2 + $0xa0] sm:$0xf]  ;;  %v1634_v60 = vld [vmem:[#allocation2 + $0x1b0] sm:$0xf]  ;;  %v1748_v62 = vld [vmem:[#allocation2 + $0x1b4] sm:$0xf0] }
  0x2c   : > { %v1499_v57 = vor.u32 %v1714_v56, %v1498_v54  ;;  %v1635_v63 = vor.u32 %v1748_v62, %v1634_v60  ;;  %v1426_v0 = vld [vmem:[#allocation2 + $0x10] sm:$0xf]  ;;  %v1696_v1 = vld [vmem:[#allocation2 + $0x14] sm:$0xf0]  ;;  %v1562_v6 = vld [vmem:[#allocation2 + $0x120] sm:$0xf] }
  0x2d   : > { %1050 = vmatpush.bf16.msrb.mxu2 %v1587_v37  ;;  %1069 = vmatpush.bf16.msrb.mxu3 %v1651_v39  ;;  %v1490_v2 = vld [vmem:[#allocation2 + $0x90] sm:$0xf]  ;;  %v1427_v3 = vor.u32 %v1696_v1, %v1426_v0  ;;  %v1712_v4 = vld [vmem:[#allocation2 + $0x94] sm:$0xf0]  ;;  %v1730_v7 = vld [vmem:[#allocation2 + $0x124] sm:$0xf0] }
  0x2e   : > { %1031 = vmatpush.bf16.msrb.mxu1 %v1523_v25  ;;  %v1491_v5 = vor.u32 %v1712_v4, %v1490_v2  ;;  %v1626_v8 = vld [vmem:[#allocation2 + $0x1a0] sm:$0xf]  ;;  %v1563_v9 = vor.u32 %v1730_v7, %v1562_v6  ;;  %v1746_v10 = vld [vmem:[#allocation2 + $0x1a4] sm:$0xf0]  ;;  %v1554_v18 = vld [vmem:[#allocation2 + $0x110] sm:$0xf] }
  0x2f   : > { %1013 = vmatpush.bf16.msrb.mxu0 %v1451_v31  ;;  %v1627_v11 = vor.u32 %v1746_v10, %v1626_v8  ;;  %v1418_v12 = vld [vmem:[#allocation2] sm:$0xf]  ;;  %v1694_v13 = vld [vmem:[#allocation2 + $0x4] sm:$0xf0]  ;;  %v1728_v19 = vld [vmem:[#allocation2 + $0x114] sm:$0xf0] }
  0x30   : > { %v1482_v14 = vld [vmem:[#allocation2 + $0x80] sm:$0xf]  ;;  %v1419_v15 = vor.u32 %v1694_v13, %v1418_v12  ;;  %v1710_v16 = vld [vmem:[#allocation2 + $0x84] sm:$0xf0]  ;;  %v1618_v20 = vld [vmem:[#allocation2 + $0x190] sm:$0xf]  ;;  %v1555_v21 = vor.u32 %v1728_v19, %v1554_v18 }
  0x31   : > { %1051 = vmatpush.bf16.msrb.mxu2 %v1579_v49  ;;  %1070 = vmatpush.bf16.msrb.mxu3 %v1643_v51  ;;  %v1483_v17 = vor.u32 %v1710_v16, %v1482_v14  ;;  %v1744_v22 = vld [vmem:[#allocation2 + $0x194] sm:$0xf0]  ;;  %v1707_v24 = vld [vmem:[#allocation2 + $0x74] sm:$0xf]  ;;  %v1476_v25 = vld [vmem:[#allocation2 + $0x78] sm:$0xf0] }
  0x32   : > { %1032 = vmatpush.bf16.msrb.mxu1 %v1515_v33  ;;  %v1619_v23 = vor.u32 %v1744_v22, %v1618_v20  ;;  %v1540_v28 = vld [vmem:[#allocation2 + $0xf8] sm:$0xf0]  ;;  %v1546_v30 = vld [vmem:[#allocation2 + $0x100] sm:$0xf]  ;;  %v1726_v31 = vld [vmem:[#allocation2 + $0x104] sm:$0xf0] }
  0x33   : > { %1014 = vmatpush.bf16.msrb.mxu0 %v1443_v43  ;;  %v1610_v32 = vld [vmem:[#allocation2 + $0x180] sm:$0xf]  ;;  %v1547_v33 = vor.u32 %v1726_v31, %v1546_v30  ;;  %v1742_v34 = vld [vmem:[#allocation2 + $0x184] sm:$0xf0]  ;;  %v1705_v36 = vld [vmem:[#allocation2 + $0x64] sm:$0xf] }
  0x34   : > { %v1611_v35 = vor.u32 %v1742_v34, %v1610_v32  ;;  %v1468_v37 = vld [vmem:[#allocation2 + $0x68] sm:$0xf0]  ;;  %v1721_v38 = vld [vmem:[#allocation2 + $0xe4] sm:$0xf]  ;;  %v333_v39 = vld [vmem:[%s2108_s2] sm:$0xf] }
  0x35   : > { %1071 = vmatpush.bf16.msrb.mxu3 %v1635_v63  ;;  %v1471_v40 = vor.u32 %v1705_v36, %v1468_v37  ;;  %v1532_v41 = vld [vmem:[#allocation2 + $0xe8] sm:$0xf0]  ;;  %v1739_v43 = vld [vmem:[#allocation2 + $0x174] sm:$0xf]  ;;  %v1604_v44 = vld [vmem:[#allocation2 + $0x178] sm:$0xf0] }
  0x36   : > { %1033 = vmatpush.bf16.msrb.mxu1 %v1507_v45  ;;  %v1535_v42 = vor.u32 %v1721_v38, %v1532_v41  ;;  %v1755_v45 = vld [vmem:[#allocation2 + $0x1f4] sm:$0xf]  ;;  %v1607_v46 = vor.u32 %v1739_v43, %v1604_v44  ;;  %v1668_v47 = vld [vmem:[#allocation2 + $0x1f8] sm:$0xf0]  ;;  %v2029_v60 = vperm.slane %v333_v39, 2  ;;  %v2033_v7 = vperm.slane %v333_v39, 3 }
  0x37   : > { %345 = vxpose.xlu0.c.b16.cont [3/4] (short) (narrow) %v315_v53, 32  ;;  %v1698_v53 = vld [vmem:[#allocation2 + $0x24] sm:$0xf0]  ;;  %v1671_v48 = vor.u32 %v1755_v45, %v1668_v47  ;;  %v1703_v49 = vld [vmem:[#allocation2 + $0x54] sm:$0xf] }
  0x38   : > { %v1435_v55 = vor.u32 %v1698_v53, %v1434_v52  ;;  %v1460_v50 = vld [vmem:[#allocation2 + $0x58] sm:$0xf0]  ;;  %v1719_v51 = vld [vmem:[#allocation2 + $0xd4] sm:$0xf]  ;;  %v2025_v52 = vperm.slane %v333_v39, 0  ;;  %v2027_v53 = vperm.slane %v333_v39, 1 }
  0x39   : > { %1072 = vmatpush.bf16.msrb.mxu3 %v1627_v11  ;;  %v1463_v54 = vor.u32 %v1703_v49, %v1460_v50  ;;  %v1660_v62 = vld [vmem:[#allocation2 + $0x1e8] sm:$0xf0]  ;;  %v1701_v2 = vld [vmem:[#allocation2 + $0x44] sm:$0xf]  ;;  %v1735_v11 = vld [vmem:[#allocation2 + $0x154] sm:$0xf] }
  0x3a   : > { %1015 = vmatpush.bf16.msrb.mxu0 %v1435_v55  ;;  %1034 = vmatpush.bf16.msrb.mxu1 %v1499_v57  ;;  %v1524_v55 = vld [vmem:[#allocation2 + $0xd8] sm:$0xf0]  ;;  %v1737_v57 = vld [vmem:[#allocation2 + $0x164] sm:$0xf]  ;;  %v1751_v13 = vld [vmem:[#allocation2 + $0x1d4] sm:$0xf] }
  0x3b   : > { %v1527_v56 = vor.u32 %v1719_v51, %v1524_v55  ;;  %v1717_v4 = vld [vmem:[#allocation2 + $0xc4] sm:$0xf]  ;;  %v1588_v12 = vld [vmem:[#allocation2 + $0x158] sm:$0xf0]  ;;  %v1699_v18 = vld [vmem:[#allocation2 + $0x34] sm:$0xf] }
  0x3c   : > { %v1591_v16 = vor.u32 %v1735_v11, %v1588_v12  ;;  %v1444_v19 = vld [vmem:[#allocation2 + $0x38] sm:$0xf0]  ;;  %v1749_v30 = vld [vmem:[#allocation2 + $0x1c4] sm:$0xf]  ;;  %v1644_v34 = vld [vmem:[#allocation2 + $0x1c8] sm:$0xf0] }
  0x3d   : > { %1073 = vmatpush.bf16.msrb.mxu3 %v1619_v23  ;;  %v1447_v23 = vor.u32 %v1699_v18, %v1444_v19  ;;  %v1436_v36 = vld [vmem:[#allocation2 + $0x28] sm:$0xf0]  ;;  %v1647_v43 = vor.u32 %v1749_v30, %v1644_v34  ;;  %v1713_v45 = vld [vmem:[#allocation2 + $0xa4] sm:$0xf] }
  0x3e   : > { %1016 = vmatpush.bf16.msrb.mxu0 %v1427_v3  ;;  %1035 = vmatpush.bf16.msrb.mxu1 %v1491_v5  ;;  %v1452_v3 = vld [vmem:[#allocation2 + $0x48] sm:$0xf0]  ;;  %v1709_v30 = vld [vmem:[#allocation2 + $0x84] sm:$0xf] }
  0x3f   : > { %v1455_v8 = vor.u32 %v1701_v2, %v1452_v3  ;;  %v1428_v2 = vld [vmem:[#allocation2 + $0x18] sm:$0xf0] }
  0x41   : > { %1074 = vmatpush.bf16.msrb.mxu3 %v1611_v35  ;;  %v1697_v35 = vld [vmem:[#allocation2 + $0x24] sm:$0xf] }
  0x42   : > { %1017 = vmatpush.bf16.msrb.mxu0 %v1419_v15  ;;  %1036 = vmatpush.bf16.msrb.mxu1 %v1483_v17  ;;  %v1652_v17 = vld [vmem:[#allocation2 + $0x1d8] sm:$0xf0]  ;;  %v1439_v44 = vor.u32 %v1697_v35, %v1436_v36 }
  0x43   : > { %v1655_v22 = vor.u32 %v1751_v13, %v1652_v17 }
  0x47   : > { %346 = vxpose.xlu0.c.b16.end [4/4] (short) (narrow) %v316_v59, 32  ;;  %v1732_v59 = vld [vmem:[#allocation2 + $0x134] sm:$0xf0] }
  0x48   : > { %v1571_v61 = vor.u32 %v1732_v59, %v1570_v58  ;;  %v1596_v58 = vld [vmem:[#allocation2 + $0x168] sm:$0xf0]  ;;  %v1753_v59 = vld [vmem:[#allocation2 + $0x1e4] sm:$0xf] }
  0x49   : > { %v1663_v1 = vor.u32 %v1753_v59, %v1660_v62 }
  0x4a   : > { %1052 = vmatpush.bf16.msrb.mxu2 %v1571_v61  ;;  %v1599_v61 = vor.u32 %v1737_v57, %v1596_v58  ;;  %v1572_v57 = vld [vmem:[#allocation2 + $0x138] sm:$0xf0]  ;;  %v1747_v58 = vld [vmem:[#allocation2 + $0x1b4] sm:$0xf] }
  0x4e   : > { %1053 = vmatpush.bf16.msrb.mxu2 %v1563_v9  ;;  %v1516_v9 = vld [vmem:[#allocation2 + $0xc8] sm:$0xf0] }
  0x4f   : > { %v1519_v10 = vor.u32 %v1717_v4, %v1516_v9  ;;  %v1729_v9 = vld [vmem:[#allocation2 + $0x124] sm:$0xf] }
  0x52   : > { %1054 = vmatpush.bf16.msrb.mxu2 %v1555_v21 }
  0x56   : > { %1055 = vmatpush.bf16.msrb.mxu2 %v1547_v33 }
  0xc3   : > { %v351_v26 = vpop.trf.xlu0 }
  0xc4   : > { %1408 = vmatmul.msk.bf16.vlgmr.msra.gmra.mxu0 %vm439_vm0, %v351_v26  ;;  %1410 = vmatmul.msk.bf16.vlgmr.msra.gmra.mxu1 %vm439_vm0, %v351_v26 }
  0xc5   : > { %1412 = vmatmul.msk.bf16.vlgmr.msra.gmra.mxu2 %vm439_vm0, %v351_v26  ;;  %1414 = vmatmul.msk.bf16.vlgmr.msra.gmra.mxu3 %vm439_vm0, %v351_v26  ;;  %v1723_v26 = vld [vmem:[#allocation2 + $0xf4] sm:$0xf] }
  0xc6   : > { %v1543_v29 = vor.u32 %v1723_v26, %v1540_v28  ;;  %1124 = vmatpush.bf16.msra.mxu2 %v1607_v46  ;;  %1143 = vmatpush.bf16.msra.mxu3 %v1671_v48  ;;  %v1733_v28 = vld [vmem:[#allocation2 + $0x144] sm:$0xf]  ;;  %v1500_v46 = vld [vmem:[#allocation2 + $0xa8] sm:$0xf0] }
  0xc7   : > { %v1503_v55 = vor.u32 %v1713_v45, %v1500_v46 }
  0xc8   : > { %1105 = vmatpush.bf16.msra.mxu1 %v1543_v29  ;;  %v1580_v29 = vld [vmem:[#allocation2 + $0x148] sm:$0xf0] }
  0xc9   : > { %v1583_v33 = vor.u32 %v1733_v28, %v1580_v29  ;;  %v1420_v29 = vld [vmem:[#allocation2 + $0x8] sm:$0xf0] }
  0xca   : > { %1125 = vmatpush.bf16.msra.mxu2 %v1599_v61  ;;  %1144 = vmatpush.bf16.msra.mxu3 %v1663_v1  ;;  %v1695_v1 = vld [vmem:[#allocation2 + $0x14] sm:$0xf] }
  0xcc   : > { %1106 = vmatpush.bf16.msra.mxu1 %v1535_v42 }
  0xce   : > { %1126 = vmatpush.bf16.msra.mxu2 %v1591_v16  ;;  %1145 = vmatpush.bf16.msra.mxu3 %v1655_v22  ;;  %v1745_v16 = vld [vmem:[#allocation2 + $0x1a4] sm:$0xf] }
  0xd0   : > { %1107 = vmatpush.bf16.msra.mxu1 %v1527_v56  ;;  %v1731_v56 = vld [vmem:[#allocation2 + $0x134] sm:$0xf] }
  0xd2   : > { %1127 = vmatpush.bf16.msra.mxu2 %v1583_v33  ;;  %1146 = vmatpush.bf16.msra.mxu3 %v1647_v43 }
  0xd3   : > { %v352_v27 = vpop.trf.xlu0 }
  0xd4   : > { %1409 = vmatmul.msk.bf16.gmra.mxu0 %vm439_vm0, %v352_v27  ;;  %1411 = vmatmul.msk.bf16.gmra.mxu1 %vm439_vm0, %v352_v27 }
  0xd5   : > { %1413 = vmatmul.msk.bf16.gmra.mxu2 %vm439_vm0, %v352_v27  ;;  %1415 = vmatmul.msk.bf16.gmra.mxu3 %vm439_vm0, %v352_v27  ;;  %v1479_v27 = vor.u32 %v1707_v24, %v1476_v25  ;;  %v1715_v24 = vld [vmem:[#allocation2 + $0xb4] sm:$0xf]  ;;  %v1508_v25 = vld [vmem:[#allocation2 + $0xb8] sm:$0xf0] }
  0xd6   : > { %1108 = vmatpush.bf16.msra.mxu1 %v1519_v10 }
  0xd7   : > { %1086 = vmatpush.bf16.msra.mxu0 %v1479_v27  ;;  %v1511_v27 = vor.u32 %v1715_v24, %v1508_v25  ;;  %v1693_v24 = vld [vmem:[#allocation2 + $0x4] sm:$0xf] }
  0xd8   : > { %v1423_v46 = vor.u32 %v1693_v24, %v1420_v29 }
  0xda   : > { %1109 = vmatpush.bf16.msra.mxu1 %v1511_v27 }
  0xdb   : > { %1087 = vmatpush.bf16.msra.mxu0 %v1471_v40 }
  0xde   : > { %1110 = vmatpush.bf16.msra.mxu1 %v1503_v55  ;;  %v1548_v55 = vld [vmem:[#allocation2 + $0x108] sm:$0xf0] }
  0xdf   : > { %1088 = vmatpush.bf16.msra.mxu0 %v1463_v54 }
  0xe3   : > { %1089 = vmatpush.bf16.msra.mxu0 %v1455_v8  ;;  %v1492_v8 = vld [vmem:[#allocation2 + $0x98] sm:$0xf0] }
  0xe7   : > { %1090 = vmatpush.bf16.msra.mxu0 %v1447_v23  ;;  %v1628_v23 = vld [vmem:[#allocation2 + $0x1a8] sm:$0xf0] }
  0xe8   : > { %v1631_v28 = vor.u32 %v1745_v16, %v1628_v23 }
  0xeb   : > { %1091 = vmatpush.bf16.msra.mxu0 %v1439_v44 }
 0x141   : > { %v455_v63 = vpop.f32.mrf.mxu0  ;;  %v474_v0 = vpop.f32.mrf.mxu1 }
 0x142   : > { %v456_v5 = vadd.f32 %v455_v63, %v2025_v52  ;;  %v475_v6 = vadd.f32 %v474_v0, %v2027_v53  ;;  %v1575_v63 = vor.u32 %v1731_v56, %v1572_v57  ;;  %v1636_v0 = vld [vmem:[#allocation2 + $0x1b8] sm:$0xf0] }
 0x143   : > { %v1639_v4 = vor.u32 %v1747_v58, %v1636_v0 }
 0x144   : > { %vm522_vm1 = vcmp.ge.f32.partialorder %v456_v5, 0.0  ;;  %v538_v14 = vmul.f32 0.2, %v456_v5  ;;  %vm523_vm2 = vcmp.ge.f32.partialorder %v475_v6, 0.0  ;;  %v539_v15 = vmul.f32 0.2, %v475_v6  ;;  %1128 = vmatpush.bf16.msra.mxu2 %v1575_v63 }
 0x145   : > { %1147 = vmatpush.bf16.msra.mxu3 %v1639_v4 }
 0x146   : > { %v554_v20 = vsel %vm522_vm1, %v456_v5, %v538_v14  ;;  %v555_v21 = vsel %vm523_vm2, %v475_v6, %v539_v15  ;;  %v1431_v5 = vor.u32 %v1695_v1, %v1428_v2  ;;  %v1711_v6 = vld [vmem:[#allocation2 + $0x94] sm:$0xf]  ;;  %v1564_v15 = vld [vmem:[#allocation2 + $0x128] sm:$0xf0] }
 0x147   : > { %v2042_v26 = vpack.c.bf16 %v555_v21, %v554_v20  ;;  %v1495_v14 = vor.u32 %v1711_v6, %v1492_v8  ;;  %v1567_v27 = vor.u32 %v1729_v9, %v1564_v15  ;;  %v1741_v9 = vld [vmem:[#allocation2 + $0x184] sm:$0xf] }
 0x148   : > { %v493_v31 = vpop.f32.mrf.mxu2  ;;  %v512_v32 = vpop.f32.mrf.mxu3  ;;  %1092 = vmatpush.bf16.msra.mxu0 %v1431_v5 }
 0x149   : > { %578 = vst [vmem:[%s2040_s23] sm:$0xff] %v2042_v26  ;;  %v494_v37 = vadd.f32 %v493_v31, %v2029_v60  ;;  %v513_v38 = vadd.f32 %v512_v32, %v2033_v7  ;;  %v457_v39 = vpop.f32.mrf.mxu0  ;;  %v476_v40 = vpop.f32.mrf.mxu1  ;;  %v658_v12 = vunpack.c.l.b16 %v2042_v26  ;;  %v659_v13 = vunpack.c.h.b16 %v2042_v26  ;;  %v1484_v31 = vld [vmem:[#allocation2 + $0x88] sm:$0xf0]  ;;  %1111 = vmatpush.bf16.msra.mxu1 %v1495_v14  ;;  %1129 = vmatpush.bf16.msra.mxu2 %v1567_v27 }
 0x14a   : > { %v458_v41 = vadd.f32 %v457_v39, %v2025_v52  ;;  %v477_v42 = vadd.f32 %v476_v40, %v2027_v53  ;;  %1148 = vmatpush.bf16.msra.mxu3 %v1631_v28  ;;  %v1727_v40 = vld [vmem:[#allocation2 + $0x114] sm:$0xf] }
 0x14b   : > { %vm524_vm3 = vcmp.ge.f32.partialorder %v494_v37, 0.0  ;;  %v540_v47 = vmul.f32 0.2, %v494_v37  ;;  %vm525_vm4 = vcmp.ge.f32.partialorder %v513_v38, 0.0  ;;  %v541_v48 = vmul.f32 0.2, %v513_v38 }
 0x14c   : > { %vm526_vm5 = vcmp.ge.f32.partialorder %v458_v41, 0.0  ;;  %v542_v49 = vmul.f32 0.2, %v458_v41  ;;  %vm527_vm6 = vcmp.ge.f32.partialorder %v477_v42, 0.0  ;;  %v543_v50 = vmul.f32 0.2, %v477_v42  ;;  %1093 = vmatpush.bf16.msra.mxu0 %v1423_v46 }
 0x14d   : > { %v556_v51 = vsel %vm524_vm3, %v494_v37, %v540_v47  ;;  %v557_v54 = vsel %vm525_vm4, %v513_v38, %v541_v48  ;;  %v1620_v47 = vld [vmem:[#allocation2 + $0x198] sm:$0xf0] }
 0x14e   : > { %v2050_v59 = vpack.c.bf16 %v557_v54, %v556_v51  ;;  %v558_v61 = vsel %vm526_vm5, %v458_v41, %v542_v49  ;;  %v559_v62 = vsel %vm527_vm6, %v477_v42, %v543_v50  ;;  %v1556_v41 = vld [vmem:[#allocation2 + $0x118] sm:$0xf0]  ;;  %v1743_v42 = vld [vmem:[#allocation2 + $0x194] sm:$0xf]  ;;  %v1487_v50 = vor.u32 %v1709_v30, %v1484_v31  ;;  %v1725_v54 = vld [vmem:[#allocation2 + $0x104] sm:$0xf] }
 0x14f   : > { %v572_v3 = vpack.c.bf16 %v559_v62, %v558_v61  ;;  %v1559_v51 = vor.u32 %v1727_v40, %v1556_v41  ;;  %v1623_v63 = vor.u32 %v1743_v42, %v1620_v47  ;;  %v1551_v4 = vor.u32 %v1725_v54, %v1548_v55 }
 0x150   : > { %579 = vst [vmem:[%s2040_s23 + $0x8] sm:$0xff] %v2050_v59  ;;  %v495_v10 = vpop.f32.mrf.mxu2  ;;  %v514_v11 = vpop.f32.mrf.mxu3  ;;  %v660_v49 = vunpack.c.l.b16 %v2050_v59  ;;  %v661_v61 = vunpack.c.h.b16 %v2050_v59  ;;  %1112 = vmatpush.bf16.msra.mxu1 %v1487_v50 }
 0x151   : > { %580 = vst [vmem:[%s2040_s23 + $0x10] sm:$0xff] %v572_v3  ;;  %v496_v17 = vadd.f32 %v495_v10, %v2029_v60  ;;  %v515_v18 = vadd.f32 %v514_v11, %v2033_v7  ;;  %v460_v19 = vpop.f32.mrf.mxu0  ;;  %v479_v20 = vpop.f32.mrf.mxu1  ;;  %v662_v21 = vunpack.c.l.b16 %v572_v3  ;;  %v663_v22 = vunpack.c.h.b16 %v572_v3  ;;  %1130 = vmatpush.bf16.msra.mxu2 %v1559_v51  ;;  %1149 = vmatpush.bf16.msra.mxu3 %v1623_v63  ;;  %v1612_v10 = vld [vmem:[#allocation2 + $0x188] sm:$0xf0] }
 0x152   : > { %v461_v25 = vadd.f32 %v460_v19, %v2025_v52  ;;  %v480_v26 = vadd.f32 %v479_v20, %v2027_v53 }
 0x153   : > { %vm528_vm7 = vcmp.ge.f32.partialorder %v496_v17, 0.0  ;;  %v544_v32 = vmul.f32 0.2, %v496_v17  ;;  %vm529_vm8 = vcmp.ge.f32.partialorder %v515_v18, 0.0  ;;  %v545_v33 = vmul.f32 0.2, %v515_v18 }
 0x154   : > { %vm530_vm9 = vcmp.ge.f32.partialorder %v461_v25, 0.0  ;;  %v546_v34 = vmul.f32 0.2, %v461_v25  ;;  %vm531_vm10 = vcmp.ge.f32.partialorder %v480_v26, 0.0  ;;  %v547_v35 = vmul.f32 0.2, %v480_v26 }
 0x155   : > { %v560_v36 = vsel %vm528_vm7, %v496_v17, %v544_v32  ;;  %v561_v37 = vsel %vm529_vm8, %v515_v18, %v545_v33  ;;  %v2061_v38 = vpack.c.b16 %v662_v21, %v658_v12  ;;  %v2063_v39 = vpack.c.b16 %v663_v22, %v659_v13  ;;  %1131 = vmatpush.bf16.msra.mxu2 %v1551_v4 }
 0x156   : > { %v573_v43 = vpack.c.bf16 %v561_v37, %v560_v36  ;;  %v562_v44 = vsel %vm530_vm9, %v461_v25, %v546_v34  ;;  %v563_v45 = vsel %vm531_vm10, %v480_v26, %v547_v35 }
 0x157   : > { %v2065_v48 = vpack.c.bf16 %v563_v45, %v562_v44  ;;  %1018 = vmatmul.bf16.vlgmr.msrb.gmra.mxu0 %v2061_v38  ;;  %1037 = vmatmul.bf16.vlgmr.msrb.gmra.mxu1 %v2063_v39 }
 0x158   : > { %581 = vst [vmem:[%s2040_s23 + $0x18] sm:$0xff] %v573_v43  ;;  %v498_v56 = vpop.f32.mrf.mxu2  ;;  %v517_v57 = vpop.f32.mrf.mxu3  ;;  %v664_v58 = vunpack.c.l.b16 %v573_v43  ;;  %v665_v62 = vunpack.c.h.b16 %v573_v43 }
 0x159   : > { %582 = vst [vmem:[%s2040_s23 + $0x20] sm:$0xff] %v2065_v48  ;;  %v499_v0 = vadd.f32 %v498_v56, %v2029_v60  ;;  %v518_v1 = vadd.f32 %v517_v57, %v2033_v7  ;;  %v462_v2 = vpop.f32.mrf.mxu0  ;;  %v481_v3 = vpop.f32.mrf.mxu1  ;;  %v666_v26 = vunpack.c.l.b16 %v2065_v48  ;;  %v667_v27 = vunpack.c.h.b16 %v2065_v48 }
 0x15a   : > { %v463_v5 = vadd.f32 %v462_v2, %v2025_v52  ;;  %v482_v6 = vadd.f32 %v481_v3, %v2027_v53  ;;  %v676_v8 = vpack.c.b16 %v664_v58, %v660_v49  ;;  %v677_v59 = vpack.c.b16 %v665_v62, %v661_v61 }
 0x15b   : > { %vm532_vm11 = vcmp.ge.f32.partialorder %v499_v0, 0.0  ;;  %v548_v11 = vmul.f32 0.2, %v499_v0  ;;  %vm533_vm12 = vcmp.ge.f32.partialorder %v518_v1, 0.0  ;;  %v549_v12 = vmul.f32 0.2, %v518_v1 }
 0x15c   : > { %vm534_vm13 = vcmp.ge.f32.partialorder %v463_v5, 0.0  ;;  %v550_v13 = vmul.f32 0.2, %v463_v5  ;;  %vm535_vm14 = vcmp.ge.f32.partialorder %v482_v6, 0.0  ;;  %v551_v14 = vmul.f32 0.2, %v482_v6  ;;  %1056 = vmatmul.bf16.vlgmr.msrb.gmra.mxu2 %v676_v8  ;;  %1075 = vmatmul.bf16.vlgmr.msrb.gmra.mxu3 %v677_v59 }
 0x15d   : > { %v564_v52 = vsel %vm532_vm11, %v499_v0, %v548_v11  ;;  %v565_v15 = vsel %vm533_vm12, %v518_v1, %v549_v12  ;;  %v1615_v53 = vor.u32 %v1741_v9, %v1612_v10 }
 0x15e   : > { %v575_v16 = vpack.c.bf16 %v565_v15, %v564_v52  ;;  %v566_v17 = vsel %vm534_vm13, %v463_v5, %v550_v13  ;;  %v567_v18 = vsel %vm535_vm14, %v482_v6, %v551_v14 }
 0x15f   : > { %v576_v19 = vpack.c.bf16 %v567_v18, %v566_v17  ;;  %1150 = vmatpush.bf16.msra.mxu3 %v1615_v53 }
 0x160   : > { %583 = vst [vmem:[%s2040_s23 + $0x28] sm:$0xff] %v575_v16  ;;  %v500_v20 = vpop.f32.mrf.mxu2  ;;  %v519_v21 = vpop.f32.mrf.mxu3  ;;  %v669_v35 = vunpack.c.h.b16 %v575_v16 }
 0x161   : > { %584 = vst [vmem:[%s2040_s23 + $0x30] sm:$0xff] %v576_v19  ;;  %v501_v22 = vadd.f32 %v500_v20, %v2029_v60  ;;  %v520_v23 = vadd.f32 %v519_v21, %v2033_v7  ;;  %v670_v24 = vunpack.c.l.b16 %v576_v19  ;;  %v671_v25 = vunpack.c.h.b16 %v576_v19 }
 0x162   : > { %v668_v60 = vunpack.c.l.b16 %v575_v16 }
 0x163   : > { %vm536_vm15 = vcmp.ge.f32.partialorder %v501_v22, 0.0  ;;  %v552_v28 = vmul.f32 0.2, %v501_v22  ;;  %vm537_vm0 = vcmp.ge.f32.partialorder %v520_v23, 0.0  ;;  %v553_v29 = vmul.f32 0.2, %v520_v23 }
 0x164   : > { %v678_v30 = vpack.c.b16 %v670_v24, %v666_v26  ;;  %v679_v31 = vpack.c.b16 %v671_v25, %v667_v27 }
 0x165   : > { %v568_v32 = vsel %vm536_vm15, %v501_v22, %v552_v28  ;;  %v569_v33 = vsel %vm537_vm0, %v520_v23, %v553_v29 }
 0x166   : > { %v577_v34 = vpack.c.bf16 %v569_v33, %v568_v32 }
 0x167   : > { %1023 = vmatmul.bf16.gmra.mxu0 %v678_v30  ;;  %1042 = vmatmul.bf16.gmra.mxu1 %v679_v31 }
 0x168   : > { %585 = vst [vmem:[%s2040_s23 + $0x38] sm:$0xff] %v577_v34  ;;  %v672_v7 = vunpack.c.l.b16 %v577_v34  ;;  %v673_v36 = vunpack.c.h.b16 %v577_v34 }
 0x16a   : > { %v680_v37 = vpack.c.b16 %v672_v7, %v668_v60  ;;  %v681_v40 = vpack.c.b16 %v673_v36, %v669_v35 }
 0x16c   : > { %1061 = vmatmul.bf16.gmra.mxu2 %v680_v37  ;;  %1080 = vmatmul.bf16.gmra.mxu3 %v681_v40 }
 0x177   : > { %1094 = vmatmul.bf16.vlgmr.msra.gmra.mxu0 %v2061_v38  ;;  %1113 = vmatmul.bf16.vlgmr.msra.gmra.mxu1 %v2063_v39 }
 0x17c   : > { %1132 = vmatmul.bf16.vlgmr.msra.gmra.mxu2 %v676_v8  ;;  %1151 = vmatmul.bf16.vlgmr.msra.gmra.mxu3 %v677_v59 }
 0x187   : > { %1099 = vmatmul.bf16.gmra.mxu0 %v678_v30  ;;  %1118 = vmatmul.bf16.gmra.mxu1 %v679_v31 }
 0x18c   : > { %1137 = vmatmul.bf16.gmra.mxu2 %v680_v37  ;;  %1156 = vmatmul.bf16.gmra.mxu3 %v681_v40 }
 0x1d4   : > { %v1019_v41 = vpop.f32.mrf.mxu0  ;;  %v1038_v42 = vpop.f32.mrf.mxu1 }
 0x1d5   : > { %v1039_v61 = vadd.f32 %v1038_v42, %v1019_v41 }
 0x1dc   : > { %v1021_v43 = vpop.f32.mrf.mxu0  ;;  %v1040_v44 = vpop.f32.mrf.mxu1 }
 0x1dd   : > { %v1041_v8 = vadd.f32 %v1040_v44, %v1021_v43 }
 0x1df   : > { %v1057_v45 = vpop.f32.mrf.mxu2  ;;  %v1076_v46 = vpop.f32.mrf.mxu3 }
 0x1e0   : > { %v1058_v62 = vadd.f32 %v1057_v45, %v1039_v61 }
 0x1e2   : > { %v1077_v5 = vadd.f32 %v1076_v46, %v1058_v62 }
 0x1e4   : > { %v1024_v47 = vpop.f32.mrf.mxu0  ;;  %v1043_v48 = vpop.f32.mrf.mxu1 }
 0x1e5   : > { %v1044_v16 = vadd.f32 %v1043_v48, %v1024_v47 }
 0x1e7   : > { %v1059_v49 = vpop.f32.mrf.mxu2  ;;  %v1078_v50 = vpop.f32.mrf.mxu3 }
 0x1e8   : > { %v1060_v9 = vadd.f32 %v1059_v49, %v1041_v8 }
 0x1ea   : > { %v1079_v15 = vadd.f32 %v1078_v50, %v1060_v9 }
 0x1ec   : > { %v1026_v51 = vpop.f32.mrf.mxu0  ;;  %v1045_v38 = vpop.f32.mrf.mxu1 }
 0x1ed   : > { %v1046_v27 = vadd.f32 %v1045_v38, %v1026_v51 }
 0x1ef   : > { %v1062_v39 = vpop.f32.mrf.mxu2  ;;  %v1081_v54 = vpop.f32.mrf.mxu3 }
 0x1f0   : > { %v1063_v18 = vadd.f32 %v1062_v39, %v1044_v16 }
 0x1f2   : > { %v1082_v23 = vadd.f32 %v1081_v54, %v1063_v18 }
 0x1f4   : > { %v1095_v55 = vpop.f32.mrf.mxu0  ;;  %v1114_v56 = vpop.f32.mrf.mxu1 }
 0x1f5   : > { %v1115_v63 = vadd.f32 %v1114_v56, %v1095_v55 }
 0x1f7   : > { %v1064_v57 = vpop.f32.mrf.mxu2  ;;  %v1083_v58 = vpop.f32.mrf.mxu3 }
 0x1f8   : > { %v1065_v29 = vadd.f32 %v1064_v57, %v1046_v27 }
 0x1fa   : > { %v1084_v34 = vadd.f32 %v1083_v58, %v1065_v29 }
 0x1fc   : > { %v1097_v0 = vpop.f32.mrf.mxu0  ;;  %v1116_v1 = vpop.f32.mrf.mxu1 }
 0x1fd   : > { %v1117_v10 = vadd.f32 %v1116_v1, %v1097_v0 }
 0x1ff   : > { %v1133_v2 = vpop.f32.mrf.mxu2  ;;  %v1152_v3 = vpop.f32.mrf.mxu3 }
 0x200   : > { %v1134_v4 = vadd.f32 %v1133_v2, %v1115_v63 }
 0x202   : > { %v1153_v6 = vadd.f32 %v1152_v3, %v1134_v4 }
 0x204   : > { %v1162_v59 = vpack.c.bf16 %v1153_v6, %v1077_v5  ;;  %v1100_v14 = vpop.f32.mrf.mxu0  ;;  %v1119_v52 = vpop.f32.mrf.mxu1 }
 0x205   : > { %v1120_v19 = vadd.f32 %v1119_v52, %v1100_v14 }
 0x206   : > { %1166 = vst [vmem:[%s2091_s26] sm:$0xff] %v1162_v59 }
 0x207   : > { %v1135_v11 = vpop.f32.mrf.mxu2  ;;  %v1154_v12 = vpop.f32.mrf.mxu3 }
 0x208   : > { %v1136_v13 = vadd.f32 %v1135_v11, %v1117_v10 }
 0x20a   : > { %v1155_v53 = vadd.f32 %v1154_v12, %v1136_v13 }
 0x20c   : > { %v1163_v17 = vpack.c.bf16 %v1155_v53, %v1079_v15  ;;  %v1102_v25 = vpop.f32.mrf.mxu0  ;;  %v1121_v26 = vpop.f32.mrf.mxu1 }
 0x20d   : > { %v1122_v30 = vadd.f32 %v1121_v26, %v1102_v25 }
 0x20e   : > { %1167 = vst [vmem:[%s2091_s26 + $0x8] sm:$0xff] %v1163_v17 }
 0x20f   : > { %v1138_v20 = vpop.f32.mrf.mxu2  ;;  %v1157_v21 = vpop.f32.mrf.mxu3 }
 0x210   : > { %v1139_v22 = vadd.f32 %v1138_v20, %v1120_v19 }
 0x212   : > { %v1158_v24 = vadd.f32 %v1157_v21, %v1139_v22 }
 0x214   : > { %v1164_v28 = vpack.c.bf16 %v1158_v24, %v1082_v23 }
 0x216   : > { %1168 = vst [vmem:[%s2091_s26 + $0x10] sm:$0xff] %v1164_v28 }
 0x217   : > { %v1140_v31 = vpop.f32.mrf.mxu2  ;;  %v1159_v33 = vpop.f32.mrf.mxu3 }
 0x218   : > { %v1141_v32 = vadd.f32 %v1140_v31, %v1122_v30 }
 0x21a   : > { %v1160_v60 = vadd.f32 %v1159_v33, %v1141_v32 }
 0x21c   : > { %v1165_v7 = vpack.c.bf16 %v1160_v60, %v1084_v34 }
 0x21e   : > { %1169 = vst [vmem:[%s2091_s26 + $0x18] sm:$0xff] %v1165_v7 }
 0x21f PF: > { %s17_s20 = sadd.s32 1, %s1851_s20   ;;  %s2112_s18 = smov %s1847_s19 }
 0x220   : > { %p14_p8 = scmp.ge.s32.totalorder %s17_s20, 4   ;;  %s2113_s19 = smov %s2115_s22 }
 0x222   :  { %16 = sbr.rel (!%p14_p8) target bundleno = 2 (0x2), region = 83 }
 0x227   :  { %1229 = vsyncpa [#allocation3], 1 }
 0x228   :  { %1231 = vsyncpa [#allocation3 + $0x1], 1 }

// kernel: _lambda_.4
= control target key start
LH: loop header
LB: loop body
LE: loop exit
PB: predicated region body
PF: predicated region fallthrough
CT: control target
= control target key end

     0   :  { %14 = vsyncpa [#allocation3], 0  ;;  %s3522_s27 = smov 0   ;;  %s3524_s28 = smov 0   ;;  %s4455_s0 = inlined_call_operand.vmem [shape: bf16[2,32,512], index: 0, kind: input, shape index: {}, may-alias: {0,1}]   ;;  %s4456_s1 = inlined_call_operand.vmem [shape: bf16[2,32,512], index: 1, kind: input, shape index: {}, may-alias: {0,1}]   ;;  %s4457_s2 = inlined_call_operand.vmem [shape: f32[2,1,32], index: 2, kind: input, shape index: {}]   ;;  %s4458_s3 = inlined_call_operand.vmem [shape: bf16[2,32,256], index: 3, kind: input, shape index: {}]   ;;  %s4459_s4 = inlined_call_operand.hbm [shape: bf16[512,256], index: 4, kind: input, shape index: {}]   ;;  %s4460_s5 = inlined_call_operand.vmem [shape: f32[1,256], index: 5, kind: input, shape index: {}]   ;;  %s4461_s6 = inlined_call_operand.vmem [shape: bf16[256,128], index: 6, kind: input, shape index: {}]   ;;  %s4462_s7 = inlined_call_operand.vmem [shape: bf16[2,32,256], index: 7, kind: output, shape index: {0}]   ;;  %s4463_s8 = inlined_call_operand.vmem [shape: bf16[2,32,128], index: 8, kind: output, shape index: {1}]  }
   0x1   :  { %s3526_s29 = smov 0  }
   0x2 LB: > { %s2805_s30 = sadd.s32 4294967295, %s3471_s29   ;;  %s32_s9 = sadd.s32 1, %s3467_s28  ;;  %s3471_s29 = sphi %s3526_s29, %s20_s29   ;;  %s3467_s28 = sphi %s3524_s28, %s4465_s28   ;;  %s3463_s27 = sphi %s3522_s27, %s4464_s27  }
   0x3   : > { %p34_p0 = scmp.ge.s32.totalorder %s32_s9, 2  ;;  %p2807_p1 = scmp.ge.s32.totalorder %s3471_s29, 1 }
   0x4   : > { %p262_p2 = scmp.lt.s32.totalorder %s3471_s29, 3  ;;  %p3384_p4 = scmp.eq.s32.totalorder %s2805_s30, 0 }
   0x5   : > { %s4467_s9 = smov (%p34_p0, %s32_s9), 0  ;;  %s273_s12 = sshll.u32 %s4459_s4, 4  ;;  %s274_s12 = int_to_ptr.hbm [resolvable:$true] %s273_s12 }
   0x6   : > { %p263_p3 = pnand %p2807_p1, %p262_p2  ;;  %s3473_s13 = smov [#allocation2]  }
   0x7   : > { %s275_s14 = sshll.u32 %s3473_s13, 4  ;;  %s3474_s15 = smov 128   ;;  %s276_s14 = int_to_ptr.vmem [resolvable:$true] %s275_s14 }
   0x8   : > { %p3380_p5 = pneg %p263_p3  ;;  %s3475_s16 = smov 8  }
   0x9   : > { %333 = sbr.rel (%p263_p3) target bundleno = 2464 (0x9a0), region = 48 }
   0xa   : > { %p3381_p6 = pnand %p3384_p4, %p3380_p5 }
   0xc   : > { %3383 = dma.hbm_to_vmem [thread:$0]  (!%p3381_p6), %s274_s12, 8192, %s276_s14, [#allocation3], %s3474_s15, %s3474_s15, %s3475_s16  }
   0xe   : > { %3458 = dma.done.wait (%p3384_p4), [#allocation3], 8192  }
   0xf   : > { %3460 = vsyncadd (%p3384_p4), [#allocation3], 4294959104  ;;  %p401_p7 = scmp.lt.s32.totalorder %s3463_s27, 1  ;;  %v715_v56 = vlaneseq  ;;  %vm1203_vm1 = vcmask 261120  }
  0x11   : > { %s4469_s27 = smov (!%p401_p7, %s3463_s27), 1  ;;  %v716_v60 = vand.u32 127, %v715_v56 }
  0x12   : > { %s3256_s17 = sshll.u32 %s4469_s27, 6  ;;  %s418_s26 = scalar_lea.vmem %s4457_s2, %s4469_s27 }
  0x13   : > { %s415_s20 = scalar_lea.vmem %s4456_s1, %s3256_s17  ;;  %s3553_s23 = scalar_lea.vmem %s4455_s0, %s3256_s17  ;;  %v3414_v58 = vld [vmem:[%s418_s26] ss:$0 sm:$0xff] }
  0x14   : > { %v2872_v0 = vld [vmem:[%s415_s20 + $0x20] sm:$0xf]  ;;  %v3275_v1 = vld [vmem:[%s415_s20 + $0x2c] sm:$0xf0]  ;;  %v3273_v2 = vld [vmem:[%s415_s20 + $0x24] sm:$0xf] }
  0x15   : > { %v2873_v3 = vor.u32 %v3275_v1, %v2872_v0  ;;  %v2874_v4 = vld [vmem:[%s415_s20 + $0x30] sm:$0xf0]  ;;  %v2880_v5 = vld [vmem:[%s415_s20 + $0x28] sm:$0xf]  ;;  %v3276_v6 = vld [vmem:[%s415_s20 + $0x34] sm:$0xf0] }
  0x16   : > { %v2877_v7 = vor.u32 %v3273_v2, %v2874_v4  ;;  %v2881_v8 = vor.u32 %v3276_v6, %v2880_v5  ;;  %v3274_v9 = vld [vmem:[%s415_s20 + $0x2c] sm:$0xf]  ;;  %v2882_v10 = vld [vmem:[%s415_s20 + $0x38] sm:$0xf0]  ;;  %v2856_v12 = vld [vmem:[%s415_s20] sm:$0xf] }
  0x17   : > { %618 = vmatpush.bf16.xpose.msra.mxu0 %v2873_v3  ;;  %v2885_v11 = vor.u32 %v3274_v9, %v2882_v10  ;;  %v3271_v13 = vld [vmem:[%s415_s20 + $0xc] sm:$0xf0]  ;;  %v3269_v14 = vld [vmem:[%s415_s20 + $0x4] sm:$0xf]  ;;  %v2858_v15 = vld [vmem:[%s415_s20 + $0x10] sm:$0xf0] }
  0x18   : > { %637 = vmatpush.bf16.xpose.msra.mxu1 %v2877_v7  ;;  %656 = vmatpush.bf16.xpose.msra.mxu2 %v2881_v8  ;;  %v2864_v16 = vld [vmem:[%s415_s20 + $0x8] sm:$0xf]  ;;  %v3272_v17 = vld [vmem:[%s415_s20 + $0x14] sm:$0xf0]  ;;  %v3270_v18 = vld [vmem:[%s415_s20 + $0xc] sm:$0xf]  ;;  %v2857_v20 = vor.u32 %v3271_v13, %v2856_v12  ;;  %v2861_v21 = vor.u32 %v3269_v14, %v2858_v15 }
  0x19   : > { %675 = vmatpush.bf16.xpose.msra.mxu3 %v2885_v11  ;;  %v2866_v19 = vld [vmem:[%s415_s20 + $0x18] sm:$0xf0]  ;;  %v2865_v22 = vor.u32 %v3272_v17, %v2864_v16  ;;  %v2824_v24 = vld [vmem:[%s3553_s23] sm:$0xf]  ;;  %v3263_v25 = vld [vmem:[%s3553_s23 + $0xc] sm:$0xf0] }
  0x1a   : > { %v2869_v23 = vor.u32 %v3270_v18, %v2866_v19  ;;  %v3261_v26 = vld [vmem:[%s3553_s23 + $0x4] sm:$0xf]  ;;  %v2826_v27 = vld [vmem:[%s3553_s23 + $0x10] sm:$0xf0]  ;;  %v2832_v28 = vld [vmem:[%s3553_s23 + $0x8] sm:$0xf]  ;;  %v3563_v32 = vor.u32 %v3263_v25, %v2824_v24 }
  0x1b   : > { %v3264_v29 = vld [vmem:[%s3553_s23 + $0x14] sm:$0xf0]  ;;  %v3262_v30 = vld [vmem:[%s3553_s23 + $0xc] sm:$0xf]  ;;  %v2834_v31 = vld [vmem:[%s3553_s23 + $0x18] sm:$0xf0]  ;;  %v3565_v33 = vor.u32 %v3261_v26, %v2826_v27 }
  0x1c   : > { %v3567_v34 = vor.u32 %v3264_v29, %v2832_v28  ;;  %v3569_v35 = vor.u32 %v3262_v30, %v2834_v31  ;;  %v2840_v36 = vld [vmem:[%s3553_s23 + $0x20] sm:$0xf]  ;;  %v3267_v37 = vld [vmem:[%s3553_s23 + $0x2c] sm:$0xf0]  ;;  %v3265_v38 = vld [vmem:[%s3553_s23 + $0x24] sm:$0xf] }
  0x1d   : > { %v2842_v39 = vld [vmem:[%s3553_s23 + $0x30] sm:$0xf0]  ;;  %v2848_v40 = vld [vmem:[%s3553_s23 + $0x28] sm:$0xf]  ;;  %v3268_v41 = vld [vmem:[%s3553_s23 + $0x34] sm:$0xf0]  ;;  %v3587_v44 = vor.u32 %v3267_v37, %v2840_v36 }
  0x1e   : > { %v3266_v42 = vld [vmem:[%s3553_s23 + $0x2c] sm:$0xf]  ;;  %v2850_v43 = vld [vmem:[%s3553_s23 + $0x38] sm:$0xf0]  ;;  %v3589_v45 = vor.u32 %v3265_v38, %v2842_v39  ;;  %v3591_v46 = vor.u32 %v3268_v41, %v2848_v40  ;;  %v721_v5 = vsub.s32 31, %v716_v60  ;;  %s3258_s30 = sshll.u32 %s4469_s27, 5 }
  0x1f   : > { %619 = vmatpush.bf16.xpose.msra.mxu0 %v2857_v20  ;;  %v3593_v47 = vor.u32 %v3266_v42, %v2850_v43  ;;  %s423_s12 = scalar_lea.vmem %s4458_s3, %s3258_s30  ;;  %s4411_s15 = scalar_lea.vmem %s4462_s7, %s3258_s30 }
  0x20   : > { %638 = vmatpush.bf16.xpose.msra.mxu1 %v2861_v21  ;;  %657 = vmatpush.bf16.xpose.msra.mxu2 %v2865_v22  ;;  %s3260_s30 = sshll.u32 %s4469_s27, 4 }
  0x21   : > { %676 = vmatpush.bf16.xpose.msra.mxu3 %v2869_v23  ;;  %s443_s18 = scalar_lea.vmem %s4463_s8, %s3260_s30 }
  0x26   : > { %620 = vmatmul.bf16.vlgmr.msra.gmra.mxu0 %v3563_v32 }
  0x27   : > { %639 = vmatmul.bf16.vlgmr.msra.gmra.mxu1 %v3565_v33  ;;  %658 = vmatmul.bf16.vlgmr.msra.gmra.mxu2 %v3567_v34 }
  0x28   : > { %677 = vmatmul.bf16.vlgmr.msra.gmra.mxu3 %v3569_v35 }
  0x36   : > { %625 = vmatmul.bf16.gmra.mxu0 %v3587_v44 }
  0x37   : > { %644 = vmatmul.bf16.gmra.mxu1 %v3589_v45  ;;  %663 = vmatmul.bf16.gmra.mxu2 %v3591_v46 }
  0x38   : > { %682 = vmatmul.bf16.gmra.mxu3 %v3593_v47 }
  0xa3   : > { %v621_v48 = vpop.f32.mrf.mxu0 }
  0xa4   : > { %v640_v49 = vpop.f32.mrf.mxu1 }
  0xa5   : > { %v641_v50 = vadd.f32 %v640_v49, %v621_v48 }
  0xaa   : > { %v659_v51 = vpop.f32.mrf.mxu2 }
  0xab   : > { %v660_v52 = vadd.f32 %v659_v51, %v641_v50  ;;  %v678_v53 = vpop.f32.mrf.mxu3  ;;  %v623_v54 = vpop.f32.mrf.mxu0 }
  0xac   : > { %v642_v55 = vpop.f32.mrf.mxu1 }
  0xad   : > { %v679_v57 = vadd.f32 %v678_v53, %v660_v52  ;;  %v643_v62 = vadd.f32 %v642_v55, %v623_v54 }
  0xaf   : > { %v688_v59 = vmul.f32 2.0, %v679_v57 }
  0xb1   : > { %v695_v61 = vsub.f32 %v688_v59, %v3414_v58 }
  0xb2   : > { %v661_v63 = vpop.f32.mrf.mxu2 }
  0xb3   : > { %vm703_vm0 = vcmp.lt.s32.totalorder %v695_v61, 0  ;;  %v707_v0 = vxor.u32 2147483647, %v695_v61  ;;  %v662_v1 = vadd.f32 %v661_v63, %v643_v62  ;;  %v680_v2 = vpop.f32.mrf.mxu3  ;;  %v626_v3 = vpop.f32.mrf.mxu0  ;;  %v3296_v62 = vld [vmem:[#allocation2 + $0x74] sm:$0xf0] }
  0xb4   : > { %v645_v4 = vpop.f32.mrf.mxu1  ;;  %v3008_v63 = vld [vmem:[#allocation2 + $0xf0] sm:$0xf] }
  0xb5   : > { %v711_v6 = vsel %vm703_vm0, %v707_v0, %v695_v61  ;;  %v681_v7 = vadd.f32 %v680_v2, %v662_v1  ;;  %v646_v10 = vadd.f32 %v645_v4, %v626_v3  ;;  %v2944_v61 = vld [vmem:[#allocation2 + $0x70] sm:$0xf]  ;;  %v3312_v1 = vld [vmem:[#allocation2 + $0xf4] sm:$0xf0]  ;;  %v2936_v2 = vld [vmem:[#allocation2 + $0x60] sm:$0xf] }
  0xb6   : > { %v717_v8 = vand.u32 4294967264, %v711_v6  ;;  %v2945_v0 = vor.u32 %v3296_v62, %v2944_v61  ;;  %v3294_v3 = vld [vmem:[#allocation2 + $0x64] sm:$0xf0]  ;;  %v3009_v4 = vor.u32 %v3312_v1, %v3008_v63  ;;  %v3324_v61 = vld [vmem:[#allocation2 + $0x154] sm:$0xf0] }
  0xb7   : > { %v689_v9 = vmul.f32 2.0, %v681_v7  ;;  %v3310_v6 = vld [vmem:[#allocation2 + $0xe4] sm:$0xf0]  ;;  %v2937_v7 = vor.u32 %v3294_v3, %v2936_v2  ;;  %v3120_v62 = vld [vmem:[#allocation2 + $0x1d0] sm:$0xf] }
  0xb8   : > { %v3599_v11 = vor.u32 %v721_v5, %v717_v8  ;;  %1051 = vmatpush.bf16.msrb.mxu0 %v2945_v0  ;;  %1070 = vmatpush.bf16.msrb.mxu1 %v3009_v4  ;;  %v3340_v63 = vld [vmem:[#allocation2 + $0x1d4] sm:$0xf0]  ;;  %v2904_v4 = vld [vmem:[#allocation2 + $0x20] sm:$0xf] }
  0xb9   : > { %v696_v12 = vsub.f32 %v689_v9, %v3414_v58  ;;  %v2928_v9 = vld [vmem:[#allocation2 + $0x50] sm:$0xf] }
  0xba   : > { %v664_v13 = vpop.f32.mrf.mxu2  ;;  %v3603_v14 = vsel %vm1203_vm1, %v3599_v11, 2147483648 }
  0xbb   : > { %vm704_vm2 = vcmp.lt.s32.totalorder %v696_v12, 0  ;;  %v708_v15 = vxor.u32 2147483647, %v696_v12  ;;  %v665_v16 = vadd.f32 %v664_v13, %v646_v10  ;;  %v683_v17 = vpop.f32.mrf.mxu3  ;;  %v1206_v18 = vshra.s32 %v3603_v14, 16  ;;  %v628_v23 = vpop.f32.mrf.mxu0  ;;  %v3292_v10 = vld [vmem:[#allocation2 + $0x54] sm:$0xf0] }
  0xbc   : > { %v647_v24 = vpop.f32.mrf.mxu1  ;;  %v1205_v60 = vand.u32 65535, %v3603_v14  ;;  %v2992_v14 = vld [vmem:[#allocation2 + $0xd0] sm:$0xf]  ;;  %1052 = vmatpush.bf16.msrb.mxu0 %v2937_v7 }
  0xbd   : > { %v712_v19 = vsel %vm704_vm2, %v708_v15, %v696_v12  ;;  %v684_v20 = vadd.f32 %v683_v17, %v665_v16  ;;  %v1208_v21 = vcvt.s32.f32 %v1206_v18  ;;  %v648_v28 = vadd.f32 %v647_v24, %v628_v23  ;;  %v3308_v15 = vld [vmem:[#allocation2 + $0xd4] sm:$0xf0]  ;;  %v3072_v16 = vld [vmem:[#allocation2 + $0x170] sm:$0xf]  ;;  %v2920_v23 = vld [vmem:[#allocation2 + $0x40] sm:$0xf] }
  0xbe   : > { %v718_v22 = vand.u32 4294967264, %v712_v19  ;;  %v1207_v13 = vcvt.s32.f32 %v1205_v60  ;;  %v2929_v18 = vor.u32 %v3292_v10, %v2928_v9  ;;  %v3328_v19 = vld [vmem:[#allocation2 + $0x174] sm:$0xf0]  ;;  %v3290_v24 = vld [vmem:[#allocation2 + $0x44] sm:$0xf0] }
  0xbf   : > { %v690_v25 = vmul.f32 2.0, %v684_v20  ;;  %1209 = vmax.xlane.f32.xlu0 %v1208_v21  ;;  %v3136_v20 = vld [vmem:[#allocation2 + $0x1f0] sm:$0xf]  ;;  %v3322_v9 = vld [vmem:[#allocation2 + $0x144] sm:$0xf0] }
  0xc0   : > { %v3606_v26 = vor.u32 %v721_v5, %v718_v22  ;;  %v2993_v22 = vor.u32 %v3308_v15, %v2992_v14  ;;  %1053 = vmatpush.bf16.msrb.mxu0 %v2929_v18  ;;  %v3112_v10 = vld [vmem:[#allocation2 + $0x1c0] sm:$0xf]  ;;  %v3302_v14 = vld [vmem:[#allocation2 + $0xa4] sm:$0xf0]  ;;  %v3040_v18 = vld [vmem:[#allocation2 + $0x130] sm:$0xf] }
  0xc1   : > { %v697_v27 = vsub.f32 %v690_v25, %v3414_v58  ;;  %v3073_v25 = vor.u32 %v3328_v19, %v3072_v16  ;;  %v3320_v19 = vld [vmem:[#allocation2 + $0x134] sm:$0xf0] }
  0xc2   : > { %v666_v29 = vpop.f32.mrf.mxu2  ;;  %v3610_v30 = vsel %vm1203_vm1, %v3606_v26, 2147483648 }
  0xc3   : > { %vm705_vm3 = vcmp.lt.s32.totalorder %v697_v27, 0  ;;  %v709_v31 = vxor.u32 2147483647, %v697_v27  ;;  %v667_v36 = vadd.f32 %v666_v29, %v648_v28  ;;  %v1221_v37 = vshra.s32 %v3610_v30, 16  ;;  %v685_v38 = vpop.f32.mrf.mxu3  ;;  %v2984_v29 = vld [vmem:[#allocation2 + $0xc0] sm:$0xf]  ;;  %1089 = vmatpush.bf16.msrb.mxu2 %v3073_v25 }
  0xc4   : > { %v1220_v28 = vand.u32 65535, %v3610_v30  ;;  %v3056_v30 = vld [vmem:[#allocation2 + $0x150] sm:$0xf] }
  0xc5   : > { %v713_v39 = vsel %vm705_vm3, %v709_v31, %v697_v27  ;;  %v686_v40 = vadd.f32 %v685_v38, %v667_v36  ;;  %v3613_v41 = vcvt.s32.f32 %v1221_v37  ;;  %v3344_v27 = vld [vmem:[#allocation2 + $0x1f4] sm:$0xf0]  ;;  %v3306_v31 = vld [vmem:[#allocation2 + $0xc4] sm:$0xf0]  ;;  %v3128_v38 = vld [vmem:[#allocation2 + $0x1e0] sm:$0xf]  ;;  %v3057_v0 = vor.u32 %v3324_v61, %v3056_v30 }
  0xc6   : > { %v719_v42 = vand.u32 4294967264, %v713_v39  ;;  %v3137_v36 = vor.u32 %v3344_v27, %v3136_v20  ;;  %v3326_v37 = vld [vmem:[#allocation2 + $0x164] sm:$0xf0]  ;;  %v2921_v39 = vor.u32 %v3290_v24, %v2920_v23  ;;  %v1222_v60 = vcvt.s32.f32 %v1220_v28  ;;  %v3104_v23 = vld [vmem:[#allocation2 + $0x1b0] sm:$0xf] }
  0xc7   : > { %v691_v43 = vmul.f32 2.0, %v686_v40  ;;  %1224 = vmax.xlane.f32.xlu0 %v3613_v41  ;;  %v2912_v40 = vld [vmem:[#allocation2 + $0x30] sm:$0xf]  ;;  %v3336_v24 = vld [vmem:[#allocation2 + $0x1b4] sm:$0xf0] }
  0xc8   : > { %v3616_v48 = vor.u32 %v721_v5, %v719_v42  ;;  %v3288_v42 = vld [vmem:[#allocation2 + $0x34] sm:$0xf0]  ;;  %1108 = vmatpush.bf16.msrb.mxu3 %v3137_v36  ;;  %1054 = vmatpush.bf16.msrb.mxu0 %v2921_v39  ;;  %v2960_v28 = vld [vmem:[#allocation2 + $0x90] sm:$0xf]  ;;  %v3041_v36 = vor.u32 %v3320_v19, %v3040_v18  ;;  %v3105_v39 = vor.u32 %v3336_v24, %v3104_v23  ;;  %v2946_v30 = vld [vmem:[#allocation2 + $0x78] sm:$0xf0] }
  0xc9   : > { %v698_v49 = vsub.f32 %v691_v43, %v3414_v58  ;;  %v2913_v3 = vor.u32 %v3288_v42, %v2912_v40  ;;  %v3032_v40 = vld [vmem:[#allocation2 + $0x120] sm:$0xf]  ;;  %v3318_v42 = vld [vmem:[#allocation2 + $0x124] sm:$0xf0]  ;;  %v3010_v61 = vld [vmem:[#allocation2 + $0xf8] sm:$0xf0] }
  0xca   : > { %v3620_v50 = vsel %vm1203_vm1, %v3616_v48, 2147483648  ;;  %v3080_v18 = vld [vmem:[#allocation2 + $0x180] sm:$0xf]  ;;  %v3330_v19 = vld [vmem:[#allocation2 + $0x184] sm:$0xf0] }
  0xcb   : > { %vm706_vm4 = vcmp.lt.s32.totalorder %v698_v49, 0  ;;  %v710_v51 = vxor.u32 2147483647, %v698_v49  ;;  %v1236_v52 = vshra.s32 %v3620_v50, 16  ;;  %v1235_v2 = vand.u32 65535, %v3620_v50 }
  0xcc   : > { %1055 = vmatpush.bf16.msrb.mxu0 %v2913_v3  ;;  %v2896_v50 = vld [vmem:[#allocation2 + $0x10] sm:$0xf]  ;;  %v3291_v24 = vld [vmem:[#allocation2 + $0x54] sm:$0xf] }
  0xcd   : > { %v714_v53 = vsel %vm706_vm4, %v710_v51, %v698_v49  ;;  %v3623_v54 = vcvt.s32.f32 %v1236_v52  ;;  %v3342_v49 = vld [vmem:[#allocation2 + $0x1e4] sm:$0xf0]  ;;  %v2985_v51 = vor.u32 %v3306_v31, %v2984_v29  ;;  %v2976_v52 = vld [vmem:[#allocation2 + $0xb0] sm:$0xf]  ;;  %v1237_v27 = vcvt.s32.f32 %v1235_v2  ;;  %v3300_v29 = vld [vmem:[#allocation2 + $0x94] sm:$0xf0] }
  0xce   : > { %v720_v55 = vand.u32 4294967264, %v714_v53  ;;  %v3304_v53 = vld [vmem:[#allocation2 + $0xb4] sm:$0xf0]  ;;  %v2888_v31 = vld [vmem:[#allocation2] sm:$0xf] }
  0xcf   : > { %1239 = vmax.xlane.f32.xlu1 %v3623_v54  ;;  %v2977_v7 = vor.u32 %v3304_v53, %v2976_v52  ;;  %v3334_v52 = vld [vmem:[#allocation2 + $0x1a4] sm:$0xf0]  ;;  %v2952_v53 = vld [vmem:[#allocation2 + $0x80] sm:$0xf]  ;;  %v3088_v3 = vld [vmem:[#allocation2 + $0x190] sm:$0xf] }
  0xd0   : > { %v3626_v56 = vor.u32 %v721_v5, %v720_v55  ;;  %v3000_v5 = vld [vmem:[#allocation2 + $0xe0] sm:$0xf]  ;;  %v3129_v55 = vor.u32 %v3342_v49, %v3128_v38  ;;  %v3282_v49 = vld [vmem:[#allocation2 + $0x4] sm:$0xf0] }
  0xd1   : > { %v3001_v8 = vor.u32 %v3310_v6, %v3000_v5  ;;  %v3121_v5 = vor.u32 %v3340_v63, %v3120_v62  ;;  %v3048_v6 = vld [vmem:[#allocation2 + $0x140] sm:$0xf]  ;;  %v2889_v62 = vor.u32 %v3282_v49, %v2888_v31  ;;  %v3307_v31 = vld [vmem:[#allocation2 + $0xd4] sm:$0xf] }
  0xd2   : > { %v3630_v57 = vsel %vm1203_vm1, %v3626_v56, 2147483648  ;;  %1109 = vmatpush.bf16.msrb.mxu3 %v3129_v55  ;;  %v3049_v15 = vor.u32 %v3322_v9, %v3048_v6  ;;  %v3295_v55 = vld [vmem:[#allocation2 + $0x74] sm:$0xf]  ;;  %v3293_v9 = vld [vmem:[#allocation2 + $0x64] sm:$0xf] }
  0xd3   : > { %v1251_v58 = vshra.s32 %v3630_v57, 16  ;;  %1071 = vmatpush.bf16.msrb.mxu1 %v3001_v8  ;;  %v3286_v8 = vld [vmem:[#allocation2 + $0x24] sm:$0xf0] }
  0xd4   : > { %v2905_v16 = vor.u32 %v3286_v8, %v2904_v4  ;;  %v3332_v4 = vld [vmem:[#allocation2 + $0x194] sm:$0xf0] }
  0xd5   : > { %v3633_v59 = vcvt.s32.f32 %v1251_v58 }
  0xd6   : > { %1110 = vmatpush.bf16.msrb.mxu3 %v3121_v5  ;;  %1056 = vmatpush.bf16.msrb.mxu0 %v2905_v16 }
  0xd7   : > { %1254 = vmax.xlane.f32.xlu1 %v3633_v59  ;;  %1072 = vmatpush.bf16.msrb.mxu1 %v2993_v22  ;;  %v3284_v22 = vld [vmem:[#allocation2 + $0x14] sm:$0xf0] }
  0xd8   : > { %v2897_v38 = vor.u32 %v3284_v22, %v2896_v50  ;;  %v3089_v50 = vor.u32 %v3332_v4, %v3088_v3  ;;  %v3074_v22 = vld [vmem:[#allocation2 + $0x178] sm:$0xf0] }
  0xd9   : > { %v3122_v3 = vld [vmem:[#allocation2 + $0x1d8] sm:$0xf0] }
  0xda   : > { %1057 = vmatpush.bf16.msrb.mxu0 %v2897_v38  ;;  %v2914_v4 = vld [vmem:[#allocation2 + $0x38] sm:$0xf0] }
  0xdb   : > { %1073 = vmatpush.bf16.msrb.mxu1 %v2985_v51  ;;  %v3096_v51 = vld [vmem:[#allocation2 + $0x1a0] sm:$0xf] }
  0xdc   : > { %v3097_v63 = vor.u32 %v3334_v52, %v3096_v51  ;;  %v3289_v51 = vld [vmem:[#allocation2 + $0x44] sm:$0xf] }
  0xdd   : > { %v3341_v52 = vld [vmem:[#allocation2 + $0x1e4] sm:$0xf] }
  0xde   : > { %1058 = vmatpush.bf16.msrb.mxu0 %v2889_v62  ;;  %v3058_v62 = vld [vmem:[#allocation2 + $0x158] sm:$0xf0] }
  0xdf   : > { %1074 = vmatpush.bf16.msrb.mxu1 %v2977_v7  ;;  %v2949_v7 = vor.u32 %v3295_v55, %v2946_v30  ;;  %v3305_v55 = vld [vmem:[#allocation2 + $0xc4] sm:$0xf]  ;;  %v2986_v30 = vld [vmem:[#allocation2 + $0xc8] sm:$0xf0] }
  0xe1   : > { %1059 = vmatmul.bf16.vlgmr.msrb.gmra.mxu0 %v3563_v32 }
  0xe2   : > { %1127 = vmatpush.bf16.msra.mxu0 %v2949_v7  ;;  %v2978_v7 = vld [vmem:[#allocation2 + $0xb8] sm:$0xf0] }
  0xf1   : > { %1064 = vmatmul.bf16.gmra.mxu0 %v3587_v44 }
 0x132   : > { %v3637_v12 = vpop.xlane.xlu0 %1209 }
 0x133   : > { %vm1211_vm5 = vcmp.eq.f32.partialorder %v1208_v21, %v3637_v12  ;;  %v3064_v21 = vld [vmem:[#allocation2 + $0x160] sm:$0xf] }
 0x134   : > { %v1212_v17 = vsel %vm1211_vm5, %v1207_v13, -inf  ;;  %v3065_v43 = vor.u32 %v3326_v37, %v3064_v21  ;;  %v2968_v13 = vld [vmem:[#allocation2 + $0xa0] sm:$0xf]  ;;  %v1250_v37 = vand.u32 65535, %v3630_v57  ;;  %v3033_v57 = vor.u32 %v3318_v42, %v3032_v40  ;;  %v3325_v40 = vld [vmem:[#allocation2 + $0x164] sm:$0xf] }
 0x135   : > { %1213 = vmax.xlane.f32.xlu2 %v1212_v17  ;;  %v2969_v20 = vor.u32 %v3302_v14, %v2968_v13  ;;  %v3309_v13 = vld [vmem:[#allocation2 + $0xe4] sm:$0xf]  ;;  %v3002_v14 = vld [vmem:[#allocation2 + $0xe8] sm:$0xf0] }
 0x136   : > { %1090 = vmatpush.bf16.msrb.mxu2 %v3065_v43  ;;  %v2961_v43 = vor.u32 %v3300_v29, %v2960_v28  ;;  %v1252_v6 = vcvt.s32.f32 %v1250_v37  ;;  %v3138_v28 = vld [vmem:[#allocation2 + $0x1f8] sm:$0xf0]  ;;  %v3081_v37 = vor.u32 %v3330_v19, %v3080_v18  ;;  %v3066_v42 = vld [vmem:[#allocation2 + $0x168] sm:$0xf0]  ;;  %v3301_v18 = vld [vmem:[#allocation2 + $0xa4] sm:$0xf] }
 0x137   : > { %1075 = vmatpush.bf16.msrb.mxu1 %v2969_v20  ;;  %v3327_v20 = vld [vmem:[#allocation2 + $0x174] sm:$0xf]  ;;  %v2930_v29 = vld [vmem:[#allocation2 + $0x58] sm:$0xf0]  ;;  %v2970_v19 = vld [vmem:[#allocation2 + $0xa8] sm:$0xf0] }
 0x138   : > { %v3077_v38 = vor.u32 %v3327_v20, %v3074_v22 }
 0x13a   : > { %v3641_v58 = vpop.xlane.xlu0 %1224  ;;  %1091 = vmatpush.bf16.msrb.mxu2 %v3057_v0  ;;  %v3024_v0 = vld [vmem:[#allocation2 + $0x110] sm:$0xf] }
 0x13b   : > { %vm1226_vm6 = vcmp.eq.f32.partialorder %v3613_v41, %v3641_v58  ;;  %v3338_v41 = vld [vmem:[#allocation2 + $0x1c4] sm:$0xf0]  ;;  %1076 = vmatpush.bf16.msrb.mxu1 %v2961_v43  ;;  %v2933_v43 = vor.u32 %v3291_v24, %v2930_v29  ;;  %v3335_v29 = vld [vmem:[#allocation2 + $0x1b4] sm:$0xf] }
 0x13c   : > { %v1227_v1 = vsel %vm1226_vm6, %v1222_v60, -inf  ;;  %v3113_v17 = vor.u32 %v3338_v41, %v3112_v10  ;;  %v3311_v60 = vld [vmem:[#allocation2 + $0xf4] sm:$0xf]  ;;  %v2938_v10 = vld [vmem:[#allocation2 + $0x68] sm:$0xf0] }
 0x13d   : > { %1228 = vmax.xlane.f32.xlu2 %v1227_v1  ;;  %v3316_v1 = vld [vmem:[#allocation2 + $0x114] sm:$0xf0]  ;;  %v3013_v8 = vor.u32 %v3311_v60, %v3010_v61  ;;  %v2941_v23 = vor.u32 %v3293_v9, %v2938_v10  ;;  %v3069_v60 = vor.u32 %v3325_v40, %v3066_v42  ;;  %v3321_v10 = vld [vmem:[#allocation2 + $0x144] sm:$0xf]  ;;  %v3034_v42 = vld [vmem:[#allocation2 + $0x128] sm:$0xf0] }
 0x13e   : > { %1092 = vmatpush.bf16.msrb.mxu2 %v3049_v15  ;;  %1111 = vmatpush.bf16.msrb.mxu3 %v3113_v17  ;;  %v3025_v41 = vor.u32 %v3316_v1, %v3024_v0  ;;  %v3016_v15 = vld [vmem:[#allocation2 + $0x100] sm:$0xf]  ;;  %v3314_v17 = vld [vmem:[#allocation2 + $0x104] sm:$0xf0]  ;;  %v2989_v0 = vor.u32 %v3305_v55, %v2986_v30  ;;  %v3287_v1 = vld [vmem:[#allocation2 + $0x34] sm:$0xf] }
 0x13f   : > { %1128 = vmatpush.bf16.msra.mxu0 %v2941_v23  ;;  %v3319_v23 = vld [vmem:[#allocation2 + $0x134] sm:$0xf]  ;;  %v3317_v40 = vld [vmem:[#allocation2 + $0x124] sm:$0xf]  ;;  %v2954_v30 = vld [vmem:[#allocation2 + $0x88] sm:$0xf0] }
 0x140   : > { %v3297_v55 = vld [vmem:[#allocation2 + $0x84] sm:$0xf] }
 0x142   : > { %v3646_v25 = vpop.xlane.xlu1 %1239  ;;  %1093 = vmatpush.bf16.msrb.mxu2 %v3041_v36  ;;  %1112 = vmatpush.bf16.msrb.mxu3 %v3105_v39  ;;  %v2994_v36 = vld [vmem:[#allocation2 + $0xd8] sm:$0xf0] }
 0x143   : > { %vm1241_vm7 = vcmp.eq.f32.partialorder %v3623_v54, %v3646_v25  ;;  %v3298_v54 = vld [vmem:[#allocation2 + $0x84] sm:$0xf0]  ;;  %v2997_v49 = vor.u32 %v3307_v31, %v2994_v36  ;;  %1129 = vmatpush.bf16.msra.mxu0 %v2933_v43  ;;  %v3106_v31 = vld [vmem:[#allocation2 + $0x1b8] sm:$0xf0] }
 0x144   : > { %v1242_v21 = vsel %vm1241_vm7, %v1237_v27, -inf  ;;  %v2953_v2 = vor.u32 %v3298_v54, %v2952_v53  ;;  %v3343_v27 = vld [vmem:[#allocation2 + $0x1f4] sm:$0xf]  ;;  %v3130_v53 = vld [vmem:[#allocation2 + $0x1e8] sm:$0xf0] }
 0x145   : > { %1243 = vmax.xlane.f32.xlu0 %v1242_v21  ;;  %v3017_v21 = vor.u32 %v3314_v17, %v3016_v15  ;;  %v3141_v39 = vor.u32 %v3343_v27, %v3138_v28  ;;  %v2922_v54 = vld [vmem:[#allocation2 + $0x48] sm:$0xf0]  ;;  %v3133_v61 = vor.u32 %v3341_v52, %v3130_v53  ;;  %v3285_v15 = vld [vmem:[#allocation2 + $0x24] sm:$0xf]  ;;  %v2973_v27 = vor.u32 %v3301_v18, %v2970_v19  ;;  %v3283_v28 = vld [vmem:[#allocation2 + $0x14] sm:$0xf] }
 0x146   : > { %1094 = vmatpush.bf16.msrb.mxu2 %v3033_v57  ;;  %1113 = vmatpush.bf16.msrb.mxu3 %v3097_v63  ;;  %v3323_v57 = vld [vmem:[#allocation2 + $0x154] sm:$0xf]  ;;  %v2925_v63 = vor.u32 %v3289_v51, %v2922_v54  ;;  %v2906_v17 = vld [vmem:[#allocation2 + $0x28] sm:$0xf0]  ;;  %v2898_v36 = vld [vmem:[#allocation2 + $0x18] sm:$0xf0] }
 0x147   : > { %1077 = vmatpush.bf16.msrb.mxu1 %v2953_v2  ;;  %v3339_v2 = vld [vmem:[#allocation2 + $0x1d4] sm:$0xf]  ;;  %v2909_v24 = vor.u32 %v3285_v15, %v2906_v17  ;;  %v2901_v43 = vor.u32 %v3283_v28, %v2898_v36  ;;  %v3281_v51 = vld [vmem:[#allocation2 + $0x4] sm:$0xf]  ;;  %v3098_v53 = vld [vmem:[#allocation2 + $0x1a8] sm:$0xf0] }
 0x148   : > { %v3125_v9 = vor.u32 %v3339_v2, %v3122_v3  ;;  %1130 = vmatpush.bf16.msra.mxu0 %v2925_v63  ;;  %v3333_v52 = vld [vmem:[#allocation2 + $0x1a4] sm:$0xf]  ;;  %v2890_v54 = vld [vmem:[#allocation2 + $0x8] sm:$0xf0]  ;;  %v3090_v2 = vld [vmem:[#allocation2 + $0x198] sm:$0xf0] }
 0x149   : > { %v2893_v63 = vor.u32 %v3281_v51, %v2890_v54  ;;  %v3146_v15 = vld [vmem:[%s423_s12 + $0x8] sm:$0xf0] }
 0x14a   : > { %v3651_v5 = vpop.xlane.xlu1 %1254  ;;  %1095 = vmatpush.bf16.msrb.mxu2 %v3025_v41  ;;  %1078 = vmatmul.bf16.vlgmr.msrb.gmra.mxu1 %v3565_v33 }
 0x14b   : > { %vm1256_vm8 = vcmp.eq.f32.partialorder %v3633_v59, %v3651_v5  ;;  %1146 = vmatpush.bf16.msra.mxu1 %v3013_v8  ;;  %v3005_v59 = vor.u32 %v3309_v13, %v3002_v14  ;;  %1114 = vmatpush.bf16.msrb.mxu3 %v3089_v50  ;;  %v3061_v8 = vor.u32 %v3323_v57, %v3058_v62  ;;  %v3050_v13 = vld [vmem:[#allocation2 + $0x148] sm:$0xf0]  ;;  %v3315_v57 = vld [vmem:[#allocation2 + $0x114] sm:$0xf]  ;;  %v3026_v62 = vld [vmem:[#allocation2 + $0x118] sm:$0xf0]  ;;  %v1261_v51 = vcvt.f32.s32 %v3651_v5 }
 0x14c   : > { %v1257_v16 = vsel %vm1256_vm8, %v1252_v6, -inf  ;;  %v3303_v6 = vld [vmem:[#allocation2 + $0xb4] sm:$0xf]  ;;  %v2917_v14 = vor.u32 %v3287_v1, %v2914_v4  ;;  %v3114_v50 = vld [vmem:[#allocation2 + $0x1c8] sm:$0xf0]  ;;  %v3053_v20 = vor.u32 %v3321_v10, %v3050_v13  ;;  %v3029_v3 = vor.u32 %v3315_v57, %v3026_v62 }
 0x14d   : > { %1258 = vmax.xlane.f32.xlu1 %v1257_v16  ;;  %v2981_v41 = vor.u32 %v3303_v6, %v2978_v7  ;;  %v3337_v16 = vld [vmem:[#allocation2 + $0x1c4] sm:$0xf]  ;;  %v3331_v1 = vld [vmem:[#allocation2 + $0x194] sm:$0xf]  ;;  %v3018_v7 = vld [vmem:[#allocation2 + $0x108] sm:$0xf0] }
 0x14e   : > { %1096 = vmatpush.bf16.msrb.mxu2 %v3017_v21  ;;  %v3117_v22 = vor.u32 %v3337_v16, %v3114_v50  ;;  %1131 = vmatpush.bf16.msra.mxu0 %v2917_v14  ;;  %v3299_v21 = vld [vmem:[#allocation2 + $0x94] sm:$0xf]  ;;  %v3093_v4 = vor.u32 %v3331_v1, %v3090_v2  ;;  %v3313_v6 = vld [vmem:[#allocation2 + $0x104] sm:$0xf]  ;;  %v1216_v50 = vcvt.f32.s32 %v3637_v12 }
 0x14f   : > { %1147 = vmatpush.bf16.msra.mxu1 %v3005_v59  ;;  %1115 = vmatpush.bf16.msrb.mxu3 %v3081_v37  ;;  %v3042_v59 = vld [vmem:[#allocation2 + $0x138] sm:$0xf0]  ;;  %v3021_v10 = vor.u32 %v3313_v6, %v3018_v7  ;;  %v3279_v14 = vld [vmem:[%s423_s12 + $0x14] sm:$0xf] }
 0x150   : > { %v2962_v37 = vld [vmem:[#allocation2 + $0x98] sm:$0xf0]  ;;  %v1217_v18 = vshll.u32 %v1216_v50, 16 }
 0x151   : > { %1097 = vmatmul.bf16.vlgmr.msrb.gmra.mxu2 %v3567_v34 }
 0x152   : > { %1165 = vmatpush.bf16.msra.mxu2 %v3077_v38  ;;  %1116 = vmatmul.bf16.vlgmr.msrb.gmra.mxu3 %v3569_v35  ;;  %v3045_v38 = vor.u32 %v3319_v23, %v3042_v59 }
 0x153   : > { %1184 = vmatpush.bf16.msra.mxu3 %v3141_v39  ;;  %1148 = vmatpush.bf16.msra.mxu1 %v2997_v49  ;;  %v3109_v39 = vor.u32 %v3335_v29, %v3106_v31  ;;  %v2965_v49 = vor.u32 %v3299_v21, %v2962_v37 }
 0x154   : > { %1132 = vmatpush.bf16.msra.mxu0 %v2909_v24 }
 0x156   : > { %1166 = vmatpush.bf16.msra.mxu2 %v3069_v60  ;;  %v3037_v60 = vor.u32 %v3317_v40, %v3034_v42 }
 0x157   : > { %1185 = vmatpush.bf16.msra.mxu3 %v3133_v61  ;;  %1149 = vmatpush.bf16.msra.mxu1 %v2989_v0  ;;  %v3101_v61 = vor.u32 %v3333_v52, %v3098_v53  ;;  %v2957_v0 = vor.u32 %v3297_v55, %v2954_v30  ;;  %v1262_v30 = vshll.u32 %v1261_v51, 16 }
 0x158   : > { %1133 = vmatpush.bf16.msra.mxu0 %v2901_v43 }
 0x15a   : > { %1167 = vmatpush.bf16.msra.mxu2 %v3061_v8  ;;  %1083 = vmatmul.bf16.gmra.mxu1 %v3589_v45  ;;  %v3329_v8 = vld [vmem:[#allocation2 + $0x184] sm:$0xf] }
 0x15b   : > { %1186 = vmatpush.bf16.msra.mxu3 %v3125_v9  ;;  %1150 = vmatpush.bf16.msra.mxu1 %v2981_v41  ;;  %v3082_v9 = vld [vmem:[#allocation2 + $0x188] sm:$0xf0] }
 0x15c   : > { %1134 = vmatpush.bf16.msra.mxu0 %v2893_v63  ;;  %v3085_v13 = vor.u32 %v3329_v8, %v3082_v9  ;;  %v531_v63 = vld [vmem:[%s4460_s5] sm:$0x3] }
 0x15e   : > { %1168 = vmatpush.bf16.msra.mxu2 %v3053_v20 }
 0x15f   : > { %1187 = vmatpush.bf16.msra.mxu3 %v3117_v22  ;;  %1151 = vmatpush.bf16.msra.mxu1 %v2973_v27  ;;  %v1231_v22 = vcvt.f32.s32 %v3641_v58  ;;  %v1246_v58 = vcvt.f32.s32 %v3646_v25 }
 0x160   : > { %1135 = vmatmul.bf16.vlgmr.msra.gmra.mxu0 %v3563_v32  ;;  %v3152_v32 = vld [vmem:[%s423_s12 + $0x10] sm:$0xf] }
 0x161   : > { %1102 = vmatmul.bf16.gmra.mxu2 %v3591_v46  ;;  %v1232_v28 = vshll.u32 %v1231_v22, 16  ;;  %v1247_v43 = vshll.u32 %v1246_v58, 16  ;;  %v728_v22 = vperm.slane %v531_v63, 1 }
 0x162   : > { %1169 = vmatpush.bf16.msra.mxu2 %v3045_v38  ;;  %1121 = vmatmul.bf16.gmra.mxu3 %v3593_v47 }
 0x163   : > { %1188 = vmatpush.bf16.msra.mxu3 %v3109_v39  ;;  %1152 = vmatpush.bf16.msra.mxu1 %v2965_v49 }
 0x166   : > { %1170 = vmatpush.bf16.msra.mxu2 %v3037_v60 }
 0x167   : > { %1189 = vmatpush.bf16.msra.mxu3 %v3101_v61  ;;  %1153 = vmatpush.bf16.msra.mxu1 %v2957_v0 }
 0x16a   : > { %1171 = vmatpush.bf16.msra.mxu2 %v3029_v3  ;;  %1154 = vmatmul.bf16.vlgmr.msra.gmra.mxu1 %v3565_v33  ;;  %v3280_v33 = vld [vmem:[%s423_s12 + $0x14] sm:$0xf0]  ;;  %v3765_v3 = vperm.slane %v531_v63, 0 }
 0x16b   : > { %1190 = vmatpush.bf16.msra.mxu3 %v3093_v4 }
 0x16e   : > { %1172 = vmatpush.bf16.msra.mxu2 %v3021_v10 }
 0x16f   : > { %1191 = vmatpush.bf16.msra.mxu3 %v3085_v13 }
 0x170   : > { %1140 = vmatmul.bf16.gmra.mxu0 %v3587_v44  ;;  %v3144_v44 = vld [vmem:[%s423_s12] sm:$0xf] }
 0x171   : > { %1173 = vmatmul.bf16.vlgmr.msra.gmra.mxu2 %v3567_v34  ;;  %v3677_v34 = vor.u32 %v3280_v33, %v3152_v32 }
 0x172   : > { %1192 = vmatmul.bf16.vlgmr.msra.gmra.mxu3 %v3569_v35  ;;  %v3154_v35 = vld [vmem:[%s423_s12 + $0x18] sm:$0xf0] }
 0x173   : > { %v3679_v41 = vor.u32 %v3279_v14, %v3154_v35  ;;  %1310 = vmatpush.bf16.msrb.mxu0 %v3677_v34  ;;  %3372 = vmatpush.bf16.msrb.mxu2 %v3677_v34 }
 0x175   : > { %1329 = vmatpush.bf16.msrb.mxu1 %v3679_v41  ;;  %3374 = vmatpush.bf16.msrb.mxu3 %v3679_v41 }
 0x17a   : > { %1159 = vmatmul.bf16.gmra.mxu1 %v3589_v45  ;;  %v3278_v45 = vld [vmem:[%s423_s12 + $0x4] sm:$0xf0] }
 0x181   : > { %1178 = vmatmul.bf16.gmra.mxu2 %v3591_v46  ;;  %v3277_v46 = vld [vmem:[%s423_s12 + $0x4] sm:$0xf] }
 0x182   : > { %1197 = vmatmul.bf16.gmra.mxu3 %v3593_v47  ;;  %v3685_v47 = vor.u32 %v3278_v45, %v3144_v44  ;;  %v3687_v16 = vor.u32 %v3277_v46, %v3146_v15 }
 0x184   : > { %1311 = vmatpush.bf16.msrb.mxu0 %v3685_v47  ;;  %3373 = vmatpush.bf16.msrb.mxu2 %v3685_v47 }
 0x185   : > { %1330 = vmatpush.bf16.msrb.mxu1 %v3687_v16  ;;  %3375 = vmatpush.bf16.msrb.mxu3 %v3687_v16 }
 0x188   : > { %1452 = vmatpush.bf16.msra.mxu2 %v3677_v34  ;;  %1602 = vmatpush.bf16.msra.mxu0 %v3677_v34 }
 0x189   : > { %1471 = vmatpush.bf16.msra.mxu3 %v3679_v41  ;;  %1621 = vmatpush.bf16.msra.mxu1 %v3679_v41 }
 0x18c   : > { %1453 = vmatpush.bf16.msra.mxu2 %v3685_v47  ;;  %1603 = vmatpush.bf16.msra.mxu0 %v3685_v47 }
 0x18d   : > { %1472 = vmatpush.bf16.msra.mxu3 %v3687_v16  ;;  %1622 = vmatpush.bf16.msra.mxu1 %v3687_v16 }
 0x1a8   : > { %v1214_v17 = vpop.xlane.xlu2 %1213 }
 0x1a9   : > { %v1215_v19 = vcvt.f32.s32 %v1214_v17 }
 0x1ab   : > { %v1218_v20 = vadd.s32 %v1217_v18, %v1215_v19 }
 0x1ad   : > { %vm1264_vm9 = vcmp.eq.s32.totalorder %v3599_v11, %v1218_v20 }
 0x1ae   : > { %v3705_v23 = vsel %vm1264_vm9, 2147483648, %v3599_v11  ;;  %v3476_v11 = vmov 0.0  }
 0x1af   : > { %v3709_v59 = vsel %vm1203_vm1, %v3705_v23, 2147483648  ;;  %v1272_v36 = vsel %vm1264_vm9, 1.0, %v3476_v11 }
 0x1b0   : > { %v1229_v24 = vpop.xlane.xlu2 %1228  ;;  %v1368_v27 = vshra.s32 %v3709_v59, 16 }
 0x1b1   : > { %v1230_v12 = vcvt.f32.s32 %v1229_v24 }
 0x1b2   : > { %v3712_v29 = vcvt.s32.f32 %v1368_v27 }
 0x1b3   : > { %v1233_v31 = vadd.s32 %v1232_v28, %v1230_v12 }
 0x1b4   : > { %1371 = vmax.xlane.f32.xlu2 %v3712_v29 }
 0x1b5   : > { %vm1265_vm10 = vcmp.eq.s32.totalorder %v3606_v26, %v1233_v31 }
 0x1b6   : > { %v1273_v21 = vsel %vm1265_vm10, 1.0, %v3476_v11  ;;  %v3720_v37 = vsel %vm1265_vm10, 2147483648, %v3606_v26 }
 0x1b7   : > { %v1276_v38 = vpack.c.bf16 %v1273_v21, %v1272_v36  ;;  %v3724_v39 = vsel %vm1203_vm1, %v3720_v37, 2147483648 }
 0x1b8   : > { %v1244_v40 = vpop.xlane.xlu0 %1243  ;;  %v1383_v42 = vshra.s32 %v3724_v39, 16 }
 0x1b9   : > { %v1245_v25 = vcvt.f32.s32 %v1244_v40  ;;  %3158 = vmatmul.msk.bf16.vlgmr.msrb.gmra.mxu0 %vm1203_vm1, %v1276_v38  ;;  %3160 = vmatmul.msk.bf16.vlgmr.msrb.gmra.mxu1 %vm1203_vm1, %v1276_v38 }
 0x1ba   : > { %v3729_v49 = vcvt.s32.f32 %v1383_v42  ;;  %1902 = vmatpush.bf16.msrb.mxu0 %v3677_v34  ;;  %1921 = vmatpush.bf16.msrb.mxu1 %v3679_v41 }
 0x1bb   : > { %v1248_v26 = vadd.s32 %v1247_v43, %v1245_v25 }
 0x1bc   : > { %1386 = vmax.xlane.f32.xlu0 %v3729_v49 }
 0x1bd   : > { %vm1266_vm11 = vcmp.eq.s32.totalorder %v3616_v48, %v1248_v26 }
 0x1be   : > { %v3737_v52 = vsel %vm1266_vm11, 2147483648, %v3616_v48  ;;  %1903 = vmatpush.bf16.msrb.mxu0 %v3685_v47  ;;  %1922 = vmatpush.bf16.msrb.mxu1 %v3687_v16  ;;  %v1274_v48 = vsel %vm1266_vm11, 1.0, %v3476_v11 }
 0x1bf   : > { %v3743_v53 = vsel %vm1203_vm1, %v3737_v52, 2147483648 }
 0x1c0   : > { %v1259_v54 = vpop.xlane.xlu1 %1258  ;;  %v1398_v55 = vshra.s32 %v3743_v53, 16 }
 0x1c1   : > { %v1260_v60 = vcvt.f32.s32 %v1259_v54 }
 0x1c2   : > { %v3746_v61 = vcvt.s32.f32 %v1398_v55 }
 0x1c3   : > { %v1263_v5 = vadd.s32 %v1262_v30, %v1260_v60 }
 0x1c4   : > { %1401 = vmax.xlane.f32.xlu1 %v3746_v61 }
 0x1c5   : > { %vm1267_vm12 = vcmp.eq.s32.totalorder %v3626_v56, %v1263_v5 }
 0x1c6   : > { %v1275_v57 = vsel %vm1267_vm12, 1.0, %v3476_v11  ;;  %v3753_v62 = vsel %vm1267_vm12, 2147483648, %v3626_v56  ;;  %v1060_v56 = vpop.f32.mrf.mxu0 }
 0x1c7   : > { %v1277_v0 = vpack.c.bf16 %v1275_v57, %v1274_v48  ;;  %v3760_v1 = vsel %vm1203_vm1, %v3753_v62, 2147483648  ;;  %v1061_v6 = vadd.f32 %v1060_v56, %v3765_v3  ;;  %v1079_v7 = vpop.f32.mrf.mxu1 }
 0x1c8   : > { %v1413_v2 = vshra.s32 %v3760_v1, 16 }
 0x1c9   : > { %3159 = vmatmul.msk.bf16.vlgmr.msrb.gmra.mxu2 %vm1203_vm1, %v1277_v0  ;;  %3161 = vmatmul.msk.bf16.vlgmr.msrb.gmra.mxu3 %vm1203_vm1, %v1277_v0  ;;  %v1080_v8 = vadd.f32 %v1079_v7, %v1061_v6 }
 0x1ca   : > { %v3767_v4 = vcvt.s32.f32 %v1413_v2  ;;  %1752 = vmatpush.bf16.msrb.mxu2 %v3677_v34  ;;  %1771 = vmatpush.bf16.msrb.mxu3 %v3679_v41 }
 0x1cc   : > { %1416 = vmax.xlane.f32.xlu2 %v3767_v4 }
 0x1ce   : > { %1753 = vmatpush.bf16.msrb.mxu2 %v3685_v47  ;;  %1772 = vmatpush.bf16.msrb.mxu3 %v3687_v16  ;;  %v3775_v9 = vpop.f32.mrf.mxu0 }
 0x1cf   : > { %v3777_v10 = vpop.f32.mrf.mxu1 }
 0x1d4   : > { %v1098_v13 = vpop.f32.mrf.mxu2 }
 0x1d5   : > { %v1117_v32 = vpop.f32.mrf.mxu3  ;;  %v1099_v33 = vadd.f32 %v1098_v13, %v1080_v8 }
 0x1d6   : > { %v1065_v14 = vpop.f32.mrf.mxu0 }
 0x1d7   : > { %v1066_v35 = vadd.f32 %v1065_v14, %v3765_v3  ;;  %v1084_v44 = vpop.f32.mrf.mxu1  ;;  %v3780_v45 = vadd.f32 %v1117_v32, %v1099_v33 }
 0x1d9   : > { %v1085_v46 = vadd.f32 %v1084_v44, %v1066_v35 }
 0x1dc   : > { %v3782_v15 = vpop.f32.mrf.mxu2 }
 0x1dd   : > { %v3784_v50 = vpop.f32.mrf.mxu3 }
 0x1de   : > { %v1067_v17 = vpop.f32.mrf.mxu0 }
 0x1df   : > { %v1068_v18 = vadd.f32 %v1067_v17, %v3765_v3  ;;  %v1086_v19 = vpop.f32.mrf.mxu1  ;;  %v1367_v17 = vand.u32 65535, %v3709_v59  ;;  %v1397_v59 = vand.u32 65535, %v3743_v53 }
 0x1e1   : > { %v1087_v20 = vadd.f32 %v1086_v19, %v1068_v18 }
 0x1e4   : > { %v1103_v24 = vpop.f32.mrf.mxu2 }
 0x1e5   : > { %v1122_v27 = vpop.f32.mrf.mxu3  ;;  %v1104_v28 = vadd.f32 %v1103_v24, %v1085_v46 }
 0x1e6   : > { %v1136_v12 = vpop.f32.mrf.mxu0 }
 0x1e7   : > { %v1137_v31 = vadd.f32 %v1136_v12, %v728_v22  ;;  %v1155_v58 = vpop.f32.mrf.mxu1  ;;  %v3787_v36 = vadd.f32 %v1122_v27, %v1104_v28  ;;  %v1369_v27 = vcvt.s32.f32 %v1367_v17  ;;  %v1382_v12 = vand.u32 65535, %v3724_v39 }
 0x1e9   : > { %v1156_v21 = vadd.f32 %v1155_v58, %v1137_v31  ;;  %v1384_v58 = vcvt.s32.f32 %v1382_v12 }
 0x1ec   : > { %v1105_v38 = vpop.f32.mrf.mxu2 }
 0x1ed   : > { %v1106_v40 = vadd.f32 %v1105_v38, %v1087_v20  ;;  %v1124_v43 = vpop.f32.mrf.mxu3 }
 0x1ee   : > { %v1138_v42 = vpop.f32.mrf.mxu0 }
 0x1ef   : > { %v1139_v25 = vadd.f32 %v1138_v42, %v728_v22  ;;  %v1157_v26 = vpop.f32.mrf.mxu1  ;;  %v3789_v51 = vadd.f32 %v1124_v43, %v1106_v40 }
 0x1f1   : > { %v1158_v54 = vadd.f32 %v1157_v26, %v1139_v25  ;;  %v1399_v25 = vcvt.s32.f32 %v1397_v59 }
 0x1f4   : > { %v1174_v48 = vpop.f32.mrf.mxu2 }
 0x1f5   : > { %v1193_v57 = vpop.f32.mrf.mxu3  ;;  %v1175_v63 = vadd.f32 %v1174_v48, %v1156_v21 }
 0x1f6   : > { %v1141_v55 = vpop.f32.mrf.mxu0 }
 0x1f7   : > { %v1142_v30 = vadd.f32 %v1141_v55, %v728_v22  ;;  %v1160_v60 = vpop.f32.mrf.mxu1  ;;  %v3791_v56 = vadd.f32 %v1193_v57, %v1175_v63 }
 0x1f9   : > { %v1161_v5 = vadd.f32 %v1160_v60, %v1142_v30 }
 0x1fc   : > { %v1176_v8 = vpop.f32.mrf.mxu2 }
 0x1fd   : > { %v1195_v13 = vpop.f32.mrf.mxu3  ;;  %v1177_v32 = vadd.f32 %v1176_v8, %v1158_v54 }
 0x1fe   : > { %v1143_v0 = vpop.f32.mrf.mxu0 }
 0x1ff   : > { %v1144_v2 = vadd.f32 %v1143_v0, %v728_v22  ;;  %v1162_v6 = vpop.f32.mrf.mxu1  ;;  %v3793_v33 = vadd.f32 %v1195_v13, %v1177_v32 }
 0x201   : > { %v1163_v7 = vadd.f32 %v1162_v6, %v1144_v2 }
 0x204   : > { %v1179_v14 = vpop.f32.mrf.mxu2 }
 0x205   : > { %v1198_v35 = vpop.f32.mrf.mxu3  ;;  %v1180_v44 = vadd.f32 %v1179_v14, %v1161_v5 }
 0x207   : > { %v3795_v46 = vadd.f32 %v1198_v35, %v1180_v44 }
 0x20c   : > { %v1181_v18 = vpop.f32.mrf.mxu2 }
 0x20d   : > { %v1182_v19 = vadd.f32 %v1181_v18, %v1163_v7  ;;  %v1200_v20 = vpop.f32.mrf.mxu3 }
 0x20f   : > { %v3798_v22 = vadd.f32 %v1200_v20, %v1182_v19 }
 0x227   : > { %v1372_v24 = vpop.xlane.xlu2 %1371 }
 0x228   : > { %vm1373_vm13 = vcmp.eq.f32.partialorder %v3712_v29, %v1372_v24  ;;  %v1378_v57 = vcvt.f32.s32 %v1372_v24 }
 0x229   : > { %v1374_v28 = vsel %vm1373_vm13, %v1369_v27, -inf }
 0x22a   : > { %1375 = vmax.xlane.f32.xlu0 %v1374_v28  ;;  %v1379_v63 = vshll.u32 %v1378_v57, 16 }
 0x22f   : > { %v1387_v31 = vpop.xlane.xlu0 %1386 }
 0x230   : > { %vm1388_vm14 = vcmp.eq.f32.partialorder %v3729_v49, %v1387_v31  ;;  %v1412_v49 = vand.u32 65535, %v3760_v1  ;;  %v1393_v6 = vcvt.f32.s32 %v1387_v31 }
 0x231   : > { %v1389_v21 = vsel %vm1388_vm14, %v1384_v58, -inf }
 0x232   : > { %1390 = vmax.xlane.f32.xlu1 %v1389_v21  ;;  %v1414_v55 = vcvt.s32.f32 %v1412_v49  ;;  %v1394_v32 = vshll.u32 %v1393_v6, 16 }
 0x236   : > { %v1313_v38 = vpop.f32.mrf.mxu0  ;;  %v1332_v40 = vpop.f32.mrf.mxu1 }
 0x237   : > { %v3805_v42 = vadd.f32 %v1313_v38, %v3780_v45  ;;  %v3808_v43 = vadd.f32 %v1332_v40, %v3791_v56  ;;  %v1402_v29 = vpop.xlane.xlu1 %1401 }
 0x238   : > { %vm1403_vm15 = vcmp.eq.f32.partialorder %v3746_v61, %v1402_v29  ;;  %v1408_v17 = vcvt.f32.s32 %v1402_v29 }
 0x239   : > { %v1404_v39 = vsel %vm1403_vm15, %v1399_v25, -inf  ;;  %vm1342_vm9 = vcmp.ge.f32.partialorder %v3805_v42, 0.0  ;;  %vm1343_vm10 = vcmp.ge.f32.partialorder %v3808_v43, 0.0 }
 0x23a   : > { %1405 = vmax.xlane.f32.xlu2 %v1404_v39  ;;  %v1409_v12 = vshll.u32 %v1408_v17, 16 }
 0x23e   : > { %v1334_v26 = vpop.f32.mrf.mxu1 }
 0x23f   : > { %v3813_v54 = vadd.f32 %v1334_v26, %v3793_v33  ;;  %v1417_v53 = vpop.xlane.xlu2 %1416 }
 0x240   : > { %vm1418_vm0 = vcmp.eq.f32.partialorder %v3767_v4, %v1417_v53 }
 0x241   : > { %v1419_v30 = vsel %vm1418_vm0, %v1414_v55, -inf  ;;  %vm1345_vm15 = vcmp.ge.f32.partialorder %v3813_v54, 0.0 }
 0x242   : > { %1420 = vmax.xlane.f32.xlu0 %v1419_v30 }
 0x24c   : > { %v1318_v60 = vpop.f32.mrf.mxu2  ;;  %v1337_v5 = vpop.f32.mrf.mxu3 }
 0x24d   : > { %v3817_v48 = vadd.f32 %v1318_v60, %v3787_v36  ;;  %v3820_v61 = vadd.f32 %v1337_v5, %v3795_v46 }
 0x29d   : > { %v1376_v1 = vpop.xlane.xlu0 %1375 }
 0x29e   : > { %v1377_v0 = vcvt.f32.s32 %v1376_v1 }
 0x2a0   : > { %v1380_v2 = vadd.s32 %v1379_v63, %v1377_v0 }
 0x2a2   : > { %vm1426_vm2 = vcmp.eq.s32.totalorder %v3705_v23, %v1380_v2 }
 0x2a3   : > { %v3824_v4 = vsel %vm1426_vm2, 2147483648, %v3705_v23  ;;  %v1434_v18 = vsel %vm1426_vm2, 1.0, %v3476_v11 }
 0x2a4   : > { %v1516_v7 = vsel %vm1203_vm1, %v3824_v4, 2147483648 }
 0x2a5   : > { %v1391_v8 = vpop.xlane.xlu1 %1390  ;;  %v1518_v13 = vshra.s32 %v1516_v7, 16  ;;  %v1517_v1 = vand.u32 65535, %v1516_v7 }
 0x2a6   : > { %v1392_v14 = vcvt.f32.s32 %v1391_v8 }
 0x2a7   : > { %v1520_v35 = vcvt.s32.f32 %v1518_v13  ;;  %v1519_v0 = vcvt.s32.f32 %v1517_v1  ;;  %v1063_v13 = vadd.f32 %v3775_v9, %v3765_v3  ;;  %v1350_v9 = vmul.f32 0.2, %v3805_v42 }
 0x2a8   : > { %v1395_v44 = vadd.s32 %v1394_v32, %v1392_v14  ;;  %v3867_v14 = vpop.f32.mrf.mxu2 }
 0x2a9   : > { %1521 = vmax.xlane.f32.xlu1 %v1520_v35  ;;  %v1082_v7 = vadd.f32 %v3777_v10, %v1063_v13  ;;  %v1351_v10 = vmul.f32 0.2, %v3808_v43 }
 0x2aa   : > { %vm1427_vm3 = vcmp.eq.s32.totalorder %v3720_v37, %v1395_v44  ;;  %v3869_v44 = vpop.f32.mrf.mxu3 }
 0x2ab   : > { %v1435_v19 = vsel %vm1427_vm3, 1.0, %v3476_v11  ;;  %v3832_v23 = vsel %vm1427_vm3, 2147483648, %v3720_v37  ;;  %v1423_v37 = vcvt.f32.s32 %v1417_v53  ;;  %v1101_v17 = vadd.f32 %v3782_v15, %v1082_v7 }
 0x2ac   : > { %v1438_v20 = vpack.c.bf16 %v1435_v19, %v1434_v18  ;;  %v1531_v24 = vsel %vm1203_vm1, %v3832_v23, 2147483648  ;;  %vm1346_vm3 = vcmp.ge.f32.partialorder %v3817_v48, 0.0 }
 0x2ad   : > { %v1533_v27 = vshra.s32 %v1531_v24, 16  ;;  %v1406_v28 = vpop.xlane.xlu2 %1405  ;;  %v1424_v25 = vshll.u32 %v1423_v37, 16  ;;  %v3876_v3 = vadd.f32 %v3784_v50, %v1101_v17  ;;  %v3888_v37 = vsel %vm1343_vm10, %v3808_v43, %v1351_v10 }
 0x2ae   : > { %3162 = vmatmul.msk.bf16.vlgmr.msra.gmra.mxu2 %vm1203_vm1, %v1438_v20  ;;  %3164 = vmatmul.msk.bf16.vlgmr.msra.gmra.mxu3 %vm1203_vm1, %v1438_v20  ;;  %v1407_v31 = vcvt.f32.s32 %v1406_v28  ;;  %v1354_v17 = vmul.f32 0.2, %v3817_v48 }
 0x2af   : > { %v1535_v58 = vcvt.s32.f32 %v1533_v27  ;;  %2052 = vmatpush.bf16.msra.mxu2 %v3677_v34  ;;  %2071 = vmatpush.bf16.msra.mxu3 %v3679_v41 }
 0x2b0   : > { %v1410_v21 = vadd.s32 %v1409_v12, %v1407_v31  ;;  %v1315_v31 = vpop.f32.mrf.mxu0 }
 0x2b1   : > { %1536 = vmax.xlane.f32.xlu2 %v1535_v58 }
 0x2b2   : > { %vm1428_vm4 = vcmp.eq.s32.totalorder %v3737_v52, %v1410_v21  ;;  %v3885_v21 = vsel %vm1342_vm9, %v3805_v42, %v1350_v9 }
 0x2b3   : > { %2053 = vmatpush.bf16.msra.mxu2 %v3685_v47  ;;  %2072 = vmatpush.bf16.msra.mxu3 %v3687_v16  ;;  %v3844_v59 = vsel %vm1428_vm4, 2147483648, %v3737_v52  ;;  %v1436_v53 = vsel %vm1428_vm4, 1.0, %v3476_v11  ;;  %vm1347_vm4 = vcmp.ge.f32.partialorder %v3820_v61, 0.0 }
 0x2b4   : > { %v1546_v38 = vsel %vm1203_vm1, %v3844_v59, 2147483648 }
 0x2b5   : > { %v1421_v40 = vpop.xlane.xlu0 %1420  ;;  %v1548_v29 = vshra.s32 %v1546_v38, 16 }
 0x2b6   : > { %v1422_v39 = vcvt.f32.s32 %v1421_v40 }
 0x2b7   : > { %v1550_v49 = vcvt.s32.f32 %v1548_v29  ;;  %v1316_v29 = vadd.f32 %v1315_v31, %v3876_v3 }
 0x2b8   : > { %v1425_v26 = vadd.s32 %v1424_v25, %v1422_v39 }
 0x2b9   : > { %1551 = vmax.xlane.f32.xlu0 %v1550_v49  ;;  %vm1344_vm14 = vcmp.ge.f32.partialorder %v1316_v29, 0.0 }
 0x2ba   : > { %vm1429_vm5 = vcmp.eq.s32.totalorder %v3753_v62, %v1425_v26 }
 0x2bb   : > { %v1437_v55 = vsel %vm1429_vm5, 1.0, %v3476_v11  ;;  %v3852_v30 = vsel %vm1429_vm5, 2147483648, %v3753_v62  ;;  %v1532_v62 = vand.u32 65535, %v1531_v24 }
 0x2bc   : > { %v1439_v52 = vpack.c.bf16 %v1437_v55, %v1436_v53  ;;  %v1561_v60 = vsel %vm1203_vm1, %v3852_v30, 2147483648  ;;  %v1352_v55 = vmul.f32 0.2, %v1316_v29 }
 0x2bd   : > { %v1563_v5 = vshra.s32 %v1561_v60, 16  ;;  %v1534_v8 = vcvt.s32.f32 %v1532_v62  ;;  %v1562_v28 = vand.u32 65535, %v1561_v60 }
 0x2be   : > { %3163 = vmatmul.msk.bf16.gmra.mxu2 %vm1203_vm1, %v1439_v52  ;;  %3165 = vmatmul.msk.bf16.gmra.mxu3 %vm1203_vm1, %v1439_v52  ;;  %v1353_v52 = vmul.f32 0.2, %v3813_v54 }
 0x2bf   : > { %v1565_v57 = vcvt.s32.f32 %v1563_v5  ;;  %v1564_v40 = vcvt.s32.f32 %v1562_v28 }
 0x2c1   : > { %1566 = vmax.xlane.f32.xlu1 %v1565_v57 }
 0x31c   : > { %v3858_v63 = vpop.xlane.xlu1 %1521 }
 0x31d   : > { %vm1523_vm6 = vcmp.eq.f32.partialorder %v1520_v35, %v3858_v63  ;;  %v1547_v35 = vand.u32 65535, %v1546_v38 }
 0x31e   : > { %v1524_v2 = vsel %vm1523_vm6, %v1519_v0, -inf  ;;  %v3906_v0 = vsel %vm1344_vm14, %v1316_v29, %v1352_v55 }
 0x31f   : > { %1525 = vmax.xlane.f32.xlu2 %v1524_v2  ;;  %v1549_v19 = vcvt.s32.f32 %v1547_v35  ;;  %v3909_v2 = vsel %vm1345_vm15, %v3813_v54, %v1353_v52 }
 0x324   : > { %v3861_v6 = vpop.xlane.xlu2 %1536 }
 0x325   : > { %vm1538_vm7 = vcmp.eq.f32.partialorder %v1535_v58, %v3861_v6 }
 0x326   : > { %v1539_v32 = vsel %vm1538_vm7, %v1534_v8, -inf }
 0x327   : > { %1540 = vmax.xlane.f32.xlu0 %v1539_v32 }
 0x32c   : > { %v3872_v18 = vpop.xlane.xlu0 %1551 }
 0x32d   : > { %vm1553_vm8 = vcmp.eq.f32.partialorder %v1550_v49, %v3872_v18 }
 0x32e   : > { %v1554_v20 = vsel %vm1553_vm8, %v1549_v19, -inf  ;;  %v1355_v19 = vmul.f32 0.2, %v3820_v61 }
 0x32f   : > { %1555 = vmax.xlane.f32.xlu1 %v1554_v20 }
 0x331   : > { %v1455_v24 = vpop.f32.mrf.mxu2  ;;  %v1474_v27 = vpop.f32.mrf.mxu3 }
 0x332   : > { %v1456_v15 = vadd.f32 %v1455_v24, %v3780_v45  ;;  %v1475_v12 = vadd.f32 %v1474_v27, %v3791_v56  ;;  %v3926_v24 = vsel %vm1346_vm3, %v3817_v48, %v1354_v17  ;;  %v3929_v27 = vsel %vm1347_vm4, %v3820_v61, %v1355_v19 }
 0x334   : > { %vm1484_vm11 = vcmp.ge.f32.partialorder %v1456_v15, 0.0  ;;  %v1492_v58 = vmul.f32 0.2, %v1456_v15  ;;  %vm1485_vm12 = vcmp.ge.f32.partialorder %v1475_v12, 0.0  ;;  %v1493_v50 = vmul.f32 0.2, %v1475_v12  ;;  %v3890_v38 = vpop.xlane.xlu1 %1566 }
 0x335   : > { %vm1568_vm13 = vcmp.eq.f32.partialorder %v1565_v57, %v3890_v38 }
 0x336   : > { %v3893_v25 = vsel %vm1484_vm11, %v1456_v15, %v1492_v58  ;;  %v3895_v39 = vsel %vm1485_vm12, %v1475_v12, %v1493_v50  ;;  %v1569_v26 = vsel %vm1568_vm13, %v1564_v40, -inf  ;;  %v1528_v58 = vcvt.f32.s32 %v3858_v63 }
 0x337   : > { %v1508_v49 = vmax.f32 %v3885_v21, %v3893_v25  ;;  %v1509_v42 = vmax.f32 %v3888_v37, %v3895_v39  ;;  %1570 = vmax.xlane.f32.xlu2 %v1569_v26  ;;  %v1543_v26 = vcvt.f32.s32 %v3861_v6 }
 0x338   : > { %v1529_v40 = vshll.u32 %v1528_v58, 16 }
 0x339   : > { %v1457_v43 = vpop.f32.mrf.mxu2  ;;  %v1476_v53 = vpop.f32.mrf.mxu3  ;;  %v1544_v52 = vshll.u32 %v1543_v26, 16 }
 0x33a   : > { %v1458_v60 = vadd.f32 %v1457_v43, %v3876_v3  ;;  %v1477_v5 = vadd.f32 %v1476_v53, %v3793_v33 }
 0x33c   : > { %vm1486_vm0 = vcmp.ge.f32.partialorder %v1458_v60, 0.0  ;;  %v1494_v57 = vmul.f32 0.2, %v1458_v60  ;;  %vm1487_vm2 = vcmp.ge.f32.partialorder %v1477_v5, 0.0  ;;  %v1495_v1 = vmul.f32 0.2, %v1477_v5 }
 0x33e   : > { %v3911_v62 = vsel %vm1486_vm0, %v1458_v60, %v1494_v57  ;;  %v3913_v8 = vsel %vm1487_vm2, %v1477_v5, %v1495_v1  ;;  %v1558_v57 = vcvt.f32.s32 %v3872_v18 }
 0x33f   : > { %v1510_v13 = vmax.f32 %v3906_v0, %v3911_v62  ;;  %v1511_v32 = vmax.f32 %v3909_v2, %v3913_v8 }
 0x341   : > { %v1460_v7 = vpop.f32.mrf.mxu2  ;;  %v1479_v35 = vpop.f32.mrf.mxu3 }
 0x342   : > { %v1461_v20 = vadd.f32 %v1460_v7, %v3787_v36  ;;  %v1480_v54 = vadd.f32 %v1479_v35, %v3795_v46 }
 0x344   : > { %vm1488_vm5 = vcmp.ge.f32.partialorder %v1461_v20, 0.0  ;;  %v1496_v9 = vmul.f32 0.2, %v1461_v20  ;;  %vm1489_vm6 = vcmp.ge.f32.partialorder %v1480_v54, 0.0  ;;  %v1497_v10 = vmul.f32 0.2, %v1480_v54 }
 0x346   : > { %v3931_v28 = vsel %vm1488_vm5, %v1461_v20, %v1496_v9  ;;  %v3933_v15 = vsel %vm1489_vm6, %v1480_v54, %v1497_v10  ;;  %v1559_v20 = vshll.u32 %v1558_v57, 16 }
 0x347   : > { %v1512_v12 = vmax.f32 %v3926_v24, %v3931_v28  ;;  %v1513_v31 = vmax.f32 %v3929_v27, %v3933_v15 }
 0x392   : > { %v1526_v50 = vpop.xlane.xlu2 %1525 }
 0x393   : > { %v1527_v29 = vcvt.f32.s32 %v1526_v50 }
 0x395   : > { %v1530_v48 = vadd.s32 %v1529_v40, %v1527_v29 }
 0x397   : > { %vm1576_vm7 = vcmp.eq.s32.totalorder %v3824_v4, %v1530_v48 }
 0x398   : > { %v3943_v61 = vsel %vm1576_vm7, 2147483648, %v3824_v4  ;;  %v1584_v6 = vsel %vm1576_vm7, 1.0, %v3476_v11 }
 0x399   : > { %v1666_v43 = vsel %vm1203_vm1, %v3943_v61, 2147483648 }
 0x39a   : > { %v1541_v53 = vpop.xlane.xlu0 %1540  ;;  %v1668_v55 = vshra.s32 %v1666_v43, 16 }
 0x39b   : > { %v1542_v60 = vcvt.f32.s32 %v1541_v53 }
 0x39c   : > { %v1670_v5 = vcvt.s32.f32 %v1668_v55 }
 0x39d   : > { %v1545_v63 = vadd.s32 %v1544_v52, %v1542_v60 }
 0x39e   : > { %1671 = vmax.xlane.f32.xlu0 %v1670_v5 }
 0x39f   : > { %vm1577_vm8 = vcmp.eq.s32.totalorder %v3832_v23, %v1545_v63 }
 0x3a0   : > { %v1585_v1 = vsel %vm1577_vm8, 1.0, %v3476_v11  ;;  %v3952_v4 = vsel %vm1577_vm8, 2147483648, %v3832_v23  ;;  %v1573_v23 = vcvt.f32.s32 %v3890_v38 }
 0x3a1   : > { %v1588_v7 = vpack.c.bf16 %v1585_v1, %v1584_v6  ;;  %v1681_v35 = vsel %vm1203_vm1, %v3952_v4, 2147483648  ;;  %v1667_v6 = vand.u32 65535, %v1666_v43 }
 0x3a2   : > { %v1683_v17 = vshra.s32 %v1681_v35, 16  ;;  %v1556_v19 = vpop.xlane.xlu1 %1555  ;;  %v1574_v29 = vshll.u32 %v1573_v23, 16 }
 0x3a3   : > { %3166 = vmatmul.msk.bf16.vlgmr.msra.gmra.mxu0 %vm1203_vm1, %v1588_v7  ;;  %3168 = vmatmul.msk.bf16.vlgmr.msra.gmra.mxu1 %vm1203_vm1, %v1588_v7  ;;  %v1557_v54 = vcvt.f32.s32 %v1556_v19  ;;  %v1669_v7 = vcvt.s32.f32 %v1667_v6  ;;  %v1682_v19 = vand.u32 65535, %v1681_v35 }
 0x3a4   : > { %v1685_v18 = vcvt.s32.f32 %v1683_v17  ;;  %2202 = vmatpush.bf16.msra.mxu0 %v3677_v34  ;;  %2221 = vmatpush.bf16.msra.mxu1 %v3679_v41 }
 0x3a5   : > { %v1560_v9 = vadd.s32 %v1559_v20, %v1557_v54  ;;  %v1684_v20 = vcvt.s32.f32 %v1682_v19 }
 0x3a6   : > { %1686 = vmax.xlane.f32.xlu1 %v1685_v18 }
 0x3a7   : > { %vm1578_vm9 = vcmp.eq.s32.totalorder %v3844_v59, %v1560_v9 }
 0x3a8   : > { %2203 = vmatpush.bf16.msra.mxu0 %v3685_v47  ;;  %2222 = vmatpush.bf16.msra.mxu1 %v3687_v16  ;;  %v3965_v10 = vsel %vm1578_vm9, 2147483648, %v3844_v59  ;;  %v1586_v38 = vsel %vm1578_vm9, 1.0, %v3476_v11 }
 0x3a9   : > { %v1696_v58 = vsel %vm1203_vm1, %v3965_v10, 2147483648 }
 0x3aa   : > { %v1571_v50 = vpop.xlane.xlu2 %1570  ;;  %v1698_v40 = vshra.s32 %v1696_v58, 16  ;;  %v1697_v9 = vand.u32 65535, %v1696_v58 }
 0x3ab   : > { %v1572_v48 = vcvt.f32.s32 %v1571_v50 }
 0x3ac   : > { %v1700_v26 = vcvt.s32.f32 %v1698_v40  ;;  %v1699_v43 = vcvt.s32.f32 %v1697_v9 }
 0x3ad   : > { %v1575_v53 = vadd.s32 %v1574_v29, %v1572_v48 }
 0x3ae   : > { %1701 = vmax.xlane.f32.xlu2 %v1700_v26 }
 0x3af   : > { %vm1579_vm10 = vcmp.eq.s32.totalorder %v3852_v30, %v1575_v53 }
 0x3b0   : > { %v1587_v55 = vsel %vm1579_vm10, 1.0, %v3476_v11  ;;  %v3973_v52 = vsel %vm1579_vm10, 2147483648, %v3852_v30 }
 0x3b1   : > { %v1589_v59 = vpack.c.bf16 %v1587_v55, %v1586_v38  ;;  %v1711_v60 = vsel %vm1203_vm1, %v3973_v52, 2147483648 }
 0x3b2   : > { %v1713_v63 = vshra.s32 %v1711_v60, 16 }
 0x3b3   : > { %3167 = vmatmul.msk.bf16.gmra.mxu0 %vm1203_vm1, %v1589_v59  ;;  %3169 = vmatmul.msk.bf16.gmra.mxu1 %vm1203_vm1, %v1589_v59  ;;  %v1712_v59 = vand.u32 65535, %v1711_v60 }
 0x3b4   : > { %v1715_v57 = vcvt.s32.f32 %v1713_v63 }
 0x3b5   : > { %v1714_v19 = vcvt.s32.f32 %v1712_v59 }
 0x3b6   : > { %1716 = vmax.xlane.f32.xlu0 %v1715_v57 }
 0x411   : > { %v1672_v1 = vpop.xlane.xlu0 %1671 }
 0x412   : > { %vm1673_vm11 = vcmp.eq.f32.partialorder %v1670_v5, %v1672_v1  ;;  %v1678_v8 = vcvt.f32.s32 %v1672_v1 }
 0x413   : > { %v1674_v17 = vsel %vm1673_vm11, %v1669_v7, -inf }
 0x414   : > { %1675 = vmax.xlane.f32.xlu1 %v1674_v17 }
 0x419   : > { %v1687_v30 = vpop.xlane.xlu1 %1686 }
 0x41a   : > { %vm1688_vm12 = vcmp.eq.f32.partialorder %v1685_v18, %v1687_v30 }
 0x41b   : > { %v1689_v54 = vsel %vm1688_vm12, %v1684_v20, -inf }
 0x41c   : > { %1690 = vmax.xlane.f32.xlu2 %v1689_v54 }
 0x420   : > { %v1605_v23 = vpop.f32.mrf.mxu0  ;;  %v1624_v50 = vpop.f32.mrf.mxu1 }
 0x421   : > { %v1606_v40 = vadd.f32 %v1605_v23, %v3780_v45  ;;  %v1625_v29 = vadd.f32 %v1624_v50, %v3791_v56  ;;  %v3981_v48 = vpop.xlane.xlu2 %1701  ;;  %v1679_v50 = vshll.u32 %v1678_v8, 16 }
 0x422   : > { %vm1703_vm15 = vcmp.eq.f32.partialorder %v1700_v26, %v3981_v48 }
 0x423   : > { %vm1634_vm13 = vcmp.ge.f32.partialorder %v1606_v40, 0.0  ;;  %v1642_v5 = vmul.f32 0.2, %v1606_v40  ;;  %vm1635_vm14 = vcmp.ge.f32.partialorder %v1625_v29, 0.0  ;;  %v1643_v53 = vmul.f32 0.2, %v1625_v29 }
 0x424   : > { %v1704_v38 = vsel %vm1703_vm15, %v1699_v43, -inf  ;;  %v1693_v43 = vcvt.f32.s32 %v1687_v30 }
 0x425   : > { %v1650_v35 = vsel %vm1634_vm13, %v1606_v40, %v1642_v5  ;;  %v1651_v18 = vsel %vm1635_vm14, %v1625_v29, %v1643_v53  ;;  %1705 = vmax.xlane.f32.xlu0 %v1704_v38 }
 0x426   : > { %v3987_v58 = vmax.f32 %v1508_v49, %v1650_v35  ;;  %v3992_v55 = vmax.f32 %v1509_v42, %v1651_v18  ;;  %v1694_v53 = vshll.u32 %v1693_v43, 16 }
 0x428   : > { %v3994_v63 = vpop.f32.mrf.mxu0  ;;  %v1626_v6 = vpop.f32.mrf.mxu1 }
 0x429   : > { %v1627_v26 = vadd.f32 %v1626_v6, %v3793_v33  ;;  %v3997_v7 = vpop.xlane.xlu0 %1716 }
 0x42a   : > { %vm1718_vm2 = vcmp.eq.f32.partialorder %v1715_v57, %v3997_v7 }
 0x42b   : > { %vm1637_vm0 = vcmp.ge.f32.partialorder %v1627_v26, 0.0  ;;  %v1645_v17 = vmul.f32 0.2, %v1627_v26  ;;  %v1719_v25 = vsel %vm1718_vm2, %v1714_v19, -inf }
 0x42c   : > { %1720 = vmax.xlane.f32.xlu1 %v1719_v25 }
 0x42d   : > { %v1653_v21 = vsel %vm1637_vm0, %v1627_v26, %v1645_v17 }
 0x42e   : > { %v4003_v37 = vmax.f32 %v1511_v32, %v1653_v21 }
 0x430   : > { %v1610_v39 = vpop.f32.mrf.mxu0  ;;  %v1629_v49 = vpop.f32.mrf.mxu1 }
 0x431   : > { %v1611_v42 = vadd.f32 %v1610_v39, %v3787_v36  ;;  %v1630_v60 = vadd.f32 %v1629_v49, %v3795_v46 }
 0x433   : > { %vm1638_vm3 = vcmp.ge.f32.partialorder %v1611_v42, 0.0  ;;  %v1646_v20 = vmul.f32 0.2, %v1611_v42  ;;  %vm1639_vm4 = vcmp.ge.f32.partialorder %v1630_v60, 0.0  ;;  %v1647_v54 = vmul.f32 0.2, %v1630_v60 }
 0x435   : > { %v1654_v9 = vsel %vm1638_vm3, %v1611_v42, %v1646_v20  ;;  %v1655_v57 = vsel %vm1639_vm4, %v1630_v60, %v1647_v54 }
 0x436   : > { %v4010_v23 = vmax.f32 %v1512_v12, %v1654_v9  ;;  %v4015_v2 = vmax.f32 %v1513_v31, %v1655_v57 }
 0x487   : > { %v1676_v32 = vpop.xlane.xlu1 %1675 }
 0x488   : > { %v1677_v40 = vcvt.f32.s32 %v1676_v32 }
 0x48a   : > { %v1680_v29 = vadd.s32 %v1679_v50, %v1677_v40 }
 0x48c   : > { %vm1726_vm5 = vcmp.eq.s32.totalorder %v3943_v61, %v1680_v29 }
 0x48d   : > { %v4019_v5 = vsel %vm1726_vm5, 2147483648, %v3943_v61  ;;  %v1734_v1 = vsel %vm1726_vm5, 1.0, %v3476_v11  ;;  %v1708_v61 = vcvt.f32.s32 %v3981_v48  ;;  %v1723_v48 = vcvt.f32.s32 %v3997_v7 }
 0x48e   : > { %v1816_v24 = vsel %vm1203_vm1, %v4019_v5, 2147483648 }
 0x48f   : > { %v1691_v28 = vpop.xlane.xlu2 %1690  ;;  %v1818_v12 = vshra.s32 %v1816_v24, 16  ;;  %v1709_v17 = vshll.u32 %v1708_v61, 16  ;;  %v1724_v39 = vshll.u32 %v1723_v48, 16  ;;  %v1817_v57 = vand.u32 65535, %v1816_v24 }
 0x490   : > { %v1692_v27 = vcvt.f32.s32 %v1691_v28  ;;  %v4055_v28 = vpop.f32.mrf.mxu2 }
 0x491   : > { %v1820_v15 = vcvt.s32.f32 %v1818_v12  ;;  %v1819_v32 = vcvt.s32.f32 %v1817_v57  ;;  %v4057_v12 = vpop.f32.mrf.mxu3 }
 0x492   : > { %v1695_v31 = vadd.s32 %v1694_v53, %v1692_v27 }
 0x493   : > { %1821 = vmax.xlane.f32.xlu2 %v1820_v15 }
 0x494   : > { %vm1727_vm6 = vcmp.eq.s32.totalorder %v3952_v4, %v1695_v31 }
 0x495   : > { %v1735_v30 = vsel %vm1727_vm6, 1.0, %v3476_v11  ;;  %v4027_v35 = vsel %vm1727_vm6, 2147483648, %v3952_v4 }
 0x496   : > { %v1738_v18 = vpack.c.bf16 %v1735_v30, %v1734_v1  ;;  %v1831_v38 = vsel %vm1203_vm1, %v4027_v35, 2147483648 }
 0x497   : > { %v1833_v59 = vshra.s32 %v1831_v38, 16  ;;  %v1832_v40 = vand.u32 65535, %v1831_v38 }
 0x498   : > { %3170 = vmatmul.msk.bf16.vlgmr.msrb.gmra.mxu2 %vm1203_vm1, %v1738_v18  ;;  %3172 = vmatmul.msk.bf16.vlgmr.msrb.gmra.mxu3 %vm1203_vm1, %v1738_v18  ;;  %v1706_v6 = vpop.xlane.xlu0 %1705 }
 0x499   : > { %v1835_v26 = vcvt.s32.f32 %v1833_v59  ;;  %2348 = vmatpush.bf16.msrb.mxu2 %v3677_v34  ;;  %2367 = vmatpush.bf16.msrb.mxu3 %v3679_v41  ;;  %v1707_v4 = vcvt.f32.s32 %v1706_v6  ;;  %v1834_v29 = vcvt.s32.f32 %v1832_v40 }
 0x49b   : > { %1836 = vmax.xlane.f32.xlu0 %v1835_v26  ;;  %v1710_v19 = vadd.s32 %v1709_v17, %v1707_v4 }
 0x49d   : > { %2349 = vmatpush.bf16.msrb.mxu2 %v3685_v47  ;;  %2368 = vmatpush.bf16.msrb.mxu3 %v3687_v16  ;;  %vm1728_vm7 = vcmp.eq.s32.totalorder %v3965_v10, %v1710_v19 }
 0x49e   : > { %v4041_v21 = vsel %vm1728_vm7, 2147483648, %v3965_v10  ;;  %v1736_v47 = vsel %vm1728_vm7, 1.0, %v3476_v11 }
 0x49f   : > { %v1846_v34 = vsel %vm1203_vm1, %v4041_v21, 2147483648  ;;  %v1721_v25 = vpop.xlane.xlu1 %1720 }
 0x4a0   : > { %v1848_v41 = vshra.s32 %v1846_v34, 16  ;;  %v1722_v49 = vcvt.f32.s32 %v1721_v25  ;;  %v1847_v53 = vand.u32 65535, %v1846_v34 }
 0x4a2   : > { %v1850_v42 = vcvt.s32.f32 %v1848_v41  ;;  %v1725_v60 = vadd.s32 %v1724_v39, %v1722_v49  ;;  %v1849_v31 = vcvt.s32.f32 %v1847_v53 }
 0x4a4   : > { %1851 = vmax.xlane.f32.xlu1 %v1850_v42  ;;  %vm1729_vm8 = vcmp.eq.s32.totalorder %v3973_v52, %v1725_v60 }
 0x4a5   : > { %v1737_v16 = vsel %vm1729_vm8, 1.0, %v3476_v11  ;;  %v4049_v7 = vsel %vm1729_vm8, 2147483648, %v3973_v52 }
 0x4a6   : > { %v1739_v10 = vpack.c.bf16 %v1737_v16, %v1736_v47  ;;  %v1861_v20 = vsel %vm1203_vm1, %v4049_v7, 2147483648 }
 0x4a7   : > { %v1863_v54 = vshra.s32 %v1861_v20, 16  ;;  %v1862_v18 = vand.u32 65535, %v1861_v20 }
 0x4a8   : > { %3171 = vmatmul.msk.bf16.gmra.mxu2 %vm1203_vm1, %v1739_v10  ;;  %3173 = vmatmul.msk.bf16.gmra.mxu3 %vm1203_vm1, %v1739_v10 }
 0x4a9   : > { %v1865_v9 = vcvt.s32.f32 %v1863_v54  ;;  %v1864_v4 = vcvt.s32.f32 %v1862_v18 }
 0x4ab   : > { %1866 = vmax.xlane.f32.xlu2 %v1865_v9 }
 0x506   : > { %v1822_v8 = vpop.xlane.xlu2 %1821 }
 0x507   : > { %vm1823_vm9 = vcmp.eq.f32.partialorder %v1820_v15, %v1822_v8 }
 0x508   : > { %v1824_v50 = vsel %vm1823_vm9, %v1819_v32, -inf }
 0x509   : > { %1825 = vmax.xlane.f32.xlu0 %v1824_v50 }
 0x50e   : > { %v1837_v52 = vpop.xlane.xlu0 %1836 }
 0x50f   : > { %vm1838_vm10 = vcmp.eq.f32.partialorder %v1835_v26, %v1837_v52 }
 0x510   : > { %v1839_v43 = vsel %vm1838_vm10, %v1834_v29, -inf  ;;  %v1828_v29 = vcvt.f32.s32 %v1822_v8 }
 0x511   : > { %1840 = vmax.xlane.f32.xlu1 %v1839_v43 }
 0x512   : > { %v1829_v53 = vshll.u32 %v1828_v29, 16 }
 0x517   : > { %v4059_v27 = vpop.xlane.xlu1 %1851 }
 0x518   : > { %vm1853_vm11 = vcmp.eq.f32.partialorder %v1850_v42, %v4059_v27 }
 0x519   : > { %v1854_v24 = vsel %vm1853_vm11, %v1849_v31, -inf }
 0x51a   : > { %1855 = vmax.xlane.f32.xlu2 %v1854_v24 }
 0x51b   : > { %v1755_v15 = vpop.f32.mrf.mxu2  ;;  %v1774_v1 = vpop.f32.mrf.mxu3 }
 0x51c   : > { %v1756_v30 = vadd.f32 %v1755_v15, %v3780_v45  ;;  %v1775_v61 = vadd.f32 %v1774_v1, %v3791_v56  ;;  %v1843_v15 = vcvt.f32.s32 %v1837_v52 }
 0x51e   : > { %vm1784_vm12 = vcmp.ge.f32.partialorder %v1756_v30, 0.0  ;;  %v1792_v38 = vmul.f32 0.2, %v1756_v30  ;;  %vm1785_vm13 = vcmp.ge.f32.partialorder %v1775_v61, 0.0  ;;  %v1793_v59 = vmul.f32 0.2, %v1775_v61  ;;  %v4068_v17 = vpop.xlane.xlu2 %1866 }
 0x51f   : > { %vm1868_vm14 = vcmp.eq.f32.partialorder %v1865_v9, %v4068_v17 }
 0x520   : > { %v4064_v6 = vsel %vm1784_vm12, %v1756_v30, %v1792_v38  ;;  %v4066_v26 = vsel %vm1785_vm13, %v1775_v61, %v1793_v59  ;;  %v1869_v34 = vsel %vm1868_vm14, %v1864_v4, -inf  ;;  %v1844_v38 = vshll.u32 %v1843_v15, 16 }
 0x521   : > { %v1808_v19 = vmax.f32 %v3987_v58, %v4064_v6  ;;  %v1809_v48 = vmax.f32 %v3992_v55, %v4066_v26  ;;  %1870 = vmax.xlane.f32.xlu0 %v1869_v34 }
 0x523   : > { %v4075_v25 = vpop.f32.mrf.mxu2  ;;  %v1776_v41 = vpop.f32.mrf.mxu3 }
 0x524   : > { %v1777_v39 = vadd.f32 %v1776_v41, %v3793_v33 }
 0x526   : > { %vm1787_vm15 = vcmp.ge.f32.partialorder %v1777_v39, 0.0  ;;  %v1795_v49 = vmul.f32 0.2, %v1777_v39 }
 0x528   : > { %v4078_v42 = vsel %vm1787_vm15, %v1777_v39, %v1795_v49 }
 0x529   : > { %v1811_v60 = vmax.f32 %v4003_v37, %v4078_v42 }
 0x52b   : > { %v1760_v47 = vpop.f32.mrf.mxu2  ;;  %v1779_v16 = vpop.f32.mrf.mxu3 }
 0x52c   : > { %v1761_v10 = vadd.f32 %v1760_v47, %v3787_v36  ;;  %v1780_v20 = vadd.f32 %v1779_v16, %v3795_v46 }
 0x52e   : > { %vm1788_vm0 = vcmp.ge.f32.partialorder %v1761_v10, 0.0  ;;  %v1796_v54 = vmul.f32 0.2, %v1761_v10  ;;  %vm1789_vm2 = vcmp.ge.f32.partialorder %v1780_v20, 0.0  ;;  %v1797_v9 = vmul.f32 0.2, %v1780_v20 }
 0x530   : > { %v4084_v57 = vsel %vm1788_vm0, %v1761_v10, %v1796_v54  ;;  %v4086_v32 = vsel %vm1789_vm2, %v1780_v20, %v1797_v9 }
 0x531   : > { %v1812_v50 = vmax.f32 %v4010_v23, %v4084_v57  ;;  %v1813_v40 = vmax.f32 %v4015_v2, %v4086_v32 }
 0x57c   : > { %v1826_v43 = vpop.xlane.xlu0 %1825 }
 0x57d   : > { %v1827_v31 = vcvt.f32.s32 %v1826_v43 }
 0x57f   : > { %v1830_v24 = vadd.s32 %v1829_v53, %v1827_v31 }
 0x581   : > { %vm1876_vm3 = vcmp.eq.s32.totalorder %v4019_v5, %v1830_v24 }
 0x582   : > { %v4094_v1 = vsel %vm1876_vm3, 2147483648, %v4019_v5  ;;  %v1884_v8 = vsel %vm1876_vm3, 1.0, %v3476_v11  ;;  %v1858_v5 = vcvt.f32.s32 %v4059_v27 }
 0x583   : > { %v1966_v30 = vsel %vm1203_vm1, %v4094_v1, 2147483648 }
 0x584   : > { %v1841_v61 = vpop.xlane.xlu1 %1840  ;;  %v1968_v18 = vshra.s32 %v1966_v30, 16  ;;  %v1859_v20 = vshll.u32 %v1858_v5, 16 }
 0x585   : > { %v1842_v59 = vcvt.f32.s32 %v1841_v61 }
 0x586   : > { %v1970_v4 = vcvt.s32.f32 %v1968_v18 }
 0x587   : > { %v1845_v34 = vadd.s32 %v1844_v38, %v1842_v59 }
 0x588   : > { %1971 = vmax.xlane.f32.xlu1 %v1970_v4 }
 0x589   : > { %vm1877_vm4 = vcmp.eq.s32.totalorder %v4027_v35, %v1845_v34 }
 0x58a   : > { %v1885_v52 = vsel %vm1877_vm4, 1.0, %v3476_v11  ;;  %v4102_v41 = vsel %vm1877_vm4, 2147483648, %v4027_v35  ;;  %v1873_v35 = vcvt.f32.s32 %v4068_v17 }
 0x58b   : > { %v1888_v39 = vpack.c.bf16 %v1885_v52, %v1884_v8  ;;  %v1981_v49 = vsel %vm1203_vm1, %v4102_v41, 2147483648  ;;  %v1967_v52 = vand.u32 65535, %v1966_v30 }
 0x58c   : > { %v1983_v47 = vshra.s32 %v1981_v49, 16  ;;  %v1874_v31 = vshll.u32 %v1873_v35, 16 }
 0x58d   : > { %3174 = vmatmul.msk.bf16.vlgmr.msrb.gmra.mxu0 %vm1203_vm1, %v1888_v39  ;;  %3176 = vmatmul.msk.bf16.vlgmr.msrb.gmra.mxu1 %vm1203_vm1, %v1888_v39  ;;  %v1856_v16 = vpop.xlane.xlu2 %1855  ;;  %v1969_v39 = vcvt.s32.f32 %v1967_v52 }
 0x58e   : > { %v1985_v10 = vcvt.s32.f32 %v1983_v47  ;;  %v1857_v54 = vcvt.f32.s32 %v1856_v16  ;;  %v1982_v16 = vand.u32 65535, %v1981_v49 }
 0x590   : > { %1986 = vmax.xlane.f32.xlu2 %v1985_v10  ;;  %v1860_v9 = vadd.s32 %v1859_v20, %v1857_v54  ;;  %v4128_v20 = vpop.f32.mrf.mxu1 }
 0x592   : > { %vm1878_vm5 = vcmp.eq.s32.totalorder %v4041_v21, %v1860_v9  ;;  %v1984_v9 = vcvt.s32.f32 %v1982_v16 }
 0x593   : > { %v4112_v27 = vsel %vm1878_vm5, 2147483648, %v4041_v21  ;;  %v1886_v18 = vsel %vm1878_vm5, 1.0, %v3476_v11 }
 0x594   : > { %v1996_v29 = vsel %vm1203_vm1, %v4112_v27, 2147483648  ;;  %v1871_v43 = vpop.xlane.xlu0 %1870 }
 0x595   : > { %v1998_v53 = vshra.s32 %v1996_v29, 16  ;;  %v1872_v24 = vcvt.f32.s32 %v1871_v43  ;;  %v1997_v43 = vand.u32 65535, %v1996_v29 }
 0x597   : > { %v2000_v15 = vcvt.s32.f32 %v1998_v53  ;;  %v1875_v61 = vadd.s32 %v1874_v31, %v1872_v24 }
 0x599   : > { %2001 = vmax.xlane.f32.xlu0 %v2000_v15  ;;  %vm1879_vm6 = vcmp.eq.s32.totalorder %v4049_v7, %v1875_v61 }
 0x59a   : > { %v1887_v17 = vsel %vm1879_vm6, 1.0, %v3476_v11  ;;  %v4120_v38 = vsel %vm1879_vm6, 2147483648, %v4049_v7  ;;  %v4126_v7 = vpop.f32.mrf.mxu0 }
 0x59b   : > { %v1889_v21 = vpack.c.bf16 %v1887_v17, %v1886_v18  ;;  %v2011_v59 = vsel %vm1203_vm1, %v4120_v38, 2147483648 }
 0x59c   : > { %v2013_v34 = vshra.s32 %v2011_v59, 16  ;;  %v2012_v52 = vand.u32 65535, %v2011_v59 }
 0x59d   : > { %3175 = vmatmul.msk.bf16.gmra.mxu0 %vm1203_vm1, %v1889_v21  ;;  %3177 = vmatmul.msk.bf16.gmra.mxu1 %vm1203_vm1, %v1889_v21 }
 0x59e   : > { %v2015_v8 = vcvt.s32.f32 %v2013_v34 }
 0x5a0   : > { %2016 = vmax.xlane.f32.xlu1 %v2015_v8 }
 0x5fb   : > { %v1972_v5 = vpop.xlane.xlu1 %1971 }
 0x5fc   : > { %vm1973_vm7 = vcmp.eq.f32.partialorder %v1970_v4, %v1972_v5  ;;  %v1999_v4 = vcvt.s32.f32 %v1997_v43  ;;  %v1978_v42 = vcvt.f32.s32 %v1972_v5 }
 0x5fd   : > { %v1974_v47 = vsel %vm1973_vm7, %v1969_v39, -inf }
 0x5fe   : > { %1975 = vmax.xlane.f32.xlu2 %v1974_v47 }
 0x603   : > { %v1987_v54 = vpop.xlane.xlu2 %1986 }
 0x604   : > { %vm1988_vm8 = vcmp.eq.f32.partialorder %v1985_v10, %v1987_v54 }
 0x605   : > { %v1989_v35 = vsel %vm1988_vm8, %v1984_v9, -inf }
 0x606   : > { %1990 = vmax.xlane.f32.xlu0 %v1989_v35  ;;  %v2014_v35 = vcvt.s32.f32 %v2012_v52 }
 0x60a   : > { %v1905_v53 = vpop.f32.mrf.mxu0  ;;  %v1924_v31 = vpop.f32.mrf.mxu1 }
 0x60b   : > { %v1906_v30 = vadd.f32 %v1905_v53, %v3780_v45  ;;  %v1925_v24 = vadd.f32 %v1924_v31, %v3791_v56 }
 0x60c   : > { %v2002_v18 = vpop.xlane.xlu0 %2001 }
 0x60d   : > { %vm1934_vm9 = vcmp.ge.f32.partialorder %v1906_v30, 0.0  ;;  %v1942_v61 = vmul.f32 0.2, %v1906_v30  ;;  %vm1935_vm10 = vcmp.ge.f32.partialorder %v1925_v24, 0.0  ;;  %v1943_v49 = vmul.f32 0.2, %v1925_v24 }
 0x60e   : > { %vm2003_vm11 = vcmp.eq.f32.partialorder %v2000_v15, %v2002_v18 }
 0x60f   : > { %v1950_v17 = vsel %vm1934_vm9, %v1906_v30, %v1942_v61  ;;  %v1951_v21 = vsel %vm1935_vm10, %v1925_v24, %v1943_v49  ;;  %v2004_v34 = vsel %vm2003_vm11, %v1999_v4, -inf  ;;  %v1979_v24 = vshll.u32 %v1978_v42, 16 }
 0x610   : > { %v4135_v10 = vmax.f32 %v1808_v19, %v1950_v17  ;;  %v4140_v29 = vmax.f32 %v1809_v48, %v1951_v21  ;;  %2005 = vmax.xlane.f32.xlu1 %v2004_v34  ;;  %v1993_v49 = vcvt.f32.s32 %v1987_v54 }
 0x612   : > { %v4142_v39 = vpop.f32.mrf.mxu0  ;;  %v1926_v47 = vpop.f32.mrf.mxu1  ;;  %v1994_v21 = vshll.u32 %v1993_v49, 16 }
 0x613   : > { %v1927_v15 = vadd.f32 %v1926_v47, %v3793_v33  ;;  %v2017_v9 = vpop.xlane.xlu1 %2016 }
 0x614   : > { %vm2018_vm13 = vcmp.eq.f32.partialorder %v2015_v8, %v2017_v9 }
 0x615   : > { %vm1937_vm12 = vcmp.ge.f32.partialorder %v1927_v15, 0.0  ;;  %v1945_v16 = vmul.f32 0.2, %v1927_v15  ;;  %v2019_v6 = vsel %vm2018_vm13, %v2014_v35, -inf }
 0x616   : > { %2020 = vmax.xlane.f32.xlu2 %v2019_v6 }
 0x617   : > { %v1953_v58 = vsel %vm1937_vm12, %v1927_v15, %v1945_v16 }
 0x618   : > { %v4148_v55 = vmax.f32 %v1811_v60, %v1953_v58 }
 0x61a   : > { %v1910_v26 = vpop.f32.mrf.mxu0  ;;  %v1929_v19 = vpop.f32.mrf.mxu1 }
 0x61b   : > { %v1911_v48 = vadd.f32 %v1910_v26, %v3787_v36  ;;  %v1930_v59 = vadd.f32 %v1929_v19, %v3795_v46  ;;  %v2023_v19 = vcvt.f32.s32 %v2017_v9 }
 0x61d   : > { %vm1938_vm14 = vcmp.ge.f32.partialorder %v1911_v48, 0.0  ;;  %v1946_v43 = vmul.f32 0.2, %v1911_v48  ;;  %vm1939_vm15 = vcmp.ge.f32.partialorder %v1930_v59, 0.0  ;;  %v1947_v53 = vmul.f32 0.2, %v1930_v59 }
 0x61f   : > { %v1954_v31 = vsel %vm1938_vm14, %v1911_v48, %v1946_v43  ;;  %v1955_v8 = vsel %vm1939_vm15, %v1930_v59, %v1947_v53  ;;  %v2024_v43 = vshll.u32 %v2023_v19, 16 }
 0x620   : > { %v4155_v30 = vmax.f32 %v1812_v50, %v1954_v31  ;;  %v4160_v37 = vmax.f32 %v1813_v40, %v1955_v8 }
 0x671   : > { %v1976_v60 = vpop.xlane.xlu2 %1975 }
 0x672   : > { %v1977_v4 = vcvt.f32.s32 %v1976_v60 }
 0x674   : > { %v1980_v61 = vadd.s32 %v1979_v24, %v1977_v4 }
 0x676   : > { %vm2026_vm0 = vcmp.eq.s32.totalorder %v4094_v1, %v1980_v61 }
 0x677   : > { %v4164_v17 = vsel %vm2026_vm0, 2147483648, %v4094_v1  ;;  %v2034_v5 = vsel %vm2026_vm0, 1.0, %v3476_v11  ;;  %v2008_v1 = vcvt.f32.s32 %v2002_v18 }
 0x678   : > { %v2116_v23 = vsel %vm1203_vm1, %v4164_v17, 2147483648 }
 0x679   : > { %v1991_v57 = vpop.xlane.xlu0 %1990  ;;  %v2118_v50 = vshra.s32 %v2116_v23, 16  ;;  %v2009_v58 = vshll.u32 %v2008_v1, 16  ;;  %v2117_v49 = vand.u32 65535, %v2116_v23  ;;  %v4196_v1 = vpop.f32.mrf.mxu3 }
 0x67a   : > { %v1992_v2 = vcvt.f32.s32 %v1991_v57 }
 0x67b   : > { %v2120_v32 = vcvt.s32.f32 %v2118_v50  ;;  %v2119_v50 = vcvt.s32.f32 %v2117_v49 }
 0x67c   : > { %v1995_v40 = vadd.s32 %v1994_v21, %v1992_v2 }
 0x67d   : > { %2121 = vmax.xlane.f32.xlu0 %v2120_v32 }
 0x67e   : > { %vm2027_vm2 = vcmp.eq.s32.totalorder %v4102_v41, %v1995_v40 }
 0x67f   : > { %v2035_v54 = vsel %vm2027_vm2, 1.0, %v3476_v11  ;;  %v4172_v34 = vsel %vm2027_vm2, 2147483648, %v4102_v41 }
 0x680   : > { %v2038_v52 = vpack.c.bf16 %v2035_v54, %v2034_v5  ;;  %v2131_v47 = vsel %vm1203_vm1, %v4172_v34, 2147483648  ;;  %v4194_v54 = vpop.f32.mrf.mxu2 }
 0x681   : > { %v2133_v15 = vshra.s32 %v2131_v47, 16  ;;  %v2132_v2 = vand.u32 65535, %v2131_v47 }
 0x682   : > { %3178 = vmatmul.msk.bf16.vlgmr.msra.gmra.mxu2 %vm1203_vm1, %v2038_v52  ;;  %3180 = vmatmul.msk.bf16.vlgmr.msra.gmra.mxu3 %vm1203_vm1, %v2038_v52 }
 0x683   : > { %v2006_v16 = vpop.xlane.xlu1 %2005  ;;  %v2135_v35 = vcvt.s32.f32 %v2133_v15  ;;  %v2134_v40 = vcvt.s32.f32 %v2132_v2 }
 0x684   : > { %v2007_v6 = vcvt.f32.s32 %v2006_v16 }
 0x685   : > { %2136 = vmax.xlane.f32.xlu1 %v2135_v35 }
 0x686   : > { %v2010_v26 = vadd.s32 %v2009_v58, %v2007_v6 }
 0x688   : > { %vm2028_vm3 = vcmp.eq.s32.totalorder %v4112_v27, %v2010_v26 }
 0x689   : > { %v4180_v41 = vsel %vm2028_vm3, 2147483648, %v4112_v27  ;;  %v2021_v48 = vpop.xlane.xlu2 %2020  ;;  %v2036_v42 = vsel %vm2028_vm3, 1.0, %v3476_v11 }
 0x68a   : > { %v2146_v18 = vsel %vm1203_vm1, %v4180_v41, 2147483648  ;;  %v2022_v53 = vcvt.f32.s32 %v2021_v48 }
 0x68b   : > { %v2148_v59 = vshra.s32 %v2146_v18, 16  ;;  %v2147_v52 = vand.u32 65535, %v2146_v18 }
 0x68c   : > { %v2025_v8 = vadd.s32 %v2024_v43, %v2022_v53 }
 0x68d   : > { %v2150_v31 = vcvt.s32.f32 %v2148_v59  ;;  %v2149_v16 = vcvt.s32.f32 %v2147_v52 }
 0x68e   : > { %vm2029_vm4 = vcmp.eq.s32.totalorder %v4120_v38, %v2025_v8 }
 0x68f   : > { %2151 = vmax.xlane.f32.xlu2 %v2150_v31  ;;  %v2037_v9 = vsel %vm2029_vm4, 1.0, %v3476_v11  ;;  %v4188_v60 = vsel %vm2029_vm4, 2147483648, %v4120_v38 }
 0x690   : > { %v2039_v27 = vpack.c.bf16 %v2037_v9, %v2036_v42  ;;  %v2161_v24 = vsel %vm1203_vm1, %v4188_v60, 2147483648 }
 0x691   : > { %v2163_v4 = vshra.s32 %v2161_v24, 16  ;;  %v2162_v6 = vand.u32 65535, %v2161_v24 }
 0x692   : > { %3179 = vmatmul.msk.bf16.gmra.mxu2 %vm1203_vm1, %v2039_v27  ;;  %3181 = vmatmul.msk.bf16.gmra.mxu3 %vm1203_vm1, %v2039_v27 }
 0x693   : > { %v2165_v61 = vcvt.s32.f32 %v2163_v4  ;;  %v2164_v43 = vcvt.s32.f32 %v2162_v6 }
 0x695   : > { %2166 = vmax.xlane.f32.xlu0 %v2165_v61 }
 0x6f0   : > { %v2122_v57 = vpop.xlane.xlu0 %2121 }
 0x6f1   : > { %vm2123_vm5 = vcmp.eq.f32.partialorder %v2120_v32, %v2122_v57 }
 0x6f2   : > { %v2124_v21 = vsel %vm2123_vm5, %v2119_v50, -inf }
 0x6f3   : > { %2125 = vmax.xlane.f32.xlu1 %v2124_v21 }
 0x6f8   : > { %v2137_v38 = vpop.xlane.xlu1 %2136 }
 0x6f9   : > { %vm2138_vm6 = vcmp.eq.f32.partialorder %v2135_v35, %v2137_v38 }
 0x6fa   : > { %v2139_v5 = vsel %vm2138_vm6, %v2134_v40, -inf }
 0x6fb   : > { %2140 = vmax.xlane.f32.xlu2 %v2139_v5 }
 0x702   : > { %v4198_v15 = vpop.xlane.xlu2 %2151 }
 0x703   : > { %vm2153_vm7 = vcmp.eq.f32.partialorder %v2150_v31, %v4198_v15 }
 0x704   : > { %v2154_v23 = vsel %vm2153_vm7, %v2149_v16, -inf }
 0x705   : > { %2155 = vmax.xlane.f32.xlu0 %v2154_v23  ;;  %v2055_v32 = vpop.f32.mrf.mxu2  ;;  %v2074_v58 = vpop.f32.mrf.mxu3 }
 0x706   : > { %v2056_v47 = vadd.f32 %v2055_v32, %v3780_v45  ;;  %v2075_v35 = vadd.f32 %v2074_v58, %v3791_v56  ;;  %v2128_v58 = vcvt.f32.s32 %v2122_v57 }
 0x708   : > { %vm2084_vm8 = vcmp.ge.f32.partialorder %v2056_v47, 0.0  ;;  %v2092_v26 = vmul.f32 0.2, %v2056_v47  ;;  %vm2085_vm9 = vcmp.ge.f32.partialorder %v2075_v35, 0.0  ;;  %v2093_v19 = vmul.f32 0.2, %v2075_v35  ;;  %v4207_v59 = vpop.xlane.xlu0 %2166 }
 0x709   : > { %vm2168_vm10 = vcmp.eq.f32.partialorder %v2165_v61, %v4207_v59 }
 0x70a   : > { %v4203_v48 = vsel %vm2084_vm8, %v2056_v47, %v2092_v26  ;;  %v4205_v18 = vsel %vm2085_vm9, %v2075_v35, %v2093_v19  ;;  %v2169_v8 = vsel %vm2168_vm10, %v2164_v43, -inf  ;;  %v2129_v35 = vshll.u32 %v2128_v58, 16 }
 0x70b   : > { %v2108_v53 = vmax.f32 %v4135_v10, %v4203_v48  ;;  %v2109_v31 = vmax.f32 %v4140_v29, %v4205_v18  ;;  %2170 = vmax.xlane.f32.xlu1 %v2169_v8  ;;  %v2143_v19 = vcvt.f32.s32 %v2137_v38 }
 0x70d   : > { %v4214_v42 = vpop.f32.mrf.mxu2  ;;  %v2076_v9 = vpop.f32.mrf.mxu3 }
 0x70e   : > { %v2077_v27 = vadd.f32 %v2076_v9, %v3793_v33 }
 0x710   : > { %vm2087_vm11 = vcmp.ge.f32.partialorder %v2077_v27, 0.0  ;;  %v2095_v24 = vmul.f32 0.2, %v2077_v27 }
 0x712   : > { %v4217_v4 = vsel %vm2087_vm11, %v2077_v27, %v2095_v24  ;;  %v2144_v24 = vshll.u32 %v2143_v19, 16 }
 0x713   : > { %v2111_v49 = vmax.f32 %v4148_v55, %v4217_v4 }
 0x715   : > { %v2060_v50 = vpop.f32.mrf.mxu2  ;;  %v2079_v21 = vpop.f32.mrf.mxu3 }
 0x716   : > { %v2061_v2 = vadd.f32 %v2060_v50, %v3787_v36  ;;  %v2080_v61 = vadd.f32 %v2079_v21, %v3795_v46 }
 0x718   : > { %vm2088_vm12 = vcmp.ge.f32.partialorder %v2061_v2, 0.0  ;;  %v2096_v40 = vmul.f32 0.2, %v2061_v2  ;;  %vm2089_vm13 = vcmp.ge.f32.partialorder %v2080_v61, 0.0  ;;  %v2097_v5 = vmul.f32 0.2, %v2080_v61 }
 0x71a   : > { %v4223_v52 = vsel %vm2088_vm12, %v2061_v2, %v2096_v40  ;;  %v4225_v16 = vsel %vm2089_vm13, %v2080_v61, %v2097_v5 }
 0x71b   : > { %v2112_v23 = vmax.f32 %v4155_v30, %v4223_v52  ;;  %v2113_v32 = vmax.f32 %v4160_v37, %v4225_v16  ;;  %v3351_v37 = vld [vmem:[%s4461_s6 + $0x30] sm:$0xff] }
 0x71c   : > { %v3359_v52 = vld [vmem:[%s4461_s6 + $0x70] sm:$0xff] }
 0x766   : > { %v2126_v47 = vpop.xlane.xlu1 %2125 }
 0x767   : > { %v2127_v6 = vcvt.f32.s32 %v2126_v47 }
 0x769   : > { %v2130_v26 = vadd.s32 %v2129_v35, %v2127_v6 }
 0x76b   : > { %vm2176_vm14 = vcmp.eq.s32.totalorder %v4164_v17, %v2130_v26 }
 0x76c   : > { %v4233_v43 = vsel %vm2176_vm14, 2147483648, %v4164_v17  ;;  %v2184_v57 = vsel %vm2176_vm14, 1.0, %v3476_v11  ;;  %v2158_v17 = vcvt.f32.s32 %v4198_v15 }
 0x76d   : > { %v2266_v8 = vsel %vm1203_vm1, %v4233_v43, 2147483648 }
 0x76e   : > { %v2141_v9 = vpop.xlane.xlu2 %2140  ;;  %v2268_v27 = vshra.s32 %v2266_v8, 16  ;;  %v2159_v6 = vshll.u32 %v2158_v17, 16 }
 0x76f   : > { %v2142_v50 = vcvt.f32.s32 %v2141_v9 }
 0x770   : > { %v2270_v21 = vcvt.s32.f32 %v2268_v27 }
 0x771   : > { %v2145_v2 = vadd.s32 %v2144_v24, %v2142_v50 }
 0x772   : > { %2271 = vmax.xlane.f32.xlu2 %v2270_v21 }
 0x773   : > { %vm2177_vm15 = vcmp.eq.s32.totalorder %v4172_v34, %v2145_v2 }
 0x774   : > { %v2185_v38 = vsel %vm2177_vm15, 1.0, %v3476_v11  ;;  %v4241_v61 = vsel %vm2177_vm15, 2147483648, %v4172_v34  ;;  %v2173_v34 = vcvt.f32.s32 %v4207_v59 }
 0x775   : > { %v2188_v40 = vpack.c.bf16 %v2185_v38, %v2184_v57  ;;  %v2281_v5 = vsel %vm1203_vm1, %v4241_v61, 2147483648 }
 0x776   : > { %v2283_v58 = vshra.s32 %v2281_v5, 16  ;;  %v2174_v50 = vshll.u32 %v2173_v34, 16 }
 0x777   : > { %3182 = vmatmul.msk.bf16.vlgmr.msra.gmra.mxu0 %vm1203_vm1, %v2188_v40  ;;  %3184 = vmatmul.msk.bf16.vlgmr.msra.gmra.mxu1 %vm1203_vm1, %v2188_v40 }
 0x778   : > { %v2156_v47 = vpop.xlane.xlu0 %2155  ;;  %v2285_v35 = vcvt.s32.f32 %v2283_v58 }
 0x779   : > { %v2157_v26 = vcvt.f32.s32 %v2156_v47 }
 0x77a   : > { %2286 = vmax.xlane.f32.xlu0 %v2285_v35 }
 0x77b   : > { %v2160_v19 = vadd.s32 %v2159_v6, %v2157_v26  ;;  %v2267_v26 = vand.u32 65535, %v2266_v8 }
 0x77d   : > { %vm2178_vm0 = vcmp.eq.s32.totalorder %v4180_v41, %v2160_v19  ;;  %v2269_v34 = vcvt.s32.f32 %v2267_v26 }
 0x77e   : > { %v4251_v15 = vsel %vm2178_vm0, 2147483648, %v4180_v41  ;;  %v2171_v27 = vpop.xlane.xlu1 %2170  ;;  %v2186_v17 = vsel %vm2178_vm0, 1.0, %v3476_v11 }
 0x77f   : > { %v2296_v9 = vsel %vm1203_vm1, %v4251_v15, 2147483648  ;;  %v2172_v2 = vcvt.f32.s32 %v2171_v27 }
 0x780   : > { %v2298_v24 = vshra.s32 %v2296_v9, 16 }
 0x781   : > { %v2175_v38 = vadd.s32 %v2174_v50, %v2172_v2  ;;  %v4267_v50 = vpop.f32.mrf.mxu1 }
 0x782   : > { %v2300_v57 = vcvt.s32.f32 %v2298_v24  ;;  %v2282_v24 = vand.u32 65535, %v2281_v5 }
 0x783   : > { %vm2179_vm2 = vcmp.eq.s32.totalorder %v4188_v60, %v2175_v38 }
 0x784   : > { %2301 = vmax.xlane.f32.xlu1 %v2300_v57  ;;  %v2187_v59 = vsel %vm2179_vm2, 1.0, %v3476_v11  ;;  %v4259_v40 = vsel %vm2179_vm2, 2147483648, %v4188_v60  ;;  %v4265_v60 = vpop.f32.mrf.mxu0  ;;  %v2284_v38 = vcvt.s32.f32 %v2282_v24 }
 0x785   : > { %v2189_v41 = vpack.c.bf16 %v2187_v59, %v2186_v17  ;;  %v2311_v58 = vsel %vm1203_vm1, %v4259_v40, 2147483648  ;;  %v2297_v59 = vand.u32 65535, %v2296_v9 }
 0x786   : > { %v2313_v47 = vshra.s32 %v2311_v58, 16 }
 0x787   : > { %3183 = vmatmul.msk.bf16.gmra.mxu0 %vm1203_vm1, %v2189_v41  ;;  %3185 = vmatmul.msk.bf16.gmra.mxu1 %vm1203_vm1, %v2189_v41 }
 0x788   : > { %v2315_v6 = vcvt.s32.f32 %v2313_v47 }
 0x78a   : > { %2316 = vmax.xlane.f32.xlu2 %v2315_v6 }
 0x7e5   : > { %v2272_v19 = vpop.xlane.xlu2 %2271 }
 0x7e6   : > { %vm2273_vm3 = vcmp.eq.f32.partialorder %v2270_v21, %v2272_v19  ;;  %v2299_v21 = vcvt.s32.f32 %v2297_v59  ;;  %v2312_v59 = vand.u32 65535, %v2311_v58 }
 0x7e7   : > { %v2274_v27 = vsel %vm2273_vm3, %v2269_v34, -inf }
 0x7e8   : > { %2275 = vmax.xlane.f32.xlu0 %v2274_v27 }
 0x7ed   : > { %v2287_v2 = vpop.xlane.xlu0 %2286 }
 0x7ee   : > { %vm2288_vm4 = vcmp.eq.f32.partialorder %v2285_v35, %v2287_v2  ;;  %v2293_v30 = vcvt.f32.s32 %v2287_v2  ;;  %v3350_v2 = vld [vmem:[%s4461_s6 + $0x28] sm:$0xff] }
 0x7ef   : > { %v2289_v17 = vsel %vm2288_vm4, %v2284_v38, -inf }
 0x7f0   : > { %2290 = vmax.xlane.f32.xlu1 %v2289_v17 }
 0x7f4   : > { %v2205_v41 = vpop.f32.mrf.mxu0  ;;  %v2224_v47 = vpop.f32.mrf.mxu1 }
 0x7f5   : > { %v2206_v8 = vadd.f32 %v2205_v41, %v3780_v45  ;;  %v2225_v26 = vadd.f32 %v2224_v47, %v3791_v56 }
 0x7f7   : > { %vm2234_vm5 = vcmp.ge.f32.partialorder %v2206_v8, 0.0  ;;  %v2242_v34 = vmul.f32 0.2, %v2206_v8  ;;  %vm2235_vm6 = vcmp.ge.f32.partialorder %v2225_v26, 0.0  ;;  %v2243_v5 = vmul.f32 0.2, %v2225_v26  ;;  %v4271_v27 = vpop.xlane.xlu1 %2301 }
 0x7f8   : > { %vm2303_vm7 = vcmp.eq.f32.partialorder %v2300_v57, %v4271_v27 }
 0x7f9   : > { %v2250_v24 = vsel %vm2234_vm5, %v2206_v8, %v2242_v34  ;;  %v2251_v35 = vsel %vm2235_vm6, %v2225_v26, %v2243_v5  ;;  %v2304_v38 = vsel %vm2303_vm7, %v2299_v21, -inf  ;;  %v2314_v21 = vcvt.s32.f32 %v2312_v59  ;;  %v3352_v59 = vld [vmem:[%s4461_s6 + $0x38] sm:$0xff] }
 0x7fa   : > { %v4277_v9 = vmax.f32 %v2108_v53, %v2250_v24  ;;  %v4282_v17 = vmax.f32 %v2109_v31, %v2251_v35  ;;  %2305 = vmax.xlane.f32.xlu2 %v2304_v38  ;;  %2568 = vmatpush.bf16.msrb.mxu0 %v3352_v59 }
 0x7fc   : > { %v4284_v41 = vpop.f32.mrf.mxu0  ;;  %v2226_v47 = vpop.f32.mrf.mxu1 }
 0x7fd   : > { %v2227_v57 = vadd.f32 %v2226_v47, %v3793_v33  ;;  %v2317_v26 = vpop.xlane.xlu2 %2316  ;;  %v3360_v47 = vld [vmem:[%s4461_s6 + $0x78] sm:$0xff] }
 0x7fe   : > { %vm2318_vm9 = vcmp.eq.f32.partialorder %v2315_v6, %v2317_v26  ;;  %2587 = vmatpush.bf16.msrb.mxu1 %v3360_v47  ;;  %2569 = vmatpush.bf16.msrb.mxu0 %v3351_v37  ;;  %v3355_v47 = vld [vmem:[%s4461_s6 + $0x50] sm:$0xff]  ;;  %v3345_v37 = vld [vmem:[%s4461_s6] sm:$0xff] }
 0x7ff   : > { %vm2237_vm8 = vcmp.ge.f32.partialorder %v2227_v57, 0.0  ;;  %v2245_v8 = vmul.f32 0.2, %v2227_v57  ;;  %v2319_v48 = vsel %vm2318_vm9, %v2314_v21, -inf }
 0x800   : > { %2320 = vmax.xlane.f32.xlu0 %v2319_v48 }
 0x801   : > { %v2253_v10 = vsel %vm2237_vm8, %v2227_v57, %v2245_v8  ;;  %v3358_v8 = vld [vmem:[%s4461_s6 + $0x68] sm:$0xff] }
 0x802   : > { %v4290_v29 = vmax.f32 %v2111_v49, %v2253_v10  ;;  %v2278_v49 = vcvt.f32.s32 %v2272_v19  ;;  %2588 = vmatpush.bf16.msrb.mxu1 %v3359_v52  ;;  %2570 = vmatpush.bf16.msrb.mxu0 %v3350_v2  ;;  %v3353_v52 = vld [vmem:[%s4461_s6 + $0x40] sm:$0xff]  ;;  %v1482_v2 = vadd.f32 %v4057_v12, %v3798_v22 }
 0x804   : > { %v2210_v18 = vpop.f32.mrf.mxu0  ;;  %v2229_v53 = vpop.f32.mrf.mxu1  ;;  %v2279_v57 = vshll.u32 %v2278_v49, 16  ;;  %vm1491_vm4 = vcmp.ge.f32.partialorder %v1482_v2, 0.0 }
 0x805   : > { %v2211_v31 = vadd.f32 %v2210_v18, %v3787_v36  ;;  %v2230_v58 = vadd.f32 %v2229_v53, %v3795_v46 }
 0x806   : > { %2589 = vmatpush.bf16.msrb.mxu1 %v3358_v8  ;;  %v4375_v8 = vpop.f32.mrf.mxu2 }
 0x807   : > { %vm2238_vm10 = vcmp.ge.f32.partialorder %v2211_v31, 0.0  ;;  %v2246_v34 = vmul.f32 0.2, %v2211_v31  ;;  %vm2239_vm11 = vcmp.ge.f32.partialorder %v2230_v58, 0.0  ;;  %v2247_v5 = vmul.f32 0.2, %v2230_v58 }
 0x809   : > { %v2254_v24 = vsel %vm2238_vm10, %v2211_v31, %v2246_v34  ;;  %v2255_v6 = vsel %vm2239_vm11, %v2230_v58, %v2247_v5  ;;  %v2308_v31 = vcvt.f32.s32 %v4271_v27  ;;  %v3349_v27 = vld [vmem:[%s4461_s6 + $0x20] sm:$0xff] }
 0x80a   : > { %v4297_v35 = vmax.f32 %v2112_v23, %v2254_v24  ;;  %v4302_v55 = vmax.f32 %v2113_v32, %v2255_v6  ;;  %v2294_v32 = vshll.u32 %v2293_v30, 16  ;;  %2571 = vmatpush.bf16.msrb.mxu0 %v3349_v27  ;;  %v3354_v30 = vld [vmem:[%s4461_s6 + $0x48] sm:$0xff]  ;;  %v1763_v27 = vadd.f32 %v4194_v54, %v3789_v51 }
 0x80b   : > { %v2309_v34 = vshll.u32 %v2308_v31, 16 }
 0x85b   : > { %v2276_v4 = vpop.xlane.xlu0 %2275 }
 0x85c   : > { %v2277_v38 = vcvt.f32.s32 %v2276_v4 }
 0x85e   : > { %v2280_v16 = vadd.s32 %v2279_v57, %v2277_v38  ;;  %v3346_v57 = vld [vmem:[%s4461_s6 + $0x8] sm:$0xff] }
 0x860   : > { %vm2326_vm12 = vcmp.eq.s32.totalorder %v4233_v43, %v2280_v16  ;;  %v2323_v43 = vcvt.f32.s32 %v2317_v26  ;;  %v3347_v26 = vld [vmem:[%s4461_s6 + $0x10] sm:$0xff]  ;;  %v1608_v16 = vadd.f32 %v3994_v63, %v3876_v3  ;;  %v1758_v63 = vadd.f32 %v4075_v25, %v3876_v3 }
 0x861   : > { %v2330_v10 = vsel %vm2326_vm12, 1.0, %v3476_v11 }
 0x862   : > { %vm1636_vm0 = vcmp.ge.f32.partialorder %v1608_v16, 0.0  ;;  %v1794_v31 = vmul.f32 0.2, %v1758_v63  ;;  %vm1786_vm5 = vcmp.ge.f32.partialorder %v1758_v63, 0.0 }
 0x863   : > { %v2291_v23 = vpop.xlane.xlu1 %2290 }
 0x864   : > { %v2292_v19 = vcvt.f32.s32 %v2291_v23  ;;  %v1321_v23 = vadd.f32 %v3867_v14, %v3789_v51 }
 0x866   : > { %v2295_v21 = vadd.s32 %v2294_v32, %v2292_v19  ;;  %v1340_v32 = vadd.f32 %v3869_v44, %v3798_v22  ;;  %v1463_v19 = vadd.f32 %v4055_v28, %v3789_v51  ;;  %v1356_v14 = vmul.f32 0.2, %v1321_v23 }
 0x867   : > { %v1499_v44 = vmul.f32 0.2, %v1482_v2  ;;  %v1613_v28 = vadd.f32 %v4126_v7, %v3789_v51 }
 0x868   : > { %vm2327_vm13 = vcmp.eq.s32.totalorder %v4241_v61, %v2295_v21  ;;  %v2324_v61 = vshll.u32 %v2323_v43, 16  ;;  %v4377_v21 = vpop.f32.mrf.mxu3  ;;  %vm1349_vm2 = vcmp.ge.f32.partialorder %v1340_v32, 0.0  ;;  %vm1490_vm3 = vcmp.ge.f32.partialorder %v1463_v19, 0.0 }
 0x869   : > { %v2331_v48 = vsel %vm2327_vm13, 1.0, %v3476_v11  ;;  %vm1640_vm9 = vcmp.ge.f32.partialorder %v1613_v28, 0.0  ;;  %vm1790_vm13 = vcmp.ge.f32.partialorder %v1763_v27, 0.0 }
 0x86a   : > { %v2334_v18 = vpack.c.bf16 %v2331_v48, %v2330_v10  ;;  %v1644_v10 = vmul.f32 0.2, %v1608_v16  ;;  %v1357_v48 = vmul.f32 0.2, %v1340_v32 }
 0x86c   : > { %3186 = vmatmul.msk.bf16.vlgmr.msrb.gmra.mxu2 %vm1203_vm1, %v2334_v18  ;;  %3188 = vmatmul.msk.bf16.vlgmr.msrb.gmra.mxu3 %vm1203_vm1, %v2334_v18  ;;  %v1498_v18 = vmul.f32 0.2, %v1463_v19  ;;  %v1652_v12 = vsel %vm1636_vm0, %v1608_v16, %v1644_v10  ;;  %v4387_v25 = vsel %vm1349_vm2, %v1340_v32, %v1357_v48 }
 0x86d   : > { %v2306_v53 = vpop.xlane.xlu2 %2305  ;;  %v1660_v7 = vmax.f32 %v1510_v13, %v1652_v12 }
 0x86e   : > { %v2307_v58 = vcvt.f32.s32 %v2306_v53  ;;  %v1908_v53 = vadd.f32 %v4142_v39, %v3876_v3  ;;  %v1506_v43 = vsel %vm1490_vm3, %v1463_v19, %v1498_v18 }
 0x870   : > { %v2310_v5 = vadd.s32 %v2309_v34, %v2307_v58  ;;  %v2058_v58 = vadd.f32 %v4214_v42, %v3876_v3  ;;  %v2208_v42 = vadd.f32 %v4284_v41, %v3876_v3  ;;  %vm1936_vm6 = vcmp.ge.f32.partialorder %v1908_v53, 0.0 }
 0x871   : > { %v1782_v41 = vadd.f32 %v4196_v1, %v3798_v22  ;;  %v1798_v1 = vmul.f32 0.2, %v1763_v27 }
 0x872   : > { %vm2328_vm14 = vcmp.eq.s32.totalorder %v4251_v15, %v2310_v5  ;;  %v3357_v15 = vld [vmem:[%s4461_s6 + $0x60] sm:$0xff]  ;;  %v4389_v5 = vsel %vm1491_vm4, %v1482_v2, %v1499_v44  ;;  %v2094_v0 = vmul.f32 0.2, %v2058_v58  ;;  %vm2086_vm10 = vcmp.ge.f32.partialorder %v2058_v58, 0.0 }
 0x873   : > { %v2321_v24 = vpop.xlane.xlu0 %2320  ;;  %v2332_v49 = vsel %vm2328_vm14, 1.0, %v3476_v11  ;;  %2590 = vmatpush.bf16.msrb.mxu1 %v3357_v15  ;;  %v2244_v15 = vmul.f32 0.2, %v2208_v42  ;;  %vm2236_vm11 = vcmp.ge.f32.partialorder %v2208_v42, 0.0  ;;  %vm1791_vm14 = vcmp.ge.f32.partialorder %v1782_v41, 0.0 }
 0x874   : > { %v2322_v6 = vcvt.f32.s32 %v2321_v24  ;;  %v1648_v24 = vmul.f32 0.2, %v1613_v28  ;;  %v1515_v2 = vmax.f32 %v4387_v25, %v4389_v5  ;;  %v1806_v44 = vsel %vm1790_vm13, %v1763_v27, %v1798_v1 }
 0x876   : > { %v2325_v4 = vadd.s32 %v2324_v61, %v2322_v6  ;;  %v1632_v61 = vadd.f32 %v4128_v20, %v3798_v22 }
 0x878   : > { %vm2329_vm15 = vcmp.eq.s32.totalorder %v4259_v40, %v2325_v4  ;;  %v3348_v40 = vld [vmem:[%s4461_s6 + $0x18] sm:$0xff]  ;;  %v1944_v4 = vmul.f32 0.2, %v1908_v53  ;;  %v1649_v20 = vmul.f32 0.2, %v1632_v61  ;;  %vm1641_vm12 = vcmp.ge.f32.partialorder %v1632_v61, 0.0 }
 0x879   : > { %v2333_v38 = vsel %vm2329_vm15, 1.0, %v3476_v11  ;;  %v3356_v11 = vld [vmem:[%s4461_s6 + $0x58] sm:$0xff]  ;;  %2572 = vmatpush.bf16.msrb.mxu0 %v3348_v40 }
 0x87a   : > { %v2335_v59 = vpack.c.bf16 %v2333_v38, %v2332_v49  ;;  %2591 = vmatpush.bf16.msrb.mxu1 %v3356_v11  ;;  %v1657_v10 = vsel %vm1641_vm12, %v1632_v61, %v1649_v20  ;;  %v2212_v61 = vpop.f32.mrf.mxu0 }
 0x87b   : > { %v2213_v27 = vadd.f32 %v2212_v61, %v3789_v51 }
 0x87c   : > { %3187 = vmatmul.msk.bf16.gmra.mxu2 %vm1203_vm1, %v2335_v59  ;;  %3189 = vmatmul.msk.bf16.gmra.mxu3 %vm1203_vm1, %v2335_v59  ;;  %vm1348_vm1 = vcmp.ge.f32.partialorder %v1321_v23, 0.0  ;;  %v1802_v59 = vsel %vm1786_vm5, %v1758_v63, %v1794_v31 }
 0x87d   : > { %2573 = vmatpush.bf16.msrb.mxu0 %v3347_v26  ;;  %v1364_v34 = vsel %vm1348_vm1, %v1321_v23, %v1356_v14  ;;  %v1810_v11 = vmax.f32 %v1660_v7, %v1802_v59  ;;  %v2063_v7 = vadd.f32 %v4375_v8, %v3789_v51 }
 0x87e   : > { %2592 = vmatpush.bf16.msrb.mxu1 %v3355_v47  ;;  %v1656_v47 = vsel %vm1640_vm9, %v1613_v28, %v1648_v24  ;;  %v1514_v19 = vmax.f32 %v1364_v34, %v1506_v43  ;;  %v2082_v24 = vadd.f32 %v4377_v21, %v3798_v22 }
 0x87f   : > { %vm2090_vm5 = vcmp.ge.f32.partialorder %v2063_v7, 0.0 }
 0x880   : > { %v1664_v18 = vmax.f32 %v1514_v19, %v1656_v47 }
 0x881   : > { %2574 = vmatpush.bf16.msrb.mxu0 %v3346_v57  ;;  %v2102_v57 = vsel %vm2086_vm10, %v2058_v58, %v2094_v0  ;;  %v1665_v58 = vmax.f32 %v1515_v2, %v1657_v10 }
 0x882   : > { %2593 = vmatpush.bf16.msrb.mxu1 %v3354_v30  ;;  %v1799_v30 = vmul.f32 0.2, %v1782_v41  ;;  %v1814_v43 = vmax.f32 %v1664_v18, %v1806_v44 }
 0x884   : > { %v1807_v28 = vsel %vm1791_vm14, %v1782_v41, %v1799_v30 }
 0x885   : > { %2575 = vmatpush.bf16.msrb.mxu0 %v3345_v37  ;;  %v1815_v5 = vmax.f32 %v1665_v58, %v1807_v28 }
 0x886   : > { %2594 = vmatpush.bf16.msrb.mxu1 %v3353_v52 }
 0x8ef   : > { %v2351_v39 = vpop.f32.mrf.mxu2  ;;  %v2370_v6 = vpop.f32.mrf.mxu3 }
 0x8f0   : > { %v2352_v49 = vadd.f32 %v2351_v39, %v3780_v45  ;;  %v2371_v38 = vadd.f32 %v2370_v6, %v3791_v56  ;;  %v1952_v45 = vsel %vm1936_vm6, %v1908_v53, %v1944_v4  ;;  %vm2091_vm6 = vcmp.ge.f32.partialorder %v2082_v24, 0.0 }
 0x8f1   : > { %v1960_v37 = vmax.f32 %v1810_v11, %v1952_v45  ;;  %v2248_v11 = vmul.f32 0.2, %v2213_v27 }
 0x8f2   : > { %vm2380_vm7 = vcmp.ge.f32.partialorder %v2352_v49, 0.0  ;;  %v2388_v62 = vmul.f32 0.2, %v2352_v49  ;;  %vm2381_vm8 = vcmp.ge.f32.partialorder %v2371_v38, 0.0  ;;  %v2389_v13 = vmul.f32 0.2, %v2371_v38 }
 0x8f3   : > { %v2110_v63 = vmax.f32 %v1960_v37, %v2102_v57 }
 0x8f4   : > { %v2396_v56 = vsel %vm2380_vm7, %v2352_v49, %v2388_v62  ;;  %v2397_v40 = vsel %vm2381_vm8, %v2371_v38, %v2389_v13  ;;  %v2098_v62 = vmul.f32 0.2, %v2063_v7  ;;  %v2099_v13 = vmul.f32 0.2, %v2082_v24 }
 0x8f5   : > { %v2404_v54 = vmax.f32 %v4277_v9, %v2396_v56  ;;  %v2405_v26 = vmax.f32 %v4282_v17, %v2397_v40  ;;  %v2252_v9 = vsel %vm2236_vm11, %v2208_v42, %v2244_v15  ;;  %vm2240_vm7 = vcmp.ge.f32.partialorder %v2213_v27, 0.0 }
 0x8f6   : > { %v2260_v12 = vmax.f32 %v2110_v63, %v2252_v9  ;;  %v2106_v57 = vsel %vm2090_vm5, %v2063_v7, %v2098_v62  ;;  %v2107_v1 = vsel %vm2091_vm6, %v2082_v24, %v2099_v13  ;;  %v2256_v9 = vsel %vm2240_vm7, %v2213_v27, %v2248_v11 }
 0x8f7   : > { %v2412_v52 = vpack.c.bf16 %v2405_v26, %v2404_v54  ;;  %v2353_v16 = vpop.f32.mrf.mxu2  ;;  %v2372_v23 = vpop.f32.mrf.mxu3 }
 0x8f8   : > { %v2354_v17 = vadd.f32 %v2353_v16, %v3876_v3  ;;  %v2373_v32 = vadd.f32 %v2372_v23, %v3793_v33  ;;  %v1913_v33 = vadd.f32 %v4265_v60, %v3789_v51  ;;  %v1932_v3 = vadd.f32 %v4267_v50, %v3798_v22  ;;  %v2231_v60 = vpop.f32.mrf.mxu1 }
 0x8f9   : > { %2416 = vst [vmem:[%s4411_s15] sm:$0xff] %v2412_v52  ;;  %v2456_v4 = vunpack.c.l.b16 %v2412_v52  ;;  %v2457_v42 = vunpack.c.h.b16 %v2412_v52  ;;  %v2232_v8 = vadd.f32 %v2231_v60, %v3798_v22 }
 0x8fa   : > { %vm2382_vm15 = vcmp.ge.f32.partialorder %v2354_v17, 0.0  ;;  %v2390_v14 = vmul.f32 0.2, %v2354_v17  ;;  %vm2383_vm1 = vcmp.ge.f32.partialorder %v2373_v32, 0.0  ;;  %v2391_v48 = vmul.f32 0.2, %v2373_v32 }
 0x8fb   : > { %vm1940_vm0 = vcmp.ge.f32.partialorder %v1913_v33, 0.0  ;;  %v1948_v50 = vmul.f32 0.2, %v1913_v33  ;;  %vm1941_vm2 = vcmp.ge.f32.partialorder %v1932_v3, 0.0  ;;  %v1949_v6 = vmul.f32 0.2, %v1932_v3 }
 0x8fc   : > { %v2398_v53 = vsel %vm2382_vm15, %v2354_v17, %v2390_v14  ;;  %v2399_v31 = vsel %vm2383_vm1, %v2373_v32, %v2391_v48  ;;  %vm2241_vm8 = vcmp.ge.f32.partialorder %v2232_v8, 0.0 }
 0x8fd   : > { %v2406_v34 = vmax.f32 %v2260_v12, %v2398_v53  ;;  %v2407_v25 = vmax.f32 %v4290_v29, %v2399_v31  ;;  %v1956_v56 = vsel %vm1940_vm0, %v1913_v33, %v1948_v50  ;;  %v1957_v40 = vsel %vm1941_vm2, %v1932_v3, %v1949_v6 }
 0x8fe   : > { %v1964_v30 = vmax.f32 %v1814_v43, %v1956_v56  ;;  %v1965_v37 = vmax.f32 %v1815_v5, %v1957_v40 }
 0x8ff   : > { %v2413_v39 = vpack.c.bf16 %v2407_v25, %v2406_v34  ;;  %v2356_v38 = vpop.f32.mrf.mxu2  ;;  %v2375_v59 = vpop.f32.mrf.mxu3 }
 0x900   : > { %v2357_v21 = vadd.f32 %v2356_v38, %v3787_v36  ;;  %v2376_v0 = vadd.f32 %v2375_v59, %v3795_v46  ;;  %v2249_v36 = vmul.f32 0.2, %v2232_v8  ;;  %v2114_v2 = vmax.f32 %v1964_v30, %v2106_v57 }
 0x901   : > { %2417 = vst [vmem:[%s4411_s15 + $0x8] sm:$0xff] %v2413_v39  ;;  %v2458_v49 = vunpack.c.l.b16 %v2413_v39  ;;  %v2459_v29 = vunpack.c.h.b16 %v2413_v39  ;;  %v2115_v10 = vmax.f32 %v1965_v37, %v2107_v1 }
 0x902   : > { %vm2384_vm3 = vcmp.ge.f32.partialorder %v2357_v21, 0.0  ;;  %v2392_v45 = vmul.f32 0.2, %v2357_v21  ;;  %vm2385_vm4 = vcmp.ge.f32.partialorder %v2376_v0, 0.0  ;;  %v2393_v15 = vmul.f32 0.2, %v2376_v0 }
 0x903   : > { %v2464_v20 = vpack.c.b16 %v2458_v49, %v2456_v4  ;;  %v2465_v41 = vpack.c.b16 %v2459_v29, %v2457_v42  ;;  %v2257_v17 = vsel %vm2241_vm8, %v2232_v8, %v2249_v36  ;;  %v2264_v63 = vmax.f32 %v2114_v2, %v2256_v9 }
 0x904   : > { %v2400_v54 = vsel %vm2384_vm3, %v2357_v21, %v2392_v45  ;;  %v2401_v46 = vsel %vm2385_vm4, %v2376_v0, %v2393_v15  ;;  %v2265_v14 = vmax.f32 %v2115_v10, %v2257_v17 }
 0x905   : > { %2576 = vmatmul.bf16.vlgmr.msrb.gmra.mxu0 %v2464_v20  ;;  %2595 = vmatmul.bf16.vlgmr.msrb.gmra.mxu1 %v2465_v41  ;;  %v2408_v26 = vmax.f32 %v4297_v35, %v2400_v54  ;;  %v2409_v47 = vmax.f32 %v4302_v55, %v2401_v46 }
 0x907   : > { %v2414_v52 = vpack.c.bf16 %v2409_v47, %v2408_v26  ;;  %v2358_v16 = vpop.f32.mrf.mxu2  ;;  %v2377_v23 = vpop.f32.mrf.mxu3 }
 0x908   : > { %v2359_v32 = vadd.f32 %v2358_v16, %v3789_v51  ;;  %v2378_v19 = vadd.f32 %v2377_v23, %v3798_v22 }
 0x909   : > { %2418 = vst [vmem:[%s4411_s15 + $0x10] sm:$0xff] %v2414_v52  ;;  %v2460_v51 = vunpack.c.l.b16 %v2414_v52  ;;  %v2461_v3 = vunpack.c.h.b16 %v2414_v52 }
 0x90a   : > { %vm2386_vm9 = vcmp.ge.f32.partialorder %v2359_v32, 0.0  ;;  %v2394_v35 = vmul.f32 0.2, %v2359_v32  ;;  %vm2387_vm10 = vcmp.ge.f32.partialorder %v2378_v19, 0.0  ;;  %v2395_v55 = vmul.f32 0.2, %v2378_v19 }
 0x90c   : > { %v2402_v48 = vsel %vm2386_vm9, %v2359_v32, %v2394_v35  ;;  %v2403_v18 = vsel %vm2387_vm10, %v2378_v19, %v2395_v55 }
 0x90d   : > { %v2410_v44 = vmax.f32 %v2264_v63, %v2402_v48  ;;  %v2411_v28 = vmax.f32 %v2265_v14, %v2403_v18 }
 0x90f   : > { %v2415_v12 = vpack.c.bf16 %v2411_v28, %v2410_v44 }
 0x911   : > { %2419 = vst [vmem:[%s4411_s15 + $0x18] sm:$0xff] %v2415_v12  ;;  %v2462_v33 = vunpack.c.l.b16 %v2415_v12  ;;  %v2463_v22 = vunpack.c.h.b16 %v2415_v12 }
 0x913   : > { %v2466_v53 = vpack.c.b16 %v2462_v33, %v2460_v51  ;;  %v2467_v31 = vpack.c.b16 %v2463_v22, %v2461_v3 }
 0x915   : > { %2581 = vmatmul.bf16.gmra.mxu0 %v2466_v53  ;;  %2600 = vmatmul.bf16.gmra.mxu1 %v2467_v31 }
 0x982   : > { %v2577_v58 = vpop.f32.mrf.mxu0  ;;  %v2596_v34 = vpop.f32.mrf.mxu1 }
 0x983   : > { %v2597_v5 = vadd.f32 %v2596_v34, %v2577_v58 }
 0x98a   : > { %v2579_v25 = vpop.f32.mrf.mxu0  ;;  %v2598_v43 = vpop.f32.mrf.mxu1 }
 0x98b   : > { %v2599_v7 = vadd.f32 %v2598_v43, %v2579_v25 }
 0x98d   : > { %v3364_v24 = vpack.c.bf16 %v2599_v7, %v2597_v5 }
 0x98f   : > { %3365 = vst [vmem:[%s443_s18] sm:$0xff] %v3364_v24  }
 0x992   : > { %v2582_v61 = vpop.f32.mrf.mxu0  ;;  %v2601_v60 = vpop.f32.mrf.mxu1 }
 0x993   : > { %v2602_v6 = vadd.f32 %v2601_v60, %v2582_v61 }
 0x99a   : > { %v2584_v39 = vpop.f32.mrf.mxu0  ;;  %v2603_v50 = vpop.f32.mrf.mxu1 }
 0x99b   : > { %v2604_v4 = vadd.f32 %v2603_v50, %v2584_v39 }
 0x99d   : > { %v3369_v42 = vpack.c.bf16 %v2604_v4, %v2602_v6 }
 0x99f   : > { %3371 = vst [vmem:[%s443_s18 + $0x8] sm:$0xff] %v3369_v42  }
 0x9a0 PF: > { %s20_s29 = sadd.s32 1, %s3471_s29   ;;  %s4464_s27 = smov %s3467_s28 }
 0x9a1   : > { %p17_p8 = scmp.ge.s32.totalorder %s20_s29, 4   ;;  %s4465_s28 = smov %s4467_s9 }
 0x9a3   :  { %19 = sbr.rel (!%p17_p8) target bundleno = 2 (0x2), region = 104 }
 0x9a8   :  { %2671 = vsyncpa [#allocation3], 1 }
 0x9a9   :  { %2673 = vsyncpa [#allocation3 + $0x1], 1 }

// kernel: _lambda_.5
= control target key start
LH: loop header
LB: loop body
LE: loop exit
PB: predicated region body
PF: predicated region fallthrough
CT: control target
= control target key end

     0   :  { %s1989_s21 = smov 0   ;;  %s1991_s22 = smov 0   ;;  %s2469_s0 = inlined_call_operand.vmem [shape: bf16[2,32,256], index: 0, kind: input, shape index: {}, may-alias: {0,1}]   ;;  %s2470_s1 = inlined_call_operand.vmem [shape: bf16[2,32,256], index: 1, kind: input, shape index: {}, may-alias: {0,1}]   ;;  %s2471_s2 = inlined_call_operand.vmem [shape: f32[2,1,32], index: 2, kind: input, shape index: {}]   ;;  %s2472_s3 = inlined_call_operand.vmem [shape: bf16[2,32,128], index: 3, kind: input, shape index: {}]   ;;  %s2473_s4 = inlined_call_operand.vmem [shape: bf16[256,128], index: 4, kind: input, shape index: {}]   ;;  %s2474_s5 = inlined_call_operand.vmem [shape: f32[1,128], index: 5, kind: input, shape index: {}]   ;;  %s2475_s6 = inlined_call_operand.vmem [shape: f32[2,128,32], index: 6, kind: output, shape index: {}]  }
   0x1   :  { %s1993_s23 = smov 0  }
   0x2 LB: > { %s28_s24 = sadd.s32 1, %s1947_s22  ;;  %p1741_p0 = scmp.ge.s32.totalorder %s1951_s23, 1  ;;  %s1951_s23 = sphi %s1993_s23, %s16_s23   ;;  %s1947_s22 = sphi %s1991_s22, %s2477_s22   ;;  %s1943_s21 = sphi %s1989_s21, %s2476_s21  }
   0x3   : > { %p30_p1 = scmp.ge.s32.totalorder %s28_s24, 2  ;;  %p262_p2 = scmp.lt.s32.totalorder %s1951_s23, 3 }
   0x5   : > { %s2479_s24 = smov (%p30_p1, %s28_s24), 0  ;;  %p263_p3 = pnand %p1741_p0, %p262_p2 }
   0x6   : > { %p314_p4 = scmp.lt.s32.totalorder (!%p263_p3), %s1943_s21, 1 }
   0x7   : > { %266 = sbr.rel (%p263_p3) target bundleno = 2568 (0xa08), region = 44 }
   0xc   : > { %s2481_s21 = smov (!%p314_p4, %s1943_s21), 1  ;;  %v497_v26 = vlaneseq  ;;  %vm645_vm1 = vcmask 261120  }
   0xd   : > { %s1872_s25 = sshll.u32 %s2481_s21, 5  ;;  %s331_s10 = scalar_lea.vmem %s2471_s2, %s2481_s21 }
   0xe   : > { %s328_s28 = scalar_lea.vmem %s2470_s1, %s1872_s25  ;;  %s322_s7 = scalar_lea.vmem %s2469_s0, %s1872_s25  ;;  %v1927_v28 = vld [vmem:[%s331_s10] ss:$0 sm:$0xff]  ;;  %v498_v30 = vand.u32 127, %v497_v26 }
   0xf   : > { %v1776_v0 = vld [vmem:[%s328_s28 + $0x10] sm:$0xf]  ;;  %v1883_v1 = vld [vmem:[%s328_s28 + $0x14] sm:$0xf0]  ;;  %v1882_v3 = vld [vmem:[%s328_s28 + $0x14] sm:$0xf] }
  0x10   : > { %v1777_v2 = vor.u32 %v1883_v1, %v1776_v0  ;;  %v1778_v4 = vld [vmem:[%s328_s28 + $0x18] sm:$0xf0]  ;;  %v1768_v6 = vld [vmem:[%s328_s28] sm:$0xf]  ;;  %v1881_v7 = vld [vmem:[%s328_s28 + $0x4] sm:$0xf0] }
  0x11   : > { %v1781_v5 = vor.u32 %v1882_v3, %v1778_v4  ;;  %v1880_v8 = vld [vmem:[%s328_s28 + $0x4] sm:$0xf]  ;;  %v1770_v9 = vld [vmem:[%s328_s28 + $0x8] sm:$0xf0]  ;;  %v1769_v10 = vor.u32 %v1881_v7, %v1768_v6  ;;  %v1752_v12 = vld [vmem:[%s322_s7] sm:$0xf] }
  0x12   : > { %438 = vmatpush.bf16.xpose.msra.mxu0 %v1777_v2  ;;  %v1773_v11 = vor.u32 %v1880_v8, %v1770_v9  ;;  %v1877_v13 = vld [vmem:[%s322_s7 + $0x4] sm:$0xf0]  ;;  %v1876_v14 = vld [vmem:[%s322_s7 + $0x4] sm:$0xf]  ;;  %v1754_v15 = vld [vmem:[%s322_s7 + $0x8] sm:$0xf0] }
  0x13   : > { %457 = vmatpush.bf16.xpose.msra.mxu1 %v1781_v5  ;;  %v2016_v16 = vor.u32 %v1877_v13, %v1752_v12  ;;  %v2018_v17 = vor.u32 %v1876_v14, %v1754_v15  ;;  %v1760_v18 = vld [vmem:[%s322_s7 + $0x10] sm:$0xf]  ;;  %v1879_v19 = vld [vmem:[%s322_s7 + $0x14] sm:$0xf0]  ;;  %v1878_v20 = vld [vmem:[%s322_s7 + $0x14] sm:$0xf] }
  0x14   : > { %v1762_v21 = vld [vmem:[%s322_s7 + $0x18] sm:$0xf0]  ;;  %v2026_v22 = vor.u32 %v1879_v19, %v1760_v18  ;;  %v503_v35 = vsub.s32 31, %v498_v30  ;;  %v1892_v15 = vld [vmem:[%s2473_s4 + $0x30] sm:$0xff]  ;;  %s1874_s19 = sshll.u32 %s2481_s21, 4  ;;  %s1875_s9 = sshll.u32 %s2481_s21, 7 }
  0x15   : > { %v2028_v23 = vor.u32 %v1878_v20, %v1762_v21  ;;  %v1893_v12 = vld [vmem:[%s2473_s4 + $0x38] sm:$0xff]  ;;  %v1900_v18 = vld [vmem:[%s2473_s4 + $0x70] sm:$0xff]  ;;  %v1891_v21 = vld [vmem:[%s2473_s4 + $0x28] sm:$0xff]  ;;  %s336_s30 = scalar_lea.vmem %s2472_s3, %s1874_s19  ;;  %s2426_s12 = scalar_lea.vmem %s2475_s6, %s1875_s9 }
  0x16   : > { %v1901_v13 = vld [vmem:[%s2473_s4 + $0x78] sm:$0xff]  ;;  %607 = vmatpush.bf16.msra.mxu2 %v1893_v12 }
  0x17   : > { %626 = vmatpush.bf16.msra.mxu3 %v1901_v13 }
  0x1a   : > { %439 = vmatpush.bf16.xpose.msra.mxu0 %v1769_v10  ;;  %608 = vmatpush.bf16.msra.mxu2 %v1892_v15 }
  0x1b   : > { %458 = vmatpush.bf16.xpose.msra.mxu1 %v1773_v11  ;;  %627 = vmatpush.bf16.msra.mxu3 %v1900_v18 }
  0x1e   : > { %609 = vmatpush.bf16.msra.mxu2 %v1891_v21 }
  0x21   : > { %440 = vmatmul.bf16.vlgmr.msra.gmra.mxu0 %v2016_v16 }
  0x22   : > { %459 = vmatmul.bf16.vlgmr.msra.gmra.mxu1 %v2018_v17 }
  0x31   : > { %445 = vmatmul.bf16.gmra.mxu0 %v2026_v22 }
  0x32   : > { %464 = vmatmul.bf16.gmra.mxu1 %v2028_v23 }
  0x9e   : > { %v441_v24 = vpop.f32.mrf.mxu0 }
  0x9f   : > { %v460_v25 = vpop.f32.mrf.mxu1 }
  0xa0   : > { %v461_v27 = vadd.f32 %v460_v25, %v441_v24  ;;  %v1899_v24 = vld [vmem:[%s2473_s4 + $0x68] sm:$0xff] }
  0xa1   : > { %628 = vmatpush.bf16.msra.mxu3 %v1899_v24 }
  0xa2   : > { %v470_v29 = vmul.f32 2.0, %v461_v27  ;;  %v1890_v27 = vld [vmem:[%s2473_s4 + $0x20] sm:$0xff] }
  0xa3   : > { %610 = vmatpush.bf16.msra.mxu2 %v1890_v27 }
  0xa4   : > { %v477_v31 = vsub.f32 %v470_v29, %v1927_v28 }
  0xa6   : > { %vm485_vm0 = vcmp.lt.s32.totalorder %v477_v31, 0  ;;  %v489_v32 = vxor.u32 2147483647, %v477_v31  ;;  %v443_v33 = vpop.f32.mrf.mxu0 }
  0xa7   : > { %v462_v34 = vpop.f32.mrf.mxu1 }
  0xa8   : > { %v493_v36 = vsel %vm485_vm0, %v489_v32, %v477_v31  ;;  %v463_v37 = vadd.f32 %v462_v34, %v443_v33  ;;  %v1889_v31 = vld [vmem:[%s2473_s4 + $0x18] sm:$0xff] }
  0xa9   : > { %v499_v38 = vand.u32 4294967264, %v493_v36  ;;  %v1897_v32 = vld [vmem:[%s2473_s4 + $0x58] sm:$0xff]  ;;  %611 = vmatpush.bf16.msra.mxu2 %v1889_v31  ;;  %v1896_v36 = vld [vmem:[%s2473_s4 + $0x50] sm:$0xff] }
  0xaa   : > { %v471_v39 = vmul.f32 2.0, %v463_v37 }
  0xab   : > { %v2032_v40 = vor.u32 %v503_v35, %v499_v38 }
  0xac   : > { %v478_v41 = vsub.f32 %v471_v39, %v1927_v28  ;;  %v1887_v39 = vld [vmem:[%s2473_s4 + $0x8] sm:$0xff] }
  0xad   : > { %v646_v42 = vsel %vm645_vm1, %v2032_v40, 2147483648 }
  0xae   : > { %vm486_vm2 = vcmp.lt.s32.totalorder %v478_v41, 0  ;;  %v490_v43 = vxor.u32 2147483647, %v478_v41  ;;  %v446_v44 = vpop.f32.mrf.mxu0  ;;  %v648_v45 = vshra.s32 %v646_v42, 16  ;;  %v647_v14 = vand.u32 65535, %v646_v42 }
  0xaf   : > { %v465_v46 = vpop.f32.mrf.mxu1 }
  0xb0   : > { %v494_v47 = vsel %vm486_vm2, %v490_v43, %v478_v41  ;;  %v466_v48 = vadd.f32 %v465_v46, %v446_v44  ;;  %v650_v49 = vcvt.s32.f32 %v648_v45  ;;  %v649_v20 = vcvt.s32.f32 %v647_v14  ;;  %v1895_v46 = vld [vmem:[%s2473_s4 + $0x48] sm:$0xff] }
  0xb1   : > { %v500_v50 = vand.u32 4294967264, %v494_v47  ;;  %v1886_v47 = vld [vmem:[%s2473_s4] sm:$0xff] }
  0xb2   : > { %v472_v51 = vmul.f32 2.0, %v466_v48  ;;  %651 = vmax.xlane.f32.xlu0 %v650_v49  ;;  %v1894_v48 = vld [vmem:[%s2473_s4 + $0x40] sm:$0xff] }
  0xb3   : > { %v2036_v52 = vor.u32 %v503_v35, %v500_v50  ;;  %v1884_v50 = vld [vmem:[%s336_s30] sm:$0xff] }
  0xb4   : > { %v479_v53 = vsub.f32 %v472_v51, %v1927_v28 }
  0xb5   : > { %v661_v54 = vsel %vm645_vm1, %v2036_v52, 2147483648 }
  0xb6   : > { %vm487_vm3 = vcmp.lt.s32.totalorder %v479_v53, 0  ;;  %v491_v55 = vxor.u32 2147483647, %v479_v53  ;;  %v448_v56 = vpop.f32.mrf.mxu0  ;;  %v663_v57 = vshra.s32 %v661_v54, 16  ;;  %v662_v26 = vand.u32 65535, %v661_v54 }
  0xb7   : > { %v467_v58 = vpop.f32.mrf.mxu1 }
  0xb8   : > { %v495_v59 = vsel %vm487_vm3, %v491_v55, %v479_v53  ;;  %v468_v60 = vadd.f32 %v467_v58, %v448_v56  ;;  %v665_v61 = vcvt.s32.f32 %v663_v57  ;;  %v664_v30 = vcvt.s32.f32 %v662_v26 }
  0xb9   : > { %v501_v62 = vand.u32 4294967264, %v495_v59 }
  0xba   : > { %v473_v63 = vmul.f32 2.0, %v468_v60  ;;  %666 = vmax.xlane.f32.xlu0 %v665_v61 }
  0xbb   : > { %v2040_v0 = vor.u32 %v503_v35, %v501_v62 }
  0xbc   : > { %v480_v1 = vsub.f32 %v473_v63, %v1927_v28  ;;  %v1898_v28 = vld [vmem:[%s2473_s4 + $0x60] sm:$0xff]  ;;  %v1953_v63 = vmov 0.0  }
  0xbd   : > { %v676_v2 = vsel %vm645_vm1, %v2040_v0, 2147483648  ;;  %629 = vmatpush.bf16.msra.mxu3 %v1898_v28 }
  0xbe   : > { %vm488_vm4 = vcmp.lt.s32.totalorder %v480_v1, 0  ;;  %v492_v3 = vxor.u32 2147483647, %v480_v1  ;;  %v678_v4 = vshra.s32 %v676_v2, 16  ;;  %v677_v34 = vand.u32 65535, %v676_v2 }
  0xc0   : > { %v496_v5 = vsel %vm488_vm4, %v492_v3, %v480_v1  ;;  %v680_v6 = vcvt.s32.f32 %v678_v4  ;;  %v679_v38 = vcvt.s32.f32 %v677_v34 }
  0xc1   : > { %v502_v7 = vand.u32 4294967264, %v496_v5  ;;  %630 = vmatpush.bf16.msra.mxu3 %v1897_v32 }
  0xc2   : > { %681 = vmax.xlane.f32.xlu1 %v680_v6 }
  0xc3   : > { %v2044_v8 = vor.u32 %v503_v35, %v502_v7  ;;  %v1888_v35 = vld [vmem:[%s2473_s4 + $0x10] sm:$0xff] }
  0xc4   : > { %612 = vmatpush.bf16.msra.mxu2 %v1888_v35 }
  0xc5   : > { %v691_v9 = vsel %vm645_vm1, %v2044_v8, 2147483648  ;;  %631 = vmatpush.bf16.msra.mxu3 %v1896_v36 }
  0xc6   : > { %v693_v10 = vshra.s32 %v691_v9, 16  ;;  %v692_v42 = vand.u32 65535, %v691_v9 }
  0xc8   : > { %v695_v11 = vcvt.s32.f32 %v693_v10  ;;  %613 = vmatpush.bf16.msra.mxu2 %v1887_v39  ;;  %v694_v44 = vcvt.s32.f32 %v692_v42 }
  0xc9   : > { %632 = vmatpush.bf16.msra.mxu3 %v1895_v46 }
  0xca   : > { %696 = vmax.xlane.f32.xlu1 %v695_v11 }
  0xcc   : > { %614 = vmatpush.bf16.msra.mxu2 %v1886_v47 }
  0xcd   : > { %633 = vmatpush.bf16.msra.mxu3 %v1894_v48 }
  0xcf   : > { %615 = vmatmul.bf16.vlgmr.msra.gmra.mxu2 %v2016_v16 }
  0xd0   : > { %634 = vmatmul.bf16.vlgmr.msra.gmra.mxu3 %v2018_v17 }
  0xdf   : > { %620 = vmatmul.bf16.gmra.mxu2 %v2026_v22 }
  0xe0   : > { %639 = vmatmul.bf16.gmra.mxu3 %v2028_v23 }
 0x125   : > { %v2060_v19 = vpop.xlane.xlu0 %651 }
 0x126   : > { %vm653_vm5 = vcmp.eq.f32.partialorder %v650_v49, %v2060_v19  ;;  %v1885_v49 = vld [vmem:[%s336_s30 + $0x8] sm:$0xff]  ;;  %v658_v16 = vcvt.f32.s32 %v2060_v19 }
 0x127   : > { %v654_v25 = vsel %vm653_vm5, %v649_v20, -inf  ;;  %744 = vmatpush.bf16.msrb.mxu0 %v1885_v49  ;;  %855 = vmatpush.bf16.msrb.mxu1 %v1885_v49 }
 0x128   : > { %655 = vmax.xlane.f32.xlu2 %v654_v25  ;;  %970 = vmatpush.bf16.msrb.mxu2 %v1885_v49  ;;  %v659_v51 = vshll.u32 %v658_v16, 16 }
 0x129   : > { %1085 = vmatpush.bf16.msrb.mxu3 %v1885_v49 }
 0x12b   : > { %745 = vmatpush.bf16.msrb.mxu0 %v1884_v50  ;;  %856 = vmatpush.bf16.msrb.mxu1 %v1884_v50 }
 0x12c   : > { %971 = vmatpush.bf16.msrb.mxu2 %v1884_v50 }
 0x12d   : > { %v2075_v29 = vpop.xlane.xlu0 %666  ;;  %1086 = vmatpush.bf16.msrb.mxu3 %v1884_v50 }
 0x12e   : > { %vm668_vm6 = vcmp.eq.f32.partialorder %v665_v61, %v2075_v29  ;;  %v673_v55 = vcvt.f32.s32 %v2075_v29 }
 0x12f   : > { %v669_v33 = vsel %vm668_vm6, %v664_v30, -inf  ;;  %1200 = vmatpush.bf16.msra.mxu0 %v1885_v49  ;;  %1315 = vmatpush.bf16.msra.mxu1 %v1885_v49 }
 0x130   : > { %670 = vmax.xlane.f32.xlu2 %v669_v33  ;;  %1430 = vmatpush.bf16.msra.mxu2 %v1885_v49  ;;  %v674_v59 = vshll.u32 %v673_v55, 16 }
 0x131   : > { %1541 = vmatpush.bf16.msra.mxu3 %v1885_v49 }
 0x133   : > { %1201 = vmatpush.bf16.msra.mxu0 %v1884_v50  ;;  %1316 = vmatpush.bf16.msra.mxu1 %v1884_v50 }
 0x134   : > { %1431 = vmatpush.bf16.msra.mxu2 %v1884_v50 }
 0x135   : > { %v2090_v37 = vpop.xlane.xlu1 %681  ;;  %1542 = vmatpush.bf16.msra.mxu3 %v1884_v50 }
 0x136   : > { %vm683_vm7 = vcmp.eq.f32.partialorder %v680_v6, %v2090_v37  ;;  %v688_v62 = vcvt.f32.s32 %v2090_v37 }
 0x137   : > { %v684_v41 = vsel %vm683_vm7, %v679_v38, -inf }
 0x138   : > { %685 = vmax.xlane.f32.xlu0 %v684_v41  ;;  %v689_v7 = vshll.u32 %v688_v62, 16 }
 0x13d   : > { %v2096_v43 = vpop.xlane.xlu1 %696 }
 0x13e   : > { %vm698_vm8 = vcmp.eq.f32.partialorder %v695_v11, %v2096_v43  ;;  %v703_v12 = vcvt.f32.s32 %v2096_v43 }
 0x13f   : > { %v699_v45 = vsel %vm698_vm8, %v694_v44, -inf }
 0x140   : > { %700 = vmax.xlane.f32.xlu1 %v699_v45  ;;  %v704_v18 = vshll.u32 %v703_v12, 16 }
 0x19b   : > { %v656_v17 = vpop.xlane.xlu2 %655 }
 0x19c   : > { %v657_v53 = vcvt.f32.s32 %v656_v17 }
 0x19e   : > { %v660_v54 = vadd.s32 %v659_v51, %v657_v53 }
 0x1a0   : > { %vm706_vm9 = vcmp.eq.s32.totalorder %v2032_v40, %v660_v54 }
 0x1a1   : > { %v2120_v56 = vsel %vm706_vm9, 2147483648, %v2032_v40  ;;  %v714_v1 = vsel %vm706_vm9, 1.0, %v1953_v63 }
 0x1a2   : > { %v769_v57 = vsel %vm645_vm1, %v2120_v56, 2147483648 }
 0x1a3   : > { %v671_v58 = vpop.xlane.xlu2 %670  ;;  %v771_v22 = vshra.s32 %v769_v57, 16  ;;  %v770_v30 = vand.u32 65535, %v769_v57 }
 0x1a4   : > { %v672_v23 = vcvt.f32.s32 %v671_v58 }
 0x1a5   : > { %v773_v60 = vcvt.s32.f32 %v771_v22  ;;  %v772_v32 = vcvt.s32.f32 %v770_v30 }
 0x1a6   : > { %v675_v61 = vadd.s32 %v674_v59, %v672_v23 }
 0x1a7   : > { %774 = vmax.xlane.f32.xlu2 %v773_v60 }
 0x1a8   : > { %vm707_vm10 = vcmp.eq.s32.totalorder %v2036_v52, %v675_v61 }
 0x1a9   : > { %v715_v40 = vsel %vm707_vm10, 1.0, %v1953_v63  ;;  %v2129_v2 = vsel %vm707_vm10, 2147483648, %v2036_v52 }
 0x1aa   : > { %v718_v3 = vpack.c.bf16 %v715_v40, %v714_v1  ;;  %v784_v4 = vsel %vm645_vm1, %v2129_v2, 2147483648 }
 0x1ab   : > { %v686_v5 = vpop.xlane.xlu0 %685  ;;  %v786_v6 = vshra.s32 %v784_v4, 16  ;;  %v785_v34 = vand.u32 65535, %v784_v4 }
 0x1ac   : > { %v687_v9 = vcvt.f32.s32 %v686_v5  ;;  %1854 = vmatmul.msk.bf16.vlgmr.msrb.gmra.mxu0 %vm645_vm1, %v718_v3 }
 0x1ad   : > { %v788_v10 = vcvt.s32.f32 %v786_v6  ;;  %v787_v36 = vcvt.s32.f32 %v785_v34 }
 0x1ae   : > { %v690_v11 = vadd.s32 %v689_v7, %v687_v9 }
 0x1af   : > { %789 = vmax.xlane.f32.xlu0 %v788_v10 }
 0x1b0   : > { %vm708_vm11 = vcmp.eq.s32.totalorder %v2040_v0, %v690_v11 }
 0x1b1   : > { %v2137_v52 = vsel %vm708_vm11, 2147483648, %v2040_v0  ;;  %v716_v24 = vsel %vm708_vm11, 1.0, %v1953_v63 }
 0x1b2   : > { %v799_v13 = vsel %vm645_vm1, %v2137_v52, 2147483648 }
 0x1b3   : > { %v701_v14 = vpop.xlane.xlu1 %700  ;;  %v801_v15 = vshra.s32 %v799_v13, 16  ;;  %v800_v37 = vand.u32 65535, %v799_v13 }
 0x1b4   : > { %v702_v19 = vcvt.f32.s32 %v701_v14 }
 0x1b5   : > { %v803_v20 = vcvt.s32.f32 %v801_v15  ;;  %v802_v39 = vcvt.s32.f32 %v800_v37 }
 0x1b6   : > { %v705_v21 = vadd.s32 %v704_v18, %v702_v19 }
 0x1b7   : > { %804 = vmax.xlane.f32.xlu1 %v803_v20 }
 0x1b8   : > { %vm709_vm12 = vcmp.eq.s32.totalorder %v2044_v8, %v705_v21 }
 0x1b9   : > { %v717_v25 = vsel %vm709_vm12, 1.0, %v1953_v63  ;;  %v2145_v26 = vsel %vm709_vm12, 2147483648, %v2044_v8 }
 0x1ba   : > { %v719_v0 = vpack.c.bf16 %v717_v25, %v716_v24  ;;  %v814_v27 = vsel %vm645_vm1, %v2145_v26, 2147483648 }
 0x1bb   : > { %v816_v28 = vshra.s32 %v814_v27, 16  ;;  %v815_v42 = vand.u32 65535, %v814_v27 }
 0x1bc   : > { %1855 = vmatmul.msk.bf16.gmra.mxu0 %vm645_vm1, %v719_v0 }
 0x1bd   : > { %v818_v29 = vcvt.s32.f32 %v816_v28  ;;  %v817_v44 = vcvt.s32.f32 %v815_v42 }
 0x1bf   : > { %819 = vmax.xlane.f32.xlu2 %v818_v29 }
 0x21a   : > { %v775_v31 = vpop.xlane.xlu2 %774 }
 0x21b   : > { %vm776_vm13 = vcmp.eq.f32.partialorder %v773_v60, %v775_v31  ;;  %v781_v46 = vcvt.f32.s32 %v775_v31 }
 0x21c   : > { %v777_v33 = vsel %vm776_vm13, %v772_v32, -inf }
 0x21d   : > { %778 = vmax.xlane.f32.xlu0 %v777_v33  ;;  %v782_v48 = vshll.u32 %v781_v46, 16 }
 0x222   : > { %v790_v35 = vpop.xlane.xlu0 %789 }
 0x223   : > { %vm791_vm14 = vcmp.eq.f32.partialorder %v788_v10, %v790_v35  ;;  %v796_v16 = vcvt.f32.s32 %v790_v35 }
 0x224   : > { %v792_v8 = vsel %vm791_vm14, %v787_v36, -inf }
 0x225   : > { %793 = vmax.xlane.f32.xlu1 %v792_v8  ;;  %v797_v55 = vshll.u32 %v796_v16, 16 }
 0x22a   : > { %v805_v38 = vpop.xlane.xlu1 %804 }
 0x22b   : > { %vm806_vm15 = vcmp.eq.f32.partialorder %v803_v20, %v805_v38  ;;  %v811_v59 = vcvt.f32.s32 %v805_v38 }
 0x22c   : > { %v807_v41 = vsel %vm806_vm15, %v802_v39, -inf }
 0x22d   : > { %808 = vmax.xlane.f32.xlu2 %v807_v41  ;;  %v812_v3 = vshll.u32 %v811_v59, 16 }
 0x232   : > { %v820_v43 = vpop.xlane.xlu2 %819 }
 0x233   : > { %vm821_vm0 = vcmp.eq.f32.partialorder %v818_v29, %v820_v43  ;;  %v826_v7 = vcvt.f32.s32 %v820_v43 }
 0x234   : > { %v822_v45 = vsel %vm821_vm0, %v817_v44, -inf }
 0x235   : > { %823 = vmax.xlane.f32.xlu0 %v822_v45  ;;  %v827_v12 = vshll.u32 %v826_v7, 16 }
 0x290   : > { %v779_v47 = vpop.xlane.xlu0 %778 }
 0x291   : > { %v780_v49 = vcvt.f32.s32 %v779_v47 }
 0x293   : > { %v783_v50 = vadd.s32 %v782_v48, %v780_v49 }
 0x295   : > { %vm829_vm2 = vcmp.eq.s32.totalorder %v2120_v56, %v783_v50 }
 0x296   : > { %v2152_v17 = vsel %vm829_vm2, 2147483648, %v2120_v56  ;;  %v837_v23 = vsel %vm829_vm2, 1.0, %v1953_v63 }
 0x297   : > { %v884_v51 = vsel %vm645_vm1, %v2152_v17, 2147483648 }
 0x298   : > { %v794_v53 = vpop.xlane.xlu1 %793  ;;  %v886_v54 = vshra.s32 %v884_v51, 16  ;;  %v885_v0 = vand.u32 65535, %v884_v51 }
 0x299   : > { %v795_v57 = vcvt.f32.s32 %v794_v53 }
 0x29a   : > { %v888_v58 = vcvt.s32.f32 %v886_v54  ;;  %v887_v28 = vcvt.s32.f32 %v885_v0 }
 0x29b   : > { %v798_v22 = vadd.s32 %v797_v55, %v795_v57 }
 0x29c   : > { %889 = vmax.xlane.f32.xlu1 %v888_v58 }
 0x29d   : > { %vm830_vm3 = vcmp.eq.s32.totalorder %v2129_v2, %v798_v22 }
 0x29e   : > { %v838_v60 = vsel %vm830_vm3, 1.0, %v1953_v63  ;;  %v2160_v56 = vsel %vm830_vm3, 2147483648, %v2129_v2 }
 0x29f   : > { %v841_v61 = vpack.c.bf16 %v838_v60, %v837_v23  ;;  %v899_v62 = vsel %vm645_vm1, %v2160_v56, 2147483648 }
 0x2a0   : > { %v809_v1 = vpop.xlane.xlu2 %808  ;;  %v901_v40 = vshra.s32 %v899_v62, 16  ;;  %v900_v30 = vand.u32 65535, %v899_v62 }
 0x2a1   : > { %v810_v4 = vcvt.f32.s32 %v809_v1  ;;  %1856 = vmatmul.msk.bf16.vlgmr.msrb.gmra.mxu1 %vm645_vm1, %v841_v61 }
 0x2a2   : > { %v903_v5 = vcvt.s32.f32 %v901_v40  ;;  %v902_v32 = vcvt.s32.f32 %v900_v30 }
 0x2a3   : > { %v813_v6 = vadd.s32 %v812_v3, %v810_v4 }
 0x2a4   : > { %904 = vmax.xlane.f32.xlu2 %v903_v5 }
 0x2a5   : > { %vm831_vm4 = vcmp.eq.s32.totalorder %v2137_v52, %v813_v6 }
 0x2a6   : > { %v2167_v9 = vsel %vm831_vm4, 2147483648, %v2137_v52  ;;  %v839_v18 = vsel %vm831_vm4, 1.0, %v1953_v63 }
 0x2a7   : > { %v914_v2 = vsel %vm645_vm1, %v2167_v9, 2147483648 }
 0x2a8   : > { %v824_v10 = vpop.xlane.xlu0 %823  ;;  %v916_v11 = vshra.s32 %v914_v2, 16  ;;  %v915_v33 = vand.u32 65535, %v914_v2 }
 0x2a9   : > { %v825_v13 = vcvt.f32.s32 %v824_v10 }
 0x2aa   : > { %v918_v14 = vcvt.s32.f32 %v916_v11  ;;  %v917_v35 = vcvt.s32.f32 %v915_v33 }
 0x2ab   : > { %v828_v15 = vadd.s32 %v827_v12, %v825_v13 }
 0x2ac   : > { %919 = vmax.xlane.f32.xlu0 %v918_v14 }
 0x2ad   : > { %vm832_vm5 = vcmp.eq.s32.totalorder %v2145_v26, %v828_v15 }
 0x2ae   : > { %v840_v19 = vsel %vm832_vm5, 1.0, %v1953_v63  ;;  %v2175_v20 = vsel %vm832_vm5, 2147483648, %v2145_v26 }
 0x2af   : > { %v842_v52 = vpack.c.bf16 %v840_v19, %v839_v18  ;;  %v929_v21 = vsel %vm645_vm1, %v2175_v20, 2147483648 }
 0x2b0   : > { %v931_v24 = vshra.s32 %v929_v21, 16  ;;  %v930_v8 = vand.u32 65535, %v929_v21 }
 0x2b1   : > { %1857 = vmatmul.msk.bf16.gmra.mxu1 %vm645_vm1, %v842_v52 }
 0x2b2   : > { %v933_v25 = vcvt.s32.f32 %v931_v24  ;;  %v932_v38 = vcvt.s32.f32 %v930_v8 }
 0x2b4   : > { %934 = vmax.xlane.f32.xlu1 %v933_v25 }
 0x30f   : > { %v890_v27 = vpop.xlane.xlu1 %889 }
 0x310   : > { %vm891_vm6 = vcmp.eq.f32.partialorder %v888_v58, %v890_v27  ;;  %v896_v41 = vcvt.f32.s32 %v890_v27 }
 0x311   : > { %v892_v29 = vsel %vm891_vm6, %v887_v28, -inf }
 0x312   : > { %893 = vmax.xlane.f32.xlu2 %v892_v29  ;;  %v897_v43 = vshll.u32 %v896_v41, 16 }
 0x317   : > { %v905_v31 = vpop.xlane.xlu2 %904 }
 0x318   : > { %vm906_vm7 = vcmp.eq.f32.partialorder %v903_v5, %v905_v31  ;;  %v911_v46 = vcvt.f32.s32 %v905_v31 }
 0x319   : > { %v907_v26 = vsel %vm906_vm7, %v902_v32, -inf }
 0x31a   : > { %908 = vmax.xlane.f32.xlu0 %v907_v26  ;;  %v912_v16 = vshll.u32 %v911_v46, 16 }
 0x31f   : > { %v920_v34 = vpop.xlane.xlu0 %919 }
 0x320   : > { %vm921_vm8 = vcmp.eq.f32.partialorder %v918_v14, %v920_v34  ;;  %v926_v55 = vcvt.f32.s32 %v920_v34 }
 0x321   : > { %v922_v36 = vsel %vm921_vm8, %v917_v35, -inf }
 0x322   : > { %923 = vmax.xlane.f32.xlu1 %v922_v36  ;;  %v927_v61 = vshll.u32 %v926_v55, 16 }
 0x327   : > { %v935_v37 = vpop.xlane.xlu1 %934 }
 0x328   : > { %vm936_vm9 = vcmp.eq.f32.partialorder %v933_v25, %v935_v37  ;;  %v941_v3 = vcvt.f32.s32 %v935_v37 }
 0x329   : > { %v937_v39 = vsel %vm936_vm9, %v932_v38, -inf }
 0x32a   : > { %938 = vmax.xlane.f32.xlu2 %v937_v39  ;;  %v942_v7 = vshll.u32 %v941_v3, 16 }
 0x385   : > { %v894_v42 = vpop.xlane.xlu2 %893 }
 0x386   : > { %v895_v44 = vcvt.f32.s32 %v894_v42 }
 0x388   : > { %v898_v45 = vadd.s32 %v897_v43, %v895_v44 }
 0x38a   : > { %vm944_vm10 = vcmp.eq.s32.totalorder %v2152_v17, %v898_v45 }
 0x38b   : > { %v2182_v47 = vsel %vm944_vm10, 2147483648, %v2152_v17  ;;  %v952_v57 = vsel %vm944_vm10, 1.0, %v1953_v63 }
 0x38c   : > { %v999_v48 = vsel %vm645_vm1, %v2182_v47, 2147483648 }
 0x38d   : > { %v909_v49 = vpop.xlane.xlu0 %908  ;;  %v1001_v50 = vshra.s32 %v999_v48, 16  ;;  %v1000_v52 = vand.u32 65535, %v999_v48 }
 0x38e   : > { %v910_v51 = vcvt.f32.s32 %v909_v49 }
 0x38f   : > { %v1003_v53 = vcvt.s32.f32 %v1001_v50  ;;  %v1002_v24 = vcvt.s32.f32 %v1000_v52 }
 0x390   : > { %v913_v54 = vadd.s32 %v912_v16, %v910_v51 }
 0x391   : > { %1004 = vmax.xlane.f32.xlu0 %v1003_v53 }
 0x392   : > { %vm945_vm11 = vcmp.eq.s32.totalorder %v2160_v56, %v913_v54 }
 0x393   : > { %v953_v58 = vsel %vm945_vm11, 1.0, %v1953_v63  ;;  %v2190_v17 = vsel %vm945_vm11, 2147483648, %v2160_v56 }
 0x394   : > { %v956_v22 = vpack.c.bf16 %v953_v58, %v952_v57  ;;  %v1014_v59 = vsel %vm645_vm1, %v2190_v17, 2147483648 }
 0x395   : > { %v924_v23 = vpop.xlane.xlu1 %923  ;;  %v1016_v60 = vshra.s32 %v1014_v59, 16  ;;  %v1015_v0 = vand.u32 65535, %v1014_v59 }
 0x396   : > { %v925_v62 = vcvt.f32.s32 %v924_v23  ;;  %1858 = vmatmul.msk.bf16.vlgmr.msrb.gmra.mxu2 %vm645_vm1, %v956_v22 }
 0x397   : > { %v1018_v1 = vcvt.s32.f32 %v1016_v60  ;;  %v1017_v28 = vcvt.s32.f32 %v1015_v0 }
 0x398   : > { %v928_v40 = vadd.s32 %v927_v61, %v925_v62 }
 0x399   : > { %1019 = vmax.xlane.f32.xlu1 %v1018_v1 }
 0x39a   : > { %vm946_vm12 = vcmp.eq.s32.totalorder %v2167_v9, %v928_v40 }
 0x39b   : > { %v2197_v4 = vsel %vm946_vm12, 2147483648, %v2167_v9  ;;  %v954_v12 = vsel %vm946_vm12, 1.0, %v1953_v63 }
 0x39c   : > { %v1029_v56 = vsel %vm645_vm1, %v2197_v4, 2147483648 }
 0x39d   : > { %v939_v5 = vpop.xlane.xlu2 %938  ;;  %v1031_v6 = vshra.s32 %v1029_v56, 16  ;;  %v1030_v29 = vand.u32 65535, %v1029_v56 }
 0x39e   : > { %v940_v2 = vcvt.f32.s32 %v939_v5 }
 0x39f   : > { %v1033_v10 = vcvt.s32.f32 %v1031_v6  ;;  %v1032_v31 = vcvt.s32.f32 %v1030_v29 }
 0x3a0   : > { %v943_v11 = vadd.s32 %v942_v7, %v940_v2 }
 0x3a1   : > { %1034 = vmax.xlane.f32.xlu2 %v1033_v10 }
 0x3a2   : > { %vm947_vm13 = vcmp.eq.s32.totalorder %v2175_v20, %v943_v11 }
 0x3a3   : > { %v955_v13 = vsel %vm947_vm13, 1.0, %v1953_v63  ;;  %v2205_v14 = vsel %vm947_vm13, 2147483648, %v2175_v20 }
 0x3a4   : > { %v957_v9 = vpack.c.bf16 %v955_v13, %v954_v12  ;;  %v1044_v15 = vsel %vm645_vm1, %v2205_v14, 2147483648 }
 0x3a5   : > { %v1046_v18 = vshra.s32 %v1044_v15, 16  ;;  %v1045_v26 = vand.u32 65535, %v1044_v15 }
 0x3a6   : > { %1859 = vmatmul.msk.bf16.gmra.mxu2 %vm645_vm1, %v957_v9 }
 0x3a7   : > { %v1048_v19 = vcvt.s32.f32 %v1046_v18  ;;  %v1047_v34 = vcvt.s32.f32 %v1045_v26 }
 0x3a9   : > { %1049 = vmax.xlane.f32.xlu0 %v1048_v19 }
 0x404   : > { %v1005_v21 = vpop.xlane.xlu0 %1004 }
 0x405   : > { %vm1006_vm14 = vcmp.eq.f32.partialorder %v1003_v53, %v1005_v21  ;;  %v1011_v36 = vcvt.f32.s32 %v1005_v21 }
 0x406   : > { %v1007_v25 = vsel %vm1006_vm14, %v1002_v24, -inf }
 0x407   : > { %1008 = vmax.xlane.f32.xlu1 %v1007_v25  ;;  %v1012_v37 = vshll.u32 %v1011_v36, 16 }
 0x40c   : > { %v1020_v27 = vpop.xlane.xlu1 %1019 }
 0x40d   : > { %vm1021_vm15 = vcmp.eq.f32.partialorder %v1018_v1, %v1020_v27  ;;  %v1026_v41 = vcvt.f32.s32 %v1020_v27 }
 0x40e   : > { %v1022_v20 = vsel %vm1021_vm15, %v1017_v28, -inf }
 0x40f   : > { %1023 = vmax.xlane.f32.xlu2 %v1022_v20  ;;  %v1027_v46 = vshll.u32 %v1026_v41, 16 }
 0x414   : > { %v1035_v30 = vpop.xlane.xlu2 %1034 }
 0x415   : > { %vm1036_vm0 = vcmp.eq.f32.partialorder %v1033_v10, %v1035_v30  ;;  %v1041_v16 = vcvt.f32.s32 %v1035_v30 }
 0x416   : > { %v1037_v32 = vsel %vm1036_vm0, %v1032_v31, -inf }
 0x417   : > { %1038 = vmax.xlane.f32.xlu0 %v1037_v32  ;;  %v1042_v22 = vshll.u32 %v1041_v16, 16 }
 0x41c   : > { %v1050_v33 = vpop.xlane.xlu0 %1049 }
 0x41d   : > { %vm1051_vm2 = vcmp.eq.f32.partialorder %v1048_v19, %v1050_v33  ;;  %v1056_v61 = vcvt.f32.s32 %v1050_v33 }
 0x41e   : > { %v1052_v35 = vsel %vm1051_vm2, %v1047_v34, -inf }
 0x41f   : > { %1053 = vmax.xlane.f32.xlu1 %v1052_v35  ;;  %v1057_v3 = vshll.u32 %v1056_v61, 16 }
 0x47a   : > { %v1009_v8 = vpop.xlane.xlu1 %1008 }
 0x47b   : > { %v1010_v38 = vcvt.f32.s32 %v1009_v8 }
 0x47d   : > { %v1013_v39 = vadd.s32 %v1012_v37, %v1010_v38 }
 0x47f   : > { %vm1059_vm3 = vcmp.eq.s32.totalorder %v2182_v47, %v1013_v39 }
 0x480   : > { %v2212_v42 = vsel %vm1059_vm3, 2147483648, %v2182_v47  ;;  %v1067_v51 = vsel %vm1059_vm3, 1.0, %v1953_v63 }
 0x481   : > { %v1114_v43 = vsel %vm645_vm1, %v2212_v42, 2147483648 }
 0x482   : > { %v1024_v44 = vpop.xlane.xlu2 %1023  ;;  %v1116_v45 = vshra.s32 %v1114_v43, 16  ;;  %v1115_v9 = vand.u32 65535, %v1114_v43 }
 0x483   : > { %v1025_v48 = vcvt.f32.s32 %v1024_v44 }
 0x484   : > { %v1118_v49 = vcvt.s32.f32 %v1116_v45  ;;  %v1117_v18 = vcvt.s32.f32 %v1115_v9 }
 0x485   : > { %v1028_v50 = vadd.s32 %v1027_v46, %v1025_v48 }
 0x486   : > { %1119 = vmax.xlane.f32.xlu2 %v1118_v49 }
 0x487   : > { %vm1060_vm4 = vcmp.eq.s32.totalorder %v2190_v17, %v1028_v50 }
 0x488   : > { %v1068_v53 = vsel %vm1060_vm4, 1.0, %v1953_v63  ;;  %v2220_v47 = vsel %vm1060_vm4, 2147483648, %v2190_v17 }
 0x489   : > { %v1071_v54 = vpack.c.bf16 %v1068_v53, %v1067_v51  ;;  %v1129_v55 = vsel %vm645_vm1, %v2220_v47, 2147483648 }
 0x48a   : > { %v1039_v57 = vpop.xlane.xlu0 %1038  ;;  %v1131_v58 = vshra.s32 %v1129_v55, 16  ;;  %v1130_v52 = vand.u32 65535, %v1129_v55 }
 0x48b   : > { %v1040_v59 = vcvt.f32.s32 %v1039_v57  ;;  %1860 = vmatmul.msk.bf16.vlgmr.msrb.gmra.mxu3 %vm645_vm1, %v1071_v54 }
 0x48c   : > { %v1133_v23 = vcvt.s32.f32 %v1131_v58  ;;  %v1132_v24 = vcvt.s32.f32 %v1130_v52 }
 0x48d   : > { %v1043_v60 = vadd.s32 %v1042_v22, %v1040_v59 }
 0x48e   : > { %1134 = vmax.xlane.f32.xlu0 %v1133_v23 }
 0x48f   : > { %vm1061_vm5 = vcmp.eq.s32.totalorder %v2197_v4, %v1043_v60 }
 0x490   : > { %v2227_v62 = vsel %vm1061_vm5, 2147483648, %v2197_v4  ;;  %v1069_v7 = vsel %vm1061_vm5, 1.0, %v1953_v63 }
 0x491   : > { %v1144_v17 = vsel %vm645_vm1, %v2227_v62, 2147483648 }
 0x492   : > { %v1054_v1 = vpop.xlane.xlu1 %1053  ;;  %v1146_v40 = vshra.s32 %v1144_v17, 16  ;;  %v1145_v25 = vand.u32 65535, %v1144_v17 }
 0x493   : > { %v1055_v56 = vcvt.f32.s32 %v1054_v1 }
 0x494   : > { %v1148_v5 = vcvt.s32.f32 %v1146_v40  ;;  %v1147_v27 = vcvt.s32.f32 %v1145_v25 }
 0x495   : > { %v1058_v6 = vadd.s32 %v1057_v3, %v1055_v56 }
 0x496   : > { %1149 = vmax.xlane.f32.xlu1 %v1148_v5 }
 0x497   : > { %vm1062_vm6 = vcmp.eq.s32.totalorder %v2205_v14, %v1058_v6 }
 0x498   : > { %v1070_v2 = vsel %vm1062_vm6, 1.0, %v1953_v63  ;;  %v2235_v10 = vsel %vm1062_vm6, 2147483648, %v2205_v14 }
 0x499   : > { %v1072_v4 = vpack.c.bf16 %v1070_v2, %v1069_v7  ;;  %v1159_v11 = vsel %vm645_vm1, %v2235_v10, 2147483648 }
 0x49a   : > { %v1161_v12 = vshra.s32 %v1159_v11, 16  ;;  %v1160_v20 = vand.u32 65535, %v1159_v11 }
 0x49b   : > { %1861 = vmatmul.msk.bf16.gmra.mxu3 %vm645_vm1, %v1072_v4 }
 0x49c   : > { %v1163_v13 = vcvt.s32.f32 %v1161_v12  ;;  %v1162_v30 = vcvt.s32.f32 %v1160_v20 }
 0x49e   : > { %1164 = vmax.xlane.f32.xlu2 %v1163_v13 }
 0x4f9   : > { %v1120_v15 = vpop.xlane.xlu2 %1119 }
 0x4fa   : > { %vm1121_vm7 = vcmp.eq.f32.partialorder %v1118_v49, %v1120_v15  ;;  %v1126_v32 = vcvt.f32.s32 %v1120_v15 }
 0x4fb   : > { %v1122_v19 = vsel %vm1121_vm7, %v1117_v18, -inf }
 0x4fc   : > { %1123 = vmax.xlane.f32.xlu0 %v1122_v19  ;;  %v1127_v33 = vshll.u32 %v1126_v32, 16 }
 0x501   : > { %v1135_v21 = vpop.xlane.xlu0 %1134 }
 0x502   : > { %vm1136_vm8 = vcmp.eq.f32.partialorder %v1133_v23, %v1135_v21  ;;  %v1141_v36 = vcvt.f32.s32 %v1135_v21 }
 0x503   : > { %v1137_v14 = vsel %vm1136_vm8, %v1132_v24, -inf }
 0x504   : > { %1138 = vmax.xlane.f32.xlu1 %v1137_v14  ;;  %v1142_v41 = vshll.u32 %v1141_v36, 16 }
 0x509   : > { %v1150_v0 = vpop.xlane.xlu1 %1149 }
 0x50a   : > { %vm1151_vm9 = vcmp.eq.f32.partialorder %v1148_v5, %v1150_v0  ;;  %v1156_v46 = vcvt.f32.s32 %v1150_v0 }
 0x50b   : > { %v1152_v28 = vsel %vm1151_vm9, %v1147_v27, -inf }
 0x50c   : > { %1153 = vmax.xlane.f32.xlu2 %v1152_v28  ;;  %v1157_v54 = vshll.u32 %v1156_v46, 16 }
 0x511   : > { %v1165_v29 = vpop.xlane.xlu2 %1164 }
 0x512   : > { %vm1166_vm10 = vcmp.eq.f32.partialorder %v1163_v13, %v1165_v29  ;;  %v1171_v22 = vcvt.f32.s32 %v1165_v29 }
 0x513   : > { %v1167_v31 = vsel %vm1166_vm10, %v1162_v30, -inf }
 0x514   : > { %1168 = vmax.xlane.f32.xlu0 %v1167_v31  ;;  %v1172_v61 = vshll.u32 %v1171_v22, 16 }
 0x56f   : > { %v1124_v26 = vpop.xlane.xlu0 %1123 }
 0x570   : > { %v1125_v34 = vcvt.f32.s32 %v1124_v26 }
 0x572   : > { %v1128_v35 = vadd.s32 %v1127_v33, %v1125_v34 }
 0x574   : > { %vm1174_vm11 = vcmp.eq.s32.totalorder %v2212_v42, %v1128_v35 }
 0x575   : > { %v2242_v8 = vsel %vm1174_vm11, 2147483648, %v2212_v42  ;;  %v1182_v48 = vsel %vm1174_vm11, 1.0, %v1953_v63 }
 0x576   : > { %v1229_v37 = vsel %vm645_vm1, %v2242_v8, 2147483648 }
 0x577   : > { %v1139_v38 = vpop.xlane.xlu1 %1138  ;;  %v1231_v39 = vshra.s32 %v1229_v37, 16  ;;  %v1230_v4 = vand.u32 65535, %v1229_v37 }
 0x578   : > { %v1140_v43 = vcvt.f32.s32 %v1139_v38 }
 0x579   : > { %v1233_v44 = vcvt.s32.f32 %v1231_v39  ;;  %v1232_v12 = vcvt.s32.f32 %v1230_v4 }
 0x57a   : > { %v1143_v45 = vadd.s32 %v1142_v41, %v1140_v43 }
 0x57b   : > { %1234 = vmax.xlane.f32.xlu1 %v1233_v44 }
 0x57c   : > { %vm1175_vm12 = vcmp.eq.s32.totalorder %v2220_v47, %v1143_v45 }
 0x57d   : > { %v1183_v49 = vsel %vm1175_vm12, 1.0, %v1953_v63  ;;  %v2250_v42 = vsel %vm1175_vm12, 2147483648, %v2220_v47 }
 0x57e   : > { %v1186_v50 = vpack.c.bf16 %v1183_v49, %v1182_v48  ;;  %v1244_v16 = vsel %vm645_vm1, %v2250_v42, 2147483648 }
 0x57f   : > { %v1154_v51 = vpop.xlane.xlu2 %1153  ;;  %v1246_v53 = vshra.s32 %v1244_v16, 16  ;;  %v1245_v9 = vand.u32 65535, %v1244_v16 }
 0x580   : > { %v1155_v55 = vcvt.f32.s32 %v1154_v51  ;;  %1862 = vmatmul.msk.bf16.vlgmr.msra.gmra.mxu0 %vm645_vm1, %v1186_v50 }
 0x581   : > { %v1248_v57 = vcvt.s32.f32 %v1246_v53  ;;  %v1247_v18 = vcvt.s32.f32 %v1245_v9 }
 0x582   : > { %v1158_v58 = vadd.s32 %v1157_v54, %v1155_v55 }
 0x583   : > { %1249 = vmax.xlane.f32.xlu2 %v1248_v57 }
 0x584   : > { %vm1176_vm13 = vcmp.eq.s32.totalorder %v2227_v62, %v1158_v58 }
 0x585   : > { %v2257_v59 = vsel %vm1176_vm13, 2147483648, %v2227_v62  ;;  %v1184_v3 = vsel %vm1176_vm13, 1.0, %v1953_v63 }
 0x586   : > { %v1259_v47 = vsel %vm645_vm1, %v2257_v59, 2147483648 }
 0x587   : > { %v1169_v23 = vpop.xlane.xlu0 %1168  ;;  %v1261_v60 = vshra.s32 %v1259_v47, 16  ;;  %v1260_v19 = vand.u32 65535, %v1259_v47 }
 0x588   : > { %v1170_v17 = vcvt.f32.s32 %v1169_v23 }
 0x589   : > { %v1263_v1 = vcvt.s32.f32 %v1261_v60  ;;  %v1262_v21 = vcvt.s32.f32 %v1260_v19 }
 0x58a   : > { %v1173_v40 = vadd.s32 %v1172_v61, %v1170_v17 }
 0x58b   : > { %1264 = vmax.xlane.f32.xlu0 %v1263_v1 }
 0x58c   : > { %vm1177_vm14 = vcmp.eq.s32.totalorder %v2235_v10, %v1173_v40 }
 0x58d   : > { %v1185_v56 = vsel %vm1177_vm14, 1.0, %v1953_v63  ;;  %v2265_v5 = vsel %vm1177_vm14, 2147483648, %v2235_v10 }
 0x58e   : > { %v1187_v62 = vpack.c.bf16 %v1185_v56, %v1184_v3  ;;  %v1274_v6 = vsel %vm645_vm1, %v2265_v5, 2147483648 }
 0x58f   : > { %v1276_v7 = vshra.s32 %v1274_v6, 16  ;;  %v1275_v14 = vand.u32 65535, %v1274_v6 }
 0x590   : > { %1863 = vmatmul.msk.bf16.gmra.mxu0 %vm645_vm1, %v1187_v62 }
 0x591   : > { %v1278_v2 = vcvt.s32.f32 %v1276_v7  ;;  %v1277_v0 = vcvt.s32.f32 %v1275_v14 }
 0x593   : > { %1279 = vmax.xlane.f32.xlu1 %v1278_v2 }
 0x5ee   : > { %v1235_v11 = vpop.xlane.xlu1 %1234 }
 0x5ef   : > { %vm1236_vm15 = vcmp.eq.f32.partialorder %v1233_v44, %v1235_v11  ;;  %v1241_v28 = vcvt.f32.s32 %v1235_v11 }
 0x5f0   : > { %v1237_v13 = vsel %vm1236_vm15, %v1232_v12, -inf }
 0x5f1   : > { %1238 = vmax.xlane.f32.xlu2 %v1237_v13  ;;  %v1242_v29 = vshll.u32 %v1241_v28, 16 }
 0x5f6   : > { %v1250_v15 = vpop.xlane.xlu2 %1249 }
 0x5f7   : > { %vm1251_vm0 = vcmp.eq.f32.partialorder %v1248_v57, %v1250_v15  ;;  %v1256_v32 = vcvt.f32.s32 %v1250_v15 }
 0x5f8   : > { %v1252_v10 = vsel %vm1251_vm0, %v1247_v18, -inf }
 0x5f9   : > { %1253 = vmax.xlane.f32.xlu0 %v1252_v10  ;;  %v1257_v36 = vshll.u32 %v1256_v32, 16 }
 0x5fe   : > { %v1265_v52 = vpop.xlane.xlu0 %1264 }
 0x5ff   : > { %vm1266_vm2 = vcmp.eq.f32.partialorder %v1263_v1, %v1265_v52  ;;  %v1271_v41 = vcvt.f32.s32 %v1265_v52 }
 0x600   : > { %v1267_v24 = vsel %vm1266_vm2, %v1262_v21, -inf }
 0x601   : > { %1268 = vmax.xlane.f32.xlu1 %v1267_v24  ;;  %v1272_v50 = vshll.u32 %v1271_v41, 16 }
 0x606   : > { %v1280_v25 = vpop.xlane.xlu1 %1279 }
 0x607   : > { %vm1281_vm3 = vcmp.eq.f32.partialorder %v1278_v2, %v1280_v25  ;;  %v1286_v54 = vcvt.f32.s32 %v1280_v25 }
 0x608   : > { %v1282_v27 = vsel %vm1281_vm3, %v1277_v0, -inf }
 0x609   : > { %1283 = vmax.xlane.f32.xlu2 %v1282_v27  ;;  %v1287_v22 = vshll.u32 %v1286_v54, 16 }
 0x664   : > { %v1239_v20 = vpop.xlane.xlu2 %1238 }
 0x665   : > { %v1240_v30 = vcvt.f32.s32 %v1239_v20 }
 0x667   : > { %v1243_v31 = vadd.s32 %v1242_v29, %v1240_v30 }
 0x669   : > { %vm1289_vm4 = vcmp.eq.s32.totalorder %v2242_v8, %v1243_v31 }
 0x66a   : > { %v2272_v26 = vsel %vm1289_vm4, 2147483648, %v2242_v8  ;;  %v1297_v43 = vsel %vm1289_vm4, 1.0, %v1953_v63 }
 0x66b   : > { %v1344_v33 = vsel %vm645_vm1, %v2272_v26, 2147483648 }
 0x66c   : > { %v1254_v34 = vpop.xlane.xlu0 %1253  ;;  %v1346_v35 = vshra.s32 %v1344_v33, 16  ;;  %v1345_v62 = vand.u32 65535, %v1344_v33 }
 0x66d   : > { %v1255_v37 = vcvt.f32.s32 %v1254_v34 }
 0x66e   : > { %v1348_v38 = vcvt.s32.f32 %v1346_v35  ;;  %v1347_v7 = vcvt.s32.f32 %v1345_v62 }
 0x66f   : > { %v1258_v39 = vadd.s32 %v1257_v36, %v1255_v37 }
 0x670   : > { %1349 = vmax.xlane.f32.xlu0 %v1348_v38 }
 0x671   : > { %vm1290_vm5 = vcmp.eq.s32.totalorder %v2250_v42, %v1258_v39 }
 0x672   : > { %v1298_v44 = vsel %vm1290_vm5, 1.0, %v1953_v63  ;;  %v2280_v8 = vsel %vm1290_vm5, 2147483648, %v2250_v42 }
 0x673   : > { %v1301_v45 = vpack.c.bf16 %v1298_v44, %v1297_v43  ;;  %v1359_v46 = vsel %vm645_vm1, %v2280_v8, 2147483648 }
 0x674   : > { %v1269_v48 = vpop.xlane.xlu1 %1268  ;;  %v1361_v49 = vshra.s32 %v1359_v46, 16  ;;  %v1360_v4 = vand.u32 65535, %v1359_v46 }
 0x675   : > { %v1270_v16 = vcvt.f32.s32 %v1269_v48  ;;  %1864 = vmatmul.msk.bf16.vlgmr.msra.gmra.mxu1 %vm645_vm1, %v1301_v45 }
 0x676   : > { %v1363_v51 = vcvt.s32.f32 %v1361_v49  ;;  %v1362_v12 = vcvt.s32.f32 %v1360_v4 }
 0x677   : > { %v1273_v53 = vadd.s32 %v1272_v50, %v1270_v16 }
 0x678   : > { %1364 = vmax.xlane.f32.xlu1 %v1363_v51 }
 0x679   : > { %vm1291_vm6 = vcmp.eq.s32.totalorder %v2257_v59, %v1273_v53 }
 0x67a   : > { %v2287_v55 = vsel %vm1291_vm6, 2147483648, %v2257_v59  ;;  %v1299_v61 = vsel %vm1291_vm6, 1.0, %v1953_v63 }
 0x67b   : > { %v1374_v42 = vsel %vm645_vm1, %v2287_v55, 2147483648 }
 0x67c   : > { %v1284_v57 = vpop.xlane.xlu2 %1283  ;;  %v1376_v58 = vshra.s32 %v1374_v42, 16  ;;  %v1375_v13 = vand.u32 65535, %v1374_v42 }
 0x67d   : > { %v1285_v47 = vcvt.f32.s32 %v1284_v57 }
 0x67e   : > { %v1378_v23 = vcvt.s32.f32 %v1376_v58  ;;  %v1377_v15 = vcvt.s32.f32 %v1375_v13 }
 0x67f   : > { %v1288_v60 = vadd.s32 %v1287_v22, %v1285_v47 }
 0x680   : > { %1379 = vmax.xlane.f32.xlu2 %v1378_v23 }
 0x681   : > { %vm1292_vm7 = vcmp.eq.s32.totalorder %v2265_v5, %v1288_v60 }
 0x682   : > { %v1300_v17 = vsel %vm1292_vm7, 1.0, %v1953_v63  ;;  %v2295_v1 = vsel %vm1292_vm7, 2147483648, %v2265_v5 }
 0x683   : > { %v1302_v59 = vpack.c.bf16 %v1300_v17, %v1299_v61  ;;  %v1389_v40 = vsel %vm645_vm1, %v2295_v1, 2147483648 }
 0x684   : > { %v1391_v3 = vshra.s32 %v1389_v40, 16  ;;  %v1390_v10 = vand.u32 65535, %v1389_v40 }
 0x685   : > { %1865 = vmatmul.msk.bf16.gmra.mxu1 %vm645_vm1, %v1302_v59 }
 0x686   : > { %v1393_v56 = vcvt.s32.f32 %v1391_v3  ;;  %v1392_v52 = vcvt.s32.f32 %v1390_v10 }
 0x688   : > { %1394 = vmax.xlane.f32.xlu0 %v1393_v56 }
 0x6e3   : > { %v1350_v6 = vpop.xlane.xlu0 %1349 }
 0x6e4   : > { %vm1351_vm8 = vcmp.eq.f32.partialorder %v1348_v38, %v1350_v6  ;;  %v1356_v24 = vcvt.f32.s32 %v1350_v6 }
 0x6e5   : > { %v1352_v2 = vsel %vm1351_vm8, %v1347_v7, -inf }
 0x6e6   : > { %1353 = vmax.xlane.f32.xlu1 %v1352_v2  ;;  %v1357_v25 = vshll.u32 %v1356_v24, 16 }
 0x6eb   : > { %v1365_v11 = vpop.xlane.xlu1 %1364 }
 0x6ec   : > { %vm1366_vm9 = vcmp.eq.f32.partialorder %v1363_v51, %v1365_v11  ;;  %v1371_v28 = vcvt.f32.s32 %v1365_v11 }
 0x6ed   : > { %v1367_v5 = vsel %vm1366_vm9, %v1362_v12, -inf }
 0x6ee   : > { %1368 = vmax.xlane.f32.xlu2 %v1367_v5  ;;  %v1372_v32 = vshll.u32 %v1371_v28, 16 }
 0x6f3   : > { %v1380_v9 = vpop.xlane.xlu2 %1379 }
 0x6f4   : > { %vm1381_vm10 = vcmp.eq.f32.partialorder %v1378_v23, %v1380_v9  ;;  %v1386_v36 = vcvt.f32.s32 %v1380_v9 }
 0x6f5   : > { %v1382_v18 = vsel %vm1381_vm10, %v1377_v15, -inf }
 0x6f6   : > { %1383 = vmax.xlane.f32.xlu0 %v1382_v18  ;;  %v1387_v45 = vshll.u32 %v1386_v36, 16 }
 0x6fb   : > { %v1395_v19 = vpop.xlane.xlu0 %1394 }
 0x6fc   : > { %vm1396_vm11 = vcmp.eq.f32.partialorder %v1393_v56, %v1395_v19  ;;  %v1401_v50 = vcvt.f32.s32 %v1395_v19 }
 0x6fd   : > { %v1397_v21 = vsel %vm1396_vm11, %v1392_v52, -inf }
 0x6fe   : > { %1398 = vmax.xlane.f32.xlu1 %v1397_v21  ;;  %v1402_v54 = vshll.u32 %v1401_v50, 16 }
 0x759   : > { %v1354_v14 = vpop.xlane.xlu1 %1353 }
 0x75a   : > { %v1355_v0 = vcvt.f32.s32 %v1354_v14 }
 0x75c   : > { %v1358_v27 = vadd.s32 %v1357_v25, %v1355_v0 }
 0x75e   : > { %vm1404_vm12 = vcmp.eq.s32.totalorder %v2272_v26, %v1358_v27 }
 0x75f   : > { %v2302_v20 = vsel %vm1404_vm12, 2147483648, %v2272_v26  ;;  %v1412_v37 = vsel %vm1404_vm12, 1.0, %v1953_v63 }
 0x760   : > { %v1459_v29 = vsel %vm645_vm1, %v2302_v20, 2147483648 }
 0x761   : > { %v1369_v30 = vpop.xlane.xlu2 %1368  ;;  %v1461_v31 = vshra.s32 %v1459_v29, 16  ;;  %v1460_v59 = vand.u32 65535, %v1459_v29 }
 0x762   : > { %v1370_v33 = vcvt.f32.s32 %v1369_v30 }
 0x763   : > { %v1463_v34 = vcvt.s32.f32 %v1461_v31  ;;  %v1462_v3 = vcvt.s32.f32 %v1460_v59 }
 0x764   : > { %v1373_v35 = vadd.s32 %v1372_v32, %v1370_v33 }
 0x765   : > { %1464 = vmax.xlane.f32.xlu2 %v1463_v34 }
 0x766   : > { %vm1405_vm13 = vcmp.eq.s32.totalorder %v2280_v8, %v1373_v35 }
 0x767   : > { %v1413_v38 = vsel %vm1405_vm13, 1.0, %v1953_v63  ;;  %v2310_v26 = vsel %vm1405_vm13, 2147483648, %v2280_v8 }
 0x768   : > { %v1416_v39 = vpack.c.bf16 %v1413_v38, %v1412_v37  ;;  %v1474_v41 = vsel %vm645_vm1, %v2310_v26, 2147483648 }
 0x769   : > { %v1384_v43 = vpop.xlane.xlu0 %1383  ;;  %v1476_v44 = vshra.s32 %v1474_v41, 16  ;;  %v1475_v62 = vand.u32 65535, %v1474_v41 }
 0x76a   : > { %v1385_v46 = vcvt.f32.s32 %v1384_v43  ;;  %1866 = vmatmul.msk.bf16.vlgmr.msra.gmra.mxu2 %vm645_vm1, %v1416_v39 }
 0x76b   : > { %v1478_v48 = vcvt.s32.f32 %v1476_v44  ;;  %v1477_v7 = vcvt.s32.f32 %v1475_v62  ;;  %v616_v44 = vpop.f32.mrf.mxu2 }
 0x76c   : > { %v1388_v49 = vadd.s32 %v1387_v45, %v1385_v46  ;;  %v635_v46 = vpop.f32.mrf.mxu3 }
 0x76d   : > { %1479 = vmax.xlane.f32.xlu0 %v1478_v48 }
 0x76e   : > { %vm1406_vm14 = vcmp.eq.s32.totalorder %v2287_v55, %v1388_v49 }
 0x76f   : > { %v2317_v16 = vsel %vm1406_vm14, 2147483648, %v2287_v55  ;;  %v1414_v22 = vsel %vm1406_vm14, 1.0, %v1953_v63 }
 0x770   : > { %v1489_v8 = vsel %vm645_vm1, %v2317_v16, 2147483648 }
 0x771   : > { %v1399_v51 = vpop.xlane.xlu1 %1398  ;;  %v1491_v53 = vshra.s32 %v1489_v8, 16 }
 0x772   : > { %v1400_v42 = vcvt.f32.s32 %v1399_v51 }
 0x773   : > { %v1493_v57 = vcvt.s32.f32 %v1491_v53  ;;  %v618_v45 = vpop.f32.mrf.mxu2  ;;  %v858_v53 = vpop.f32.mrf.mxu1 }
 0x774   : > { %v1403_v58 = vadd.s32 %v1402_v54, %v1400_v42  ;;  %v637_v49 = vpop.f32.mrf.mxu3 }
 0x775   : > { %1494 = vmax.xlane.f32.xlu1 %v1493_v57 }
 0x776   : > { %vm1407_vm15 = vcmp.eq.s32.totalorder %v2295_v1, %v1403_v58 }
 0x777   : > { %v1415_v47 = vsel %vm1407_vm15, 1.0, %v1953_v63  ;;  %v1411_v23 = vsel %vm1407_vm15, 2147483648, %v2295_v1  ;;  %v1490_v1 = vand.u32 65535, %v1489_v8  ;;  %v747_v8 = vpop.f32.mrf.mxu0 }
 0x778   : > { %v1417_v55 = vpack.c.bf16 %v1415_v47, %v1414_v22  ;;  %v1504_v60 = vsel %vm645_vm1, %v1411_v23, 2147483648 }
 0x779   : > { %v1506_v61 = vshra.s32 %v1504_v60, 16  ;;  %v1492_v11 = vcvt.s32.f32 %v1490_v1  ;;  %v1505_v5 = vand.u32 65535, %v1504_v60 }
 0x77a   : > { %1867 = vmatmul.msk.bf16.gmra.mxu2 %vm645_vm1, %v1417_v55  ;;  %v1928_v55 = vld [vmem:[%s2474_s5] ss:$0 sm:$0xff] }
 0x77b   : > { %v1508_v17 = vcvt.s32.f32 %v1506_v61  ;;  %v1507_v9 = vcvt.s32.f32 %v1505_v5  ;;  %v619_v59 = vadd.f32 %v1928_v55, %v618_v45 }
 0x77c   : > { %v640_v51 = vpop.f32.mrf.mxu3 }
 0x77d   : > { %1509 = vmax.xlane.f32.xlu2 %v1508_v17  ;;  %v2347_v62 = vadd.f32 %v637_v49, %v619_v59 }
 0x784   : > { %v642_v42 = vpop.f32.mrf.mxu3 }
 0x78c   : > { %v1088_v47 = vpop.f32.mrf.mxu3 }
 0x794   : > { %v1090_v61 = vpop.f32.mrf.mxu3 }
 0x7d8   : > { %v1465_v40 = vpop.xlane.xlu2 %1464 }
 0x7d9   : > { %vm1466_vm0 = vcmp.eq.f32.partialorder %v1463_v34, %v1465_v40  ;;  %v1471_v10 = vcvt.f32.s32 %v1465_v40 }
 0x7da   : > { %v1467_v56 = vsel %vm1466_vm0, %v1462_v3, -inf }
 0x7db   : > { %1468 = vmax.xlane.f32.xlu0 %v1467_v56  ;;  %v1472_v52 = vshll.u32 %v1471_v10, 16 }
 0x7e0   : > { %v1480_v6 = vpop.xlane.xlu0 %1479 }
 0x7e1   : > { %vm1481_vm2 = vcmp.eq.f32.partialorder %v1478_v48, %v1480_v6  ;;  %v1486_v21 = vcvt.f32.s32 %v1480_v6  ;;  %v621_v48 = vpop.f32.mrf.mxu2 }
 0x7e2   : > { %v1482_v2 = vsel %vm1481_vm2, %v1477_v7, -inf  ;;  %v622_v6 = vadd.f32 %v1928_v55, %v621_v48 }
 0x7e3   : > { %1483 = vmax.xlane.f32.xlu1 %v1482_v2  ;;  %v1487_v25 = vshll.u32 %v1486_v21, 16 }
 0x7e8   : > { %v1495_v4 = vpop.xlane.xlu1 %1494 }
 0x7e9   : > { %vm1496_vm3 = vcmp.eq.f32.partialorder %v1493_v57, %v1495_v4  ;;  %v1501_v32 = vcvt.f32.s32 %v1495_v4  ;;  %v623_v50 = vpop.f32.mrf.mxu2  ;;  %v860_v57 = vpop.f32.mrf.mxu1  ;;  %v2351_v4 = vadd.f32 %v640_v51, %v622_v6 }
 0x7ea   : > { %v1497_v12 = vsel %vm1496_vm3, %v1492_v11, -inf  ;;  %v624_v11 = vadd.f32 %v1928_v55, %v623_v50 }
 0x7eb   : > { %1498 = vmax.xlane.f32.xlu2 %v1497_v12  ;;  %v1502_v34 = vshll.u32 %v1501_v32, 16  ;;  %v2353_v12 = vpop.f32.mrf.mxu3 }
 0x7f0   : > { %v1510_v13 = vpop.xlane.xlu2 %1509 }
 0x7f1   : > { %vm1511_vm4 = vcmp.eq.f32.partialorder %v1508_v17, %v1510_v13  ;;  %v1516_v35 = vcvt.f32.s32 %v1510_v13  ;;  %v973_v54 = vpop.f32.mrf.mxu2  ;;  %v617_v17 = vadd.f32 %v1928_v55, %v616_v44 }
 0x7f2   : > { %v1512_v15 = vsel %vm1511_vm4, %v1507_v9, -inf }
 0x7f3   : > { %1513 = vmax.xlane.f32.xlu0 %v1512_v15  ;;  %v1517_v38 = vshll.u32 %v1516_v35, 16  ;;  %v2345_v56 = vadd.f32 %v635_v46, %v617_v17 }
 0x7f5   : > { %v748_v2 = vadd.f32 %v747_v8, %v2345_v56  ;;  %v859_v13 = vadd.f32 %v858_v53, %v2345_v56  ;;  %v974_v10 = vadd.f32 %v973_v54, %v2345_v56  ;;  %v1091_v8 = vadd.f32 %v1090_v61, %v2347_v62 }
 0x7f7   : > { %v761_v15 = vmul.f32 0.2, %v748_v2  ;;  %vm757_vm9 = vcmp.ge.f32.partialorder %v748_v2, 0.0  ;;  %v872_v21 = vmul.f32 0.2, %v859_v13  ;;  %vm868_vm11 = vcmp.ge.f32.partialorder %v859_v13, 0.0 }
 0x7f8   : > { %vm983_vm13 = vcmp.ge.f32.partialorder %v974_v10, 0.0 }
 0x7f9   : > { %v975_v58 = vpop.f32.mrf.mxu2 }
 0x84e   : > { %v1469_v18 = vpop.xlane.xlu0 %1468 }
 0x84f   : > { %v1470_v19 = vcvt.f32.s32 %v1469_v18 }
 0x851   : > { %v1473_v24 = vadd.s32 %v1472_v52, %v1470_v19  ;;  %v2358_v52 = vadd.f32 %v642_v42, %v624_v11 }
 0x853   : > { %vm1519_vm5 = vcmp.eq.s32.totalorder %v2302_v20, %v1473_v24  ;;  %v861_v24 = vadd.f32 %v860_v57, %v2347_v62 }
 0x854   : > { %v1523_v28 = vsel %vm1519_vm5, 1.0, %v1953_v63 }
 0x855   : > { %vm869_vm14 = vcmp.ge.f32.partialorder %v861_v24, 0.0 }
 0x856   : > { %v1484_v14 = vpop.xlane.xlu1 %1483 }
 0x857   : > { %v1485_v0 = vcvt.f32.s32 %v1484_v14  ;;  %v1089_v14 = vadd.f32 %v1088_v47, %v2345_v56 }
 0x859   : > { %v1488_v27 = vadd.s32 %v1487_v25, %v1485_v0  ;;  %v765_v0 = vsel %vm757_vm9, %v748_v2, %v761_v15  ;;  %v1102_v35 = vmul.f32 0.2, %v1089_v14  ;;  %vm1098_vm15 = vcmp.ge.f32.partialorder %v1089_v14, 0.0 }
 0x85a   : > { %v1094_v15 = vadd.f32 %v2353_v12, %v2351_v4 }
 0x85b   : > { %vm1520_vm6 = vcmp.eq.s32.totalorder %v2310_v26, %v1488_v27  ;;  %v1106_v50 = vsel %vm1098_vm15, %v1089_v14, %v1102_v35 }
 0x85c   : > { %v1524_v29 = vsel %vm1520_vm6, 1.0, %v1953_v63  ;;  %vm1099_vm6 = vcmp.ge.f32.partialorder %v1091_v8, 0.0 }
 0x85d   : > { %v1527_v30 = vpack.c.bf16 %v1524_v29, %v1523_v28  ;;  %v987_v28 = vmul.f32 0.2, %v974_v10 }
 0x85e   : > { %v1499_v31 = vpop.xlane.xlu2 %1498 }
 0x85f   : > { %1868 = vmatmul.msk.bf16.vlgmr.msra.gmra.mxu3 %vm645_vm1, %v1527_v30  ;;  %v1500_v33 = vcvt.f32.s32 %v1499_v31 }
 0x861   : > { %v1503_v36 = vadd.s32 %v1502_v34, %v1500_v33  ;;  %v876_v33 = vsel %vm868_vm11, %v859_v13, %v872_v21  ;;  %v873_v34 = vmul.f32 0.2, %v861_v24 }
 0x862   : > { %v880_v46 = vmax.f32 %v765_v0, %v876_v33 }
 0x863   : > { %vm1521_vm7 = vcmp.eq.s32.totalorder %v2317_v16, %v1503_v36  ;;  %v749_v16 = vpop.f32.mrf.mxu0  ;;  %v877_v49 = vsel %vm869_vm14, %v861_v24, %v873_v34 }
 0x864   : > { %v1525_v26 = vsel %vm1521_vm7, 1.0, %v1953_v63  ;;  %v750_v1 = vadd.f32 %v749_v16, %v2347_v62 }
 0x866   : > { %v1514_v37 = vpop.xlane.xlu0 %1513  ;;  %v762_v18 = vmul.f32 0.2, %v750_v1  ;;  %vm758_vm10 = vcmp.ge.f32.partialorder %v750_v1, 0.0 }
 0x867   : > { %v1515_v39 = vcvt.f32.s32 %v1514_v37 }
 0x868   : > { %v2363_v27 = vsel %vm758_vm10, %v750_v1, %v762_v18 }
 0x869   : > { %v1518_v20 = vadd.s32 %v1517_v38, %v1515_v39  ;;  %v976_v38 = vadd.f32 %v975_v58, %v2347_v62  ;;  %v2371_v39 = vpop.f32.mrf.mxu3 }
 0x86b   : > { %vm1522_vm8 = vcmp.eq.s32.totalorder %v1411_v23, %v1518_v20  ;;  %v752_v22 = vpop.f32.mrf.mxu0  ;;  %v2336_v23 = vpop.f32.mrf.mxu2  ;;  %v988_v16 = vmul.f32 0.2, %v976_v38  ;;  %vm984_vm4 = vcmp.ge.f32.partialorder %v976_v38, 0.0 }
 0x86c   : > { %v1526_v41 = vsel %vm1522_vm8, 1.0, %v1953_v63  ;;  %v863_v63 = vpop.f32.mrf.mxu1  ;;  %v753_v19 = vadd.f32 %v752_v22, %v2351_v4  ;;  %v881_v22 = vmax.f32 %v2363_v27, %v877_v49  ;;  %v979_v47 = vadd.f32 %v2336_v23, %v2351_v4 }
 0x86d   : > { %v1528_v43 = vpack.c.bf16 %v1526_v41, %v1525_v26  ;;  %v864_v25 = vadd.f32 %v863_v63, %v2351_v4  ;;  %v991_v26 = vsel %vm983_vm13, %v974_v10, %v987_v28  ;;  %v992_v6 = vsel %vm984_vm4, %v976_v38, %v988_v16 }
 0x86e   : > { %vm759_vm12 = vcmp.ge.f32.partialorder %v753_v19, 0.0  ;;  %v763_v30 = vmul.f32 0.2, %v753_v19  ;;  %v995_v54 = vmax.f32 %v880_v46, %v991_v26  ;;  %v996_v24 = vmax.f32 %v881_v22, %v992_v6 }
 0x86f   : > { %1869 = vmatmul.msk.bf16.gmra.mxu3 %vm645_vm1, %v1528_v43  ;;  %v874_v37 = vmul.f32 0.2, %v864_v25  ;;  %vm870_vm0 = vcmp.ge.f32.partialorder %v864_v25, 0.0  ;;  %vm985_vm9 = vcmp.ge.f32.partialorder %v979_v47, 0.0  ;;  %vm1100_vm13 = vcmp.ge.f32.partialorder %v1094_v15, 0.0 }
 0x870   : > { %v2375_v44 = vsel %vm759_vm12, %v753_v19, %v763_v30  ;;  %v1110_v63 = vmax.f32 %v995_v54, %v1106_v50  ;;  %v1096_v50 = vadd.f32 %v2371_v39, %v2358_v52 }
 0x871   : > { %v2381_v53 = vsel %vm870_vm0, %v864_v25, %v874_v37 }
 0x872   : > { %v882_v55 = vmax.f32 %v2375_v44, %v2381_v53 }
 0x873   : > { %v754_v60 = vpop.f32.mrf.mxu0  ;;  %v2343_v3 = vpop.f32.mrf.mxu2 }
 0x874   : > { %v2341_v40 = vpop.f32.mrf.mxu1  ;;  %v2367_v31 = vadd.f32 %v754_v60, %v2358_v52  ;;  %v1103_v60 = vmul.f32 0.2, %v1091_v8 }
 0x875   : > { %v2392_v59 = vadd.f32 %v2341_v40, %v2358_v52 }
 0x876   : > { %v2378_v45 = vmul.f32 0.2, %v2367_v31  ;;  %v1107_v40 = vsel %vm1099_vm6, %v1091_v8, %v1103_v60  ;;  %vm760_vm11 = vcmp.ge.f32.partialorder %v2367_v31, 0.0 }
 0x877   : > { %v1111_v12 = vmax.f32 %v996_v24, %v1107_v40  ;;  %vm871_vm14 = vcmp.ge.f32.partialorder %v2392_v59, 0.0  ;;  %v875_v35 = vmul.f32 0.2, %v2392_v59 }
 0x879   : > { %v879_v39 = vsel %vm871_vm14, %v2392_v59, %v875_v35 }
 0x87b   : > { %v1203_v7 = vpop.f32.mrf.mxu0  ;;  %v1433_v9 = vpop.f32.mrf.mxu2 }
 0x87c   : > { %v1318_v5 = vpop.f32.mrf.mxu1  ;;  %v1204_v29 = vadd.f32 %v1203_v7, %v2345_v56  ;;  %v1434_v43 = vadd.f32 %v1433_v9, %v2345_v56  ;;  %v989_v9 = vmul.f32 0.2, %v979_v47 }
 0x87d   : > { %v1319_v36 = vadd.f32 %v1318_v5, %v2345_v56 }
 0x87e   : > { %v1217_v41 = vmul.f32 0.2, %v1204_v29  ;;  %vm1213_vm2 = vcmp.ge.f32.partialorder %v1204_v29, 0.0  ;;  %v1447_v58 = vmul.f32 0.2, %v1434_v43  ;;  %vm1443_vm5 = vcmp.ge.f32.partialorder %v1434_v43, 0.0 }
 0x87f   : > { %v1332_v51 = vmul.f32 0.2, %v1319_v36  ;;  %vm1328_vm3 = vcmp.ge.f32.partialorder %v1319_v36, 0.0 }
 0x880   : > { %v1221_v42 = vsel %vm1213_vm2, %v1204_v29, %v1217_v41  ;;  %v1451_v13 = vsel %vm1443_vm5, %v1434_v43, %v1447_v58  ;;  %v1104_v29 = vmul.f32 0.2, %v1094_v15  ;;  %vm1101_vm5 = vcmp.ge.f32.partialorder %v1096_v50, 0.0 }
 0x881   : > { %v1336_v61 = vsel %vm1328_vm3, %v1319_v36, %v1332_v51  ;;  %v1225_v7 = vmax.f32 %v1110_v63, %v1221_v42  ;;  %v981_v36 = vadd.f32 %v2343_v3, %v2358_v52  ;;  %v1105_v63 = vmul.f32 0.2, %v1096_v50 }
 0x882   : > { %v1108_v46 = vsel %vm1100_vm13, %v1094_v15, %v1104_v29 }
 0x883   : > { %v1205_v32 = vpop.f32.mrf.mxu0  ;;  %v1435_v48 = vpop.f32.mrf.mxu2  ;;  %v1340_v10 = vmax.f32 %v1225_v7, %v1336_v61  ;;  %vm986_vm2 = vcmp.ge.f32.partialorder %v981_v36, 0.0  ;;  %v990_v51 = vmul.f32 0.2, %v981_v36  ;;  %v768_v61 = vsel %vm760_vm11, %v2367_v31, %v2378_v45 }
 0x884   : > { %v1320_v20 = vpop.f32.mrf.mxu1  ;;  %v1206_v57 = vadd.f32 %v1205_v32, %v2347_v62  ;;  %v1436_v23 = vadd.f32 %v1435_v48, %v2347_v62  ;;  %v993_v32 = vsel %vm985_vm9, %v979_v47, %v989_v9 }
 0x885   : > { %v1321_v17 = vadd.f32 %v1320_v20, %v2347_v62  ;;  %v1455_v25 = vmax.f32 %v1340_v10, %v1451_v13  ;;  %v997_v44 = vmax.f32 %v882_v55, %v993_v32  ;;  %v1109_v13 = vsel %vm1101_vm5, %v1096_v50, %v1105_v63 }
 0x886   : > { %v1218_v11 = vmul.f32 0.2, %v1206_v57  ;;  %vm1214_vm7 = vcmp.ge.f32.partialorder %v1206_v57, 0.0  ;;  %v1448_v27 = vmul.f32 0.2, %v1436_v23  ;;  %vm1444_vm12 = vcmp.ge.f32.partialorder %v1436_v23, 0.0 }
 0x887   : > { %v1333_v19 = vmul.f32 0.2, %v1321_v17  ;;  %vm1329_vm10 = vcmp.ge.f32.partialorder %v1321_v17, 0.0  ;;  %v1112_v58 = vmax.f32 %v997_v44, %v1108_v46 }
 0x888   : > { %v1452_v26 = vsel %vm1444_vm12, %v1436_v23, %v1448_v27  ;;  %v883_v23 = vmax.f32 %v768_v61, %v879_v39 }
 0x889   : > { %v1337_v33 = vsel %vm1329_vm10, %v1321_v17, %v1333_v19  ;;  %v994_v17 = vsel %vm986_vm2, %v981_v36, %v990_v51 }
 0x88a   : > { %v998_v31 = vmax.f32 %v883_v23, %v994_v17 }
 0x88b   : > { %v1208_v2 = vpop.f32.mrf.mxu0  ;;  %v1438_v14 = vpop.f32.mrf.mxu2 }
 0x88c   : > { %v1323_v18 = vpop.f32.mrf.mxu1  ;;  %v1209_v0 = vadd.f32 %v1208_v2, %v2351_v4  ;;  %v1439_v41 = vadd.f32 %v1438_v14, %v2351_v4  ;;  %v1113_v19 = vmax.f32 %v998_v31, %v1109_v13 }
 0x88d   : > { %v1324_v34 = vadd.f32 %v1323_v18, %v2351_v4 }
 0x88e   : > { %v1219_v20 = vmul.f32 0.2, %v1209_v0  ;;  %vm1215_vm15 = vcmp.ge.f32.partialorder %v1209_v0, 0.0  ;;  %vm1445_vm4 = vcmp.ge.f32.partialorder %v1439_v41, 0.0 }
 0x88f   : > { %v1334_v8 = vmul.f32 0.2, %v1324_v34  ;;  %vm1330_vm3 = vcmp.ge.f32.partialorder %v1324_v34, 0.0 }
 0x890   : > { %v1223_v16 = vsel %vm1215_vm15, %v1209_v0, %v1219_v20 }
 0x891   : > { %v1338_v55 = vsel %vm1330_vm3, %v1324_v34, %v1334_v8  ;;  %v1227_v6 = vmax.f32 %v1112_v58, %v1223_v16 }
 0x893   : > { %v1210_v48 = vpop.f32.mrf.mxu0  ;;  %v1440_v22 = vpop.f32.mrf.mxu2 }
 0x894   : > { %v1325_v53 = vpop.f32.mrf.mxu1  ;;  %v1211_v42 = vadd.f32 %v1210_v48, %v2358_v52 }
 0x895   : > { %v1326_v60 = vadd.f32 %v1325_v53, %v2358_v52 }
 0x896   : > { %v1220_v2 = vmul.f32 0.2, %v1211_v42  ;;  %vm1216_vm6 = vcmp.ge.f32.partialorder %v1211_v42, 0.0 }
 0x897   : > { %v1335_v9 = vmul.f32 0.2, %v1326_v60 }
 0x898   : > { %v1224_v18 = vsel %vm1216_vm6, %v1211_v42, %v1220_v2 }
 0x899   : > { %v1228_v14 = vmax.f32 %v1113_v19, %v1224_v18 }
 0x8e2   : > { %v1544_v1 = vpop.f32.mrf.mxu3 }
 0x8e3   : > { %v1545_v5 = vadd.f32 %v1544_v1, %v2345_v56  ;;  %v1222_v56 = vsel %vm1214_vm7, %v1206_v57, %v1218_v11  ;;  %v1441_v11 = vadd.f32 %v1440_v22, %v2358_v52 }
 0x8e4   : > { %v1226_v37 = vmax.f32 %v1111_v12, %v1222_v56 }
 0x8e5   : > { %v1558_v21 = vmul.f32 0.2, %v1545_v5  ;;  %vm1554_vm8 = vcmp.ge.f32.partialorder %v1545_v5, 0.0  ;;  %v1450_v10 = vmul.f32 0.2, %v1441_v11  ;;  %vm1446_vm9 = vcmp.ge.f32.partialorder %v1441_v11, 0.0 }
 0x8e6   : > { %v1341_v49 = vmax.f32 %v1226_v37, %v1337_v33 }
 0x8e7   : > { %v1562_v28 = vsel %vm1554_vm8, %v1545_v5, %v1558_v21  ;;  %v1342_v5 = vmax.f32 %v1227_v6, %v1338_v55  ;;  %vm1331_vm8 = vcmp.ge.f32.partialorder %v1326_v60, 0.0 }
 0x8e8   : > { %v1566_v30 = vmax.f32 %v1455_v25, %v1562_v28  ;;  %v1456_v54 = vmax.f32 %v1341_v49, %v1452_v26  ;;  %v1339_v24 = vsel %vm1331_vm8, %v1326_v60, %v1335_v9  ;;  %v1454_v25 = vsel %vm1446_vm9, %v1441_v11, %v1450_v10 }
 0x8e9   : > { %v1343_v0 = vmax.f32 %v1228_v14, %v1339_v24 }
 0x8ea   : > { %v1546_v38 = vpop.f32.mrf.mxu3  ;;  %1570 = vxpose.xlu1.b32.start [1/4] (short) %v1566_v30, 128 }
 0x8eb   : > { %v1547_v43 = vadd.f32 %v1546_v38, %v2347_v62  ;;  %v1449_v62 = vmul.f32 0.2, %v1439_v41  ;;  %v1458_v28 = vmax.f32 %v1343_v0, %v1454_v25 }
 0x8ed   : > { %vm1555_vm0 = vcmp.ge.f32.partialorder %v1547_v43, 0.0  ;;  %v1559_v3 = vmul.f32 0.2, %v1547_v43  ;;  %v1453_v1 = vsel %vm1445_vm4, %v1439_v41, %v1449_v62 }
 0x8ee   : > { %v1457_v45 = vmax.f32 %v1342_v5, %v1453_v1 }
 0x8ef   : > { %v1563_v57 = vsel %vm1555_vm0, %v1547_v43, %v1559_v3 }
 0x8f0   : > { %v1567_v47 = vmax.f32 %v1456_v54, %v1563_v57 }
 0x8f2   : > { %1571 = vxpose.xlu1.b32.cont [2/4] (short) %v1567_v47, 128  ;;  %v1549_v7 = vpop.f32.mrf.mxu3 }
 0x8f3   : > { %v1550_v59 = vadd.f32 %v1549_v7, %v2351_v4 }
 0x8f5   : > { %vm1556_vm7 = vcmp.ge.f32.partialorder %v1550_v59, 0.0  ;;  %v1560_v15 = vmul.f32 0.2, %v1550_v59 }
 0x8f7   : > { %v1564_v40 = vsel %vm1556_vm7, %v1550_v59, %v1560_v15 }
 0x8f8   : > { %v1568_v21 = vmax.f32 %v1457_v45, %v1564_v40 }
 0x8fa   : > { %v1551_v4 = vpop.f32.mrf.mxu3  ;;  %1572 = vxpose.xlu1.b32.cont [3/4] (short) %v1568_v21, 128 }
 0x8fb   : > { %v1552_v56 = vadd.f32 %v1551_v4, %v2358_v52 }
 0x8fd   : > { %vm1557_vm10 = vcmp.ge.f32.partialorder %v1552_v56, 0.0  ;;  %v1561_v27 = vmul.f32 0.2, %v1552_v56 }
 0x8ff   : > { %v1565_v12 = vsel %vm1557_vm10, %v1552_v56, %v1561_v27 }
 0x900   : > { %v1569_v29 = vmax.f32 %v1458_v28, %v1565_v12 }
 0x902   : > { %1573 = vxpose.xlu1.b32.end [4/4] (short) %v1569_v29, 128 }
 0x98e   : > { %v1586_v52 = vpop.trf.xlu1 }
 0x98f   : > { %1602 = vst.msk [vmem:[%s2426_s12] sm:$0xff] %vm645_vm1, %v1586_v52 }
 0x996   : > { %v1587_v30 = vpop.trf.xlu1 }
 0x997   : > { %1603 = vst.msk [vmem:[%s2426_s12 + $0x8] sm:$0xff] %vm645_vm1, %v1587_v30 }
 0x99e   : > { %v1588_v32 = vpop.trf.xlu1 }
 0x99f   : > { %1604 = vst.msk [vmem:[%s2426_s12 + $0x10] sm:$0xff] %vm645_vm1, %v1588_v32 }
 0x9a6   : > { %v1589_v33 = vpop.trf.xlu1 }
 0x9a7   : > { %1605 = vst.msk [vmem:[%s2426_s12 + $0x18] sm:$0xff] %vm645_vm1, %v1589_v33 }
 0x9ae   : > { %v1590_v34 = vpop.trf.xlu1 }
 0x9af   : > { %1606 = vst.msk [vmem:[%s2426_s12 + $0x20] sm:$0xff] %vm645_vm1, %v1590_v34 }
 0x9b6   : > { %v1591_v35 = vpop.trf.xlu1 }
 0x9b7   : > { %1607 = vst.msk [vmem:[%s2426_s12 + $0x28] sm:$0xff] %vm645_vm1, %v1591_v35 }
 0x9be   : > { %v1592_v36 = vpop.trf.xlu1 }
 0x9bf   : > { %1608 = vst.msk [vmem:[%s2426_s12 + $0x30] sm:$0xff] %vm645_vm1, %v1592_v36 }
 0x9c6   : > { %v1593_v37 = vpop.trf.xlu1 }
 0x9c7   : > { %1609 = vst.msk [vmem:[%s2426_s12 + $0x38] sm:$0xff] %vm645_vm1, %v1593_v37 }
 0x9ce   : > { %v1594_v38 = vpop.trf.xlu1 }
 0x9cf   : > { %1610 = vst.msk [vmem:[%s2426_s12 + $0x40] sm:$0xff] %vm645_vm1, %v1594_v38 }
 0x9d6   : > { %v1595_v20 = vpop.trf.xlu1 }
 0x9d7   : > { %1611 = vst.msk [vmem:[%s2426_s12 + $0x48] sm:$0xff] %vm645_vm1, %v1595_v20 }
 0x9de   : > { %v1596_v26 = vpop.trf.xlu1 }
 0x9df   : > { %1612 = vst.msk [vmem:[%s2426_s12 + $0x50] sm:$0xff] %vm645_vm1, %v1596_v26 }
 0x9e6   : > { %v1597_v41 = vpop.trf.xlu1 }
 0x9e7   : > { %1613 = vst.msk [vmem:[%s2426_s12 + $0x58] sm:$0xff] %vm645_vm1, %v1597_v41 }
 0x9ee   : > { %v1598_v43 = vpop.trf.xlu1 }
 0x9ef   : > { %1614 = vst.msk [vmem:[%s2426_s12 + $0x60] sm:$0xff] %vm645_vm1, %v1598_v43 }
 0x9f6   : > { %v1599_v44 = vpop.trf.xlu1 }
 0x9f7   : > { %1615 = vst.msk [vmem:[%s2426_s12 + $0x68] sm:$0xff] %vm645_vm1, %v1599_v44 }
 0x9fe   : > { %v1600_v46 = vpop.trf.xlu1 }
 0x9ff   : > { %1616 = vst.msk [vmem:[%s2426_s12 + $0x70] sm:$0xff] %vm645_vm1, %v1600_v46 }
 0xa06   : > { %v1601_v48 = vpop.trf.xlu1 }
 0xa07   : > { %1617 = vst.msk [vmem:[%s2426_s12 + $0x78] sm:$0xff] %vm645_vm1, %v1601_v48 }
 0xa08 PF: > { %s16_s23 = sadd.s32 1, %s1951_s23   ;;  %s2476_s21 = smov %s1947_s22 }
 0xa09   : > { %p13_p5 = scmp.ge.s32.totalorder %s16_s23, 4   ;;  %s2477_s22 = smov %s2479_s24 }
 0xa0b   :  { %15 = sbr.rel (!%p13_p5) target bundleno = 2 (0x2), region = 83 }

</bundles_post_ra>
